<compile_context>
chip_gen: v6e
topology: v6e:2x2x1
jax: 0.10.0
libtpu: 0.0.40
codegen_flags: <defaults>
</compile_context>

<pallas_src>
import functools

import jax
import jax.numpy as jnp
from jax import lax
from jax.experimental import pallas as pl
from jax.experimental.pallas import tpu as pltpu


def _residual_block_down_kernel(xs_ref, w2_ref, w13_ref, out_ref,
                                *, H, W, Hs, Cin, Cout):
    # xs_ref : (1, 1, Hs+4, W+4, Cin) bf16 -- zero-padded input row strip (4-row halo)
    # w2_ref : (9*Cin, Cin)  bf16 -- 3x3 conv Cin->Cin, im2col (tap-major) layout
    # w13_ref: (10*Cin, Cout) bf16 -- [w1 (1x1, Cin rows) ; w3 (3x3 im2col, 9*Cin rows)]
    # out_ref: (1, 1, Hs//2, (W//2)*Cout) f32 -- pooled output strip, lane-dense
    Hp, Wp = Hs + 2, W + 2            # conv1 is evaluated on the padded grid
    Ho_s, Wo = Hs // 2, W // 2

    xp = xs_ref[0, 0]                                   # (Hs+4, W+4, Cin) bf16
    rxp = jnp.maximum(xp, 0.0)                          # relu(pad(x)) == pad(relu(x))
    xc = xp[2:Hs + 2, 2:W + 2, :]                       # center window for the 1x1 stream

    per_tap = Cin >= 128                                # static trace-time switch

    # ---- stream2 / conv1: ReLU -> 3x3 Cin->Cin conv, f32 accumulation on the MXU.
    if not per_tap:
        cols1 = jnp.concatenate(
            [rxp[ky:ky + Hp, kx:kx + Wp, :] for ky in range(3) for kx in range(3)],
            axis=-1).reshape(Hp * Wp, 9 * Cin)          # bf16 im2col
        h = jnp.dot(cols1, w2_ref[...], preferred_element_type=jnp.float32)
    else:
        # Per-tap K=Cin dots: each tap already fills the MXU K dim; avoids the
        # 9x-Cin im2col buffer (v7x 64 MiB VMEM).
        h = jnp.dot(rxp[0:Hp, 0:Wp, :].reshape(Hp * Wp, Cin), w2_ref[0:Cin, :],
                    preferred_element_type=jnp.float32)
        for t in range(1, 9):
            ky, kx = divmod(t, 3)
            h = h + jnp.dot(rxp[ky:ky + Hp, kx:kx + Wp, :].reshape(Hp * Wp, Cin),
                            w2_ref[t * Cin:(t + 1) * Cin, :],
                            preferred_element_type=jnp.float32)
    h = h.reshape(Hp, Wp, Cin)

    # Zero the GLOBAL 1-pixel border of conv1's output (reproduces torch's SAME
    # padding for conv2). 2D mask, broadcast over channels; cast to bf16 once.
    r0 = pl.program_id(1) * Hs                          # strip's global padded-row offset
    pi = lax.broadcasted_iota(jnp.int32, (Hp, Wp, 1), 0) + r0
    qi = lax.broadcasted_iota(jnp.int32, (Hp, Wp, 1), 1)
    interior = (pi >= 1) & (pi <= H) & (qi >= 1) & (qi <= W)
    hpad = jnp.where(interior, jnp.maximum(h, 0.0), 0.0).astype(jnp.bfloat16)

    # ---- fused stream1 (1x1) + stream2 / conv2 (3x3 Cin->Cout): ONE MXU matmul.
    if not per_tap:
        cols2 = jnp.concatenate(
            [xc] + [hpad[ky:ky + Hs, kx:kx + W, :] for ky in range(3) for kx in range(3)],
            axis=-1).reshape(Hs * W, 10 * Cin)          # bf16 im2col (center tap first)
        s = jnp.dot(cols2, w13_ref[...], preferred_element_type=jnp.float32)
    else:
        s = jnp.dot(xc.reshape(Hs * W, Cin), w13_ref[0:Cin, :],
                    preferred_element_type=jnp.float32)
        for t in range(9):
            ky, kx = divmod(t, 3)
            s = s + jnp.dot(hpad[ky:ky + Hs, kx:kx + W, :].reshape(Hs * W, Cin),
                            w13_ref[(t + 1) * Cin:(t + 2) * Cin, :],
                            preferred_element_type=jnp.float32)

    # ---- 2x2/2 average pool on the VPU (no pooling matmul); lane-dense store.
    s = s.reshape(Ho_s, 2, W, Cout)
    sh = s[:, 0] + s[:, 1]                              # pool rows -> (Ho_s, W, Cout)
    sh = sh.reshape(Ho_s, Wo, 2, Cout)
    pooled = (sh[:, :, 0, :] + sh[:, :, 1, :]) * 0.25   # pool cols -> (Ho_s, Wo, Cout)
    out_ref[0, 0] = pooled.reshape(Ho_s, Wo * Cout)


def _vmem_limit_bytes():
    # ~75% of physical VMEM (96 MiB on v5e/v6e, 48 MiB on v7x), capped at 100 MiB.
    try:
        cap = int(pltpu.get_tpu_info().vmem_capacity_bytes)
    except Exception:
        cap = 64 * 1024 * 1024
    return min((cap * 3) // 4, 100 * 1024 * 1024)


def _num_row_strips(Ho, target_pooled_rows=4):
    ns = max(1, Ho // target_pooled_rows)
    while Ho % ns:
        ns -= 1
    return ns


def residual_block_down(x_nchw, w1, w2, w3, *, n_strips=None):
    """x_nchw: (B, Cin, H, W); w1: (Cin, Cout); w2: (9, Cin, Cin); w3: (9, Cin, Cout).

    w2[ky*3+kx, i, o] / w3[ky*3+kx, i, o] correspond to torch Conv2d weight[o, i, ky, kx].
    Returns (B, Cout, H//2, W//2) float32.
    """
    B, Cin, H, W = x_nchw.shape
    Cout = w1.shape[1]
    assert H % 2 == 0 and W % 2 == 0, "AvgPool2d(2,2) path assumes even H, W"
    Ho, Wo = H // 2, W // 2
    if n_strips is None:
        n_strips = _num_row_strips(Ho)
    assert Ho % n_strips == 0
    Ho_s = Ho // n_strips
    Hs = 2 * Ho_s                                        # unpooled rows per strip

    # bf16 NHWC + zero pad(2): every matmul operand is bf16 in-kernel anyway
    # (relu commutes with the bf16 round), so this halves HBM->VMEM DMA bytes.
    x = jnp.transpose(x_nchw, (0, 2, 3, 1)).astype(jnp.bfloat16)      # NHWC bf16
    xp = jnp.pad(x, ((0, 0), (2, 2), (2, 2), (0, 0)))                 # (B, H+4, W+4, Cin)
    # Overlapping row strips (4-row halo) materialized outside the kernel so the
    # Pallas blocks remain standard non-overlapping Blocked tiles.
    x_strips = jnp.stack([xp[:, s * Hs:s * Hs + Hs + 4] for s in range(n_strips)],
                         axis=1)                                      # (B, ns, Hs+4, W+4, Cin)

    # bf16 weights (MXU-native); w1 stacked on top of the im2col-layout w3.
    w2b = w2.reshape(9 * Cin, Cin).astype(jnp.bfloat16)               # (9*Cin, Cin)
    w13b = jnp.concatenate([w1, w3.reshape(9 * Cin, Cout)],
                           axis=0).astype(jnp.bfloat16)               # (10*Cin, Cout)

    kernel = functools.partial(_residual_block_down_kernel,
                               H=H, W=W, Hs=Hs, Cin=Cin, Cout=Cout)

    out = pl.pallas_call(
        kernel,
        out_shape=jax.ShapeDtypeStruct((B, n_strips, Ho_s, Wo * Cout), jnp.float32),
        grid_spec=pltpu.PrefetchScalarGridSpec(
            num_scalar_prefetch=0,
            grid=(B, n_strips),
            in_specs=[
                pl.BlockSpec((1, 1, Hs + 4, W + 4, Cin), lambda b, s: (b, s, 0, 0, 0)),
                pl.BlockSpec((9 * Cin, Cin), lambda b, s: (0, 0)),
                pl.BlockSpec((10 * Cin, Cout), lambda b, s: (0, 0)),
            ],
            out_specs=pl.BlockSpec((1, 1, Ho_s, Wo * Cout), lambda b, s: (b, s, 0, 0)),
        ),
        compiler_params=pltpu.CompilerParams(
            dimension_semantics=("parallel", "parallel"),
            vmem_limit_bytes=_vmem_limit_bytes(),
        ),
    )(x_strips, w2b, w13b)

    out = out.reshape(B, Ho, Wo, Cout)                                # strips are row blocks
    return jnp.transpose(out, (0, 3, 1, 2))                           # NCHW


# ----------------------------- pure-JAX reference -----------------------------
def _avgpool2(y_nhwc):
    B, H, W, C = y_nhwc.shape
    return y_nhwc.reshape(B, H // 2, 2, W // 2, 2, C).mean(axis=(2, 4))


def residual_block_down_ref(x_nchw, w1, w2, w3):
    B, Cin, H, W = x_nchw.shape
    Cout = w1.shape[1]
    x = jnp.transpose(x_nchw, (0, 2, 3, 1)).astype(jnp.float32)
    dn = ('NHWC', 'HWIO', 'NHWC')

    k1 = w1.reshape(1, 1, Cin, Cout)
    s1 = lax.conv_general_dilated(x, k1, (1, 1), 'VALID', dimension_numbers=dn)
    s1 = _avgpool2(s1)

    r = jnp.maximum(x, 0.0)
    k2 = w2.reshape(3, 3, Cin, Cin)
    h = lax.conv_general_dilated(r, k2, (1, 1), 'SAME', dimension_numbers=dn)
    h = jnp.maximum(h, 0.0)
    k3 = w3.reshape(3, 3, Cin, Cout)
    s2 = lax.conv_general_dilated(h, k3, (1, 1), 'SAME', dimension_numbers=dn)
    s2 = _avgpool2(s2)

    out = s1 + s2
    return jnp.transpose(out, (0, 3, 1, 2))


if __name__ == "__main__":
    B, Cin, Cout, H, W = 2, 4, 8, 16, 16

    key = jax.random.PRNGKey(0)
    k1, k2, k3, kx = jax.random.split(key, 4)
    # Deterministic synthetic parameters (shapes follow the torch module; no checkpoint load).
    w1 = jax.random.normal(k1, (Cin, Cout), jnp.float32) * 0.2        # 1x1 conv, Cin->Cout
    w2 = jax.random.normal(k2, (9, Cin, Cin), jnp.float32) * 0.2      # 3x3 conv, Cin->Cin
    w3 = jax.random.normal(k3, (9, Cin, Cout), jnp.float32) * 0.2     # 3x3 conv, Cin->Cout
    x = jax.random.normal(kx, (B, Cin, H, W), jnp.float32)

    out = jax.block_until_ready(residual_block_down(x, w1, w2, w3))
    ref = jax.block_until_ready(residual_block_down_ref(x, w1, w2, w3))

    assert out.shape == (B, Cout, H // 2, W // 2), out.shape
    max_err = float(jnp.max(jnp.abs(out - ref)))
    # bf16 matmul operands / bf16 input (f32 accumulation) vs. a pure-f32 reference.
    assert max_err < 1e-1, f"max abs error {max_err}"
    print("KERNEL_OK")
</pallas_src>

<mosaic_0001>
module attributes {stable_mosaic.version = 11 : i64} {
  func.func @_residual_block_down_kernel(%arg0: i32, %arg1: i32, %arg2: memref<1x1x12x20x4xbf16, #tpu.memory_space<vmem>>, %arg3: memref<36x4xbf16, #tpu.memory_space<vmem>>, %arg4: memref<40x8xbf16, #tpu.memory_space<vmem>>, %arg5: memref<1x1x4x64xf32, #tpu.memory_space<vmem>>) attributes {dimension_semantics = [#tpu.dimension_semantics<parallel>, #tpu.dimension_semantics<parallel>], iteration_bounds = array<i64: 2, 2>, scalar_prefetch = 0 : i64, scratch_operands = 0 : i64, tpu.core_type = #tpu.core_type<tc>, window_params = [{transform_indices = @transform_0, window_bounds = array<i64: 1, 1, 12, 20, 4>}, {pipeline_mode = #tpu.pipeline_mode<synchronous>, transform_indices = @transform_1, window_bounds = array<i64: 36, 4>}, {pipeline_mode = #tpu.pipeline_mode<synchronous>, transform_indices = @transform_2, window_bounds = array<i64: 40, 8>}, {transform_indices = @transform_3, window_bounds = array<i64: 1, 1, 4, 64>}]} {
    %c0 = arith.constant 0 : index
    %c0_0 = arith.constant 0 : index
    %c0_1 = arith.constant 0 : index
    %c0_2 = arith.constant 0 : index
    %c0_3 = arith.constant 0 : index
    %0 = vector.load %arg2[%c0, %c0_0, %c0_1, %c0_2, %c0_3] : memref<1x1x12x20x4xbf16, #tpu.memory_space<vmem>>, vector<1x1x12x20x4xbf16>
    %1 = vector.shape_cast %0 : vector<1x1x12x20x4xbf16> to vector<12x20x4xbf16>
    %cst = arith.constant 0.000000e+00 : bf16
    %2 = vector.broadcast %cst : bf16 to vector<12x20x4xbf16>
    %3 = arith.maximumf %1, %2 : vector<12x20x4xbf16>
    %4 = vector.extract_strided_slice %1 {offsets = [2, 2, 0], sizes = [8, 16, 4], strides = [1, 1, 1]} : vector<12x20x4xbf16> to vector<8x16x4xbf16>
    %5 = vector.extract_strided_slice %3 {offsets = [0, 0, 0], sizes = [10, 18, 4], strides = [1, 1, 1]} : vector<12x20x4xbf16> to vector<10x18x4xbf16>
    %6 = vector.extract_strided_slice %3 {offsets = [0, 1, 0], sizes = [10, 18, 4], strides = [1, 1, 1]} : vector<12x20x4xbf16> to vector<10x18x4xbf16>
    %7 = vector.extract_strided_slice %3 {offsets = [0, 2, 0], sizes = [10, 18, 4], strides = [1, 1, 1]} : vector<12x20x4xbf16> to vector<10x18x4xbf16>
    %8 = vector.extract_strided_slice %3 {offsets = [1, 0, 0], sizes = [10, 18, 4], strides = [1, 1, 1]} : vector<12x20x4xbf16> to vector<10x18x4xbf16>
    %9 = vector.extract_strided_slice %3 {offsets = [1, 1, 0], sizes = [10, 18, 4], strides = [1, 1, 1]} : vector<12x20x4xbf16> to vector<10x18x4xbf16>
    %10 = vector.extract_strided_slice %3 {offsets = [1, 2, 0], sizes = [10, 18, 4], strides = [1, 1, 1]} : vector<12x20x4xbf16> to vector<10x18x4xbf16>
    %11 = vector.extract_strided_slice %3 {offsets = [2, 0, 0], sizes = [10, 18, 4], strides = [1, 1, 1]} : vector<12x20x4xbf16> to vector<10x18x4xbf16>
    %12 = vector.extract_strided_slice %3 {offsets = [2, 1, 0], sizes = [10, 18, 4], strides = [1, 1, 1]} : vector<12x20x4xbf16> to vector<10x18x4xbf16>
    %13 = vector.extract_strided_slice %3 {offsets = [2, 2, 0], sizes = [10, 18, 4], strides = [1, 1, 1]} : vector<12x20x4xbf16> to vector<10x18x4xbf16>
    %14 = tpu.concatenate %5, %6, %7, %8, %9, %10, %11, %12, %13 in 2 : vector<10x18x4xbf16>, vector<10x18x4xbf16>, vector<10x18x4xbf16>, vector<10x18x4xbf16>, vector<10x18x4xbf16>, vector<10x18x4xbf16>, vector<10x18x4xbf16>, vector<10x18x4xbf16>, vector<10x18x4xbf16> -> vector<10x18x36xbf16>
    %15 = vector.shape_cast %14 : vector<10x18x36xbf16> to vector<180x36xbf16>
    %c0_4 = arith.constant 0 : index
    %c0_5 = arith.constant 0 : index
    %16 = vector.load %arg3[%c0_4, %c0_5] : memref<36x4xbf16, #tpu.memory_space<vmem>>, vector<36x4xbf16>
    %cst_6 = arith.constant dense<0.000000e+00> : vector<180x4xf32>
    %17 = tpu.matmul %15, %16, %cst_6 {dimension_numbers = #tpu.dot_dimension_numbers<[1], [0], [0], [1], [0, 0, 1, 1], [], []>} : vector<180x36xbf16>, vector<36x4xbf16>, vector<180x4xf32> -> vector<180x4xf32>
    %18 = vector.shape_cast %17 : vector<180x4xf32> to vector<10x18x4xf32>
    %c8_i32 = arith.constant 8 : i32
    %19 = arith.muli %arg1, %c8_i32 : i32
    %20 = tpu.iota {dimensions = array<i32: 0>} : vector<10x18x1xi32>
    %21 = vector.broadcast %19 : i32 to vector<10x18x1xi32>
    %22 = arith.addi %20, %21 : vector<10x18x1xi32>
    %23 = tpu.iota {dimensions = array<i32: 1>} : vector<10x18x1xi32>
    %c1_i32 = arith.constant 1 : i32
    %24 = vector.broadcast %c1_i32 : i32 to vector<10x18x1xi32>
    %25 = arith.cmpi sge, %22, %24 : vector<10x18x1xi32>
    %c16_i32 = arith.constant 16 : i32
    %26 = vector.broadcast %c16_i32 : i32 to vector<10x18x1xi32>
    %27 = arith.cmpi sle, %22, %26 : vector<10x18x1xi32>
    %28 = arith.andi %25, %27 : vector<10x18x1xi1>
    %c1_i32_7 = arith.constant 1 : i32
    %29 = vector.broadcast %c1_i32_7 : i32 to vector<10x18x1xi32>
    %30 = arith.cmpi sge, %23, %29 : vector<10x18x1xi32>
    %31 = arith.andi %28, %30 : vector<10x18x1xi1>
    %c16_i32_8 = arith.constant 16 : i32
    %32 = vector.broadcast %c16_i32_8 : i32 to vector<10x18x1xi32>
    %33 = arith.cmpi sle, %23, %32 : vector<10x18x1xi32>
    %34 = arith.andi %31, %33 : vector<10x18x1xi1>
    %cst_9 = arith.constant 0.000000e+00 : f32
    %35 = vector.broadcast %cst_9 : f32 to vector<10x18x4xf32>
    %36 = arith.maximumf %18, %35 : vector<10x18x4xf32>
    %cst_10 = arith.constant 0.000000e+00 : f32
    %37 = vector.shape_cast %34 : vector<10x18x1xi1> to vector<10x18x1xi1>
    %38 = vector.broadcast %37 : vector<10x18x1xi1> to vector<10x18x4xi1>
    %39 = vector.broadcast %cst_10 : f32 to vector<10x18x4xf32>
    %40 = arith.select %38, %36, %39 : vector<10x18x4xi1>, vector<10x18x4xf32>
    %41 = arith.truncf %40 : vector<10x18x4xf32> to vector<10x18x4xbf16>
    %42 = vector.extract_strided_slice %41 {offsets = [0, 0, 0], sizes = [8, 16, 4], strides = [1, 1, 1]} : vector<10x18x4xbf16> to vector<8x16x4xbf16>
    %43 = vector.extract_strided_slice %41 {offsets = [0, 1, 0], sizes = [8, 16, 4], strides = [1, 1, 1]} : vector<10x18x4xbf16> to vector<8x16x4xbf16>
    %44 = vector.extract_strided_slice %41 {offsets = [0, 2, 0], sizes = [8, 16, 4], strides = [1, 1, 1]} : vector<10x18x4xbf16> to vector<8x16x4xbf16>
    %45 = vector.extract_strided_slice %41 {offsets = [1, 0, 0], sizes = [8, 16, 4], strides = [1, 1, 1]} : vector<10x18x4xbf16> to vector<8x16x4xbf16>
    %46 = vector.extract_strided_slice %41 {offsets = [1, 1, 0], sizes = [8, 16, 4], strides = [1, 1, 1]} : vector<10x18x4xbf16> to vector<8x16x4xbf16>
    %47 = vector.extract_strided_slice %41 {offsets = [1, 2, 0], sizes = [8, 16, 4], strides = [1, 1, 1]} : vector<10x18x4xbf16> to vector<8x16x4xbf16>
    %48 = vector.extract_strided_slice %41 {offsets = [2, 0, 0], sizes = [8, 16, 4], strides = [1, 1, 1]} : vector<10x18x4xbf16> to vector<8x16x4xbf16>
    %49 = vector.extract_strided_slice %41 {offsets = [2, 1, 0], sizes = [8, 16, 4], strides = [1, 1, 1]} : vector<10x18x4xbf16> to vector<8x16x4xbf16>
    %50 = vector.extract_strided_slice %41 {offsets = [2, 2, 0], sizes = [8, 16, 4], strides = [1, 1, 1]} : vector<10x18x4xbf16> to vector<8x16x4xbf16>
    %51 = tpu.concatenate %4, %42, %43, %44, %45, %46, %47, %48, %49, %50 in 2 : vector<8x16x4xbf16>, vector<8x16x4xbf16>, vector<8x16x4xbf16>, vector<8x16x4xbf16>, vector<8x16x4xbf16>, vector<8x16x4xbf16>, vector<8x16x4xbf16>, vector<8x16x4xbf16>, vector<8x16x4xbf16>, vector<8x16x4xbf16> -> vector<8x16x40xbf16>
    %52 = vector.shape_cast %51 : vector<8x16x40xbf16> to vector<128x40xbf16>
    %c0_11 = arith.constant 0 : index
    %c0_12 = arith.constant 0 : index
    %53 = vector.load %arg4[%c0_11, %c0_12] : memref<40x8xbf16, #tpu.memory_space<vmem>>, vector<40x8xbf16>
    %cst_13 = arith.constant dense<0.000000e+00> : vector<128x8xf32>
    %54 = tpu.matmul %52, %53, %cst_13 {dimension_numbers = #tpu.dot_dimension_numbers<[1], [0], [0], [1], [0, 0, 1, 1], [], []>} : vector<128x40xbf16>, vector<40x8xbf16>, vector<128x8xf32> -> vector<128x8xf32>
    %55 = vector.shape_cast %54 : vector<128x8xf32> to vector<4x2x16x8xf32>
    %56 = vector.extract_strided_slice %55 {offsets = [0, 0, 0, 0], sizes = [4, 1, 16, 8], strides = [1, 1, 1, 1]} : vector<4x2x16x8xf32> to vector<4x1x16x8xf32>
    %57 = vector.shape_cast %56 : vector<4x1x16x8xf32> to vector<4x16x8xf32>
    %58 = vector.extract_strided_slice %55 {offsets = [0, 1, 0, 0], sizes = [4, 1, 16, 8], strides = [1, 1, 1, 1]} : vector<4x2x16x8xf32> to vector<4x1x16x8xf32>
    %59 = vector.shape_cast %58 : vector<4x1x16x8xf32> to vector<4x16x8xf32>
    %60 = arith.addf %57, %59 : vector<4x16x8xf32>
    %61 = vector.shape_cast %60 : vector<4x16x8xf32> to vector<4x8x2x8xf32>
    %62 = vector.extract_strided_slice %61 {offsets = [0, 0, 0, 0], sizes = [4, 8, 1, 8], strides = [1, 1, 1, 1]} : vector<4x8x2x8xf32> to vector<4x8x1x8xf32>
    %63 = vector.shape_cast %62 : vector<4x8x1x8xf32> to vector<4x8x8xf32>
    %64 = vector.extract_strided_slice %61 {offsets = [0, 0, 1, 0], sizes = [4, 8, 1, 8], strides = [1, 1, 1, 1]} : vector<4x8x2x8xf32> to vector<4x8x1x8xf32>
    %65 = vector.shape_cast %64 : vector<4x8x1x8xf32> to vector<4x8x8xf32>
    %66 = arith.addf %63, %65 : vector<4x8x8xf32>
    %cst_14 = arith.constant 2.500000e-01 : f32
    %67 = vector.broadcast %cst_14 : f32 to vector<4x8x8xf32>
    %68 = arith.mulf %66, %67 : vector<4x8x8xf32>
    %69 = vector.shape_cast %68 : vector<4x8x8xf32> to vector<4x64xf32>
    %c0_15 = arith.constant 0 : index
    %c0_16 = arith.constant 0 : index
    %c0_17 = arith.constant 0 : index
    %c0_18 = arith.constant 0 : index
    %70 = vector.load %arg5[%c0_15, %c0_16, %c0_17, %c0_18] : memref<1x1x4x64xf32, #tpu.memory_space<vmem>>, vector<1x1x4x64xf32>
    %71 = vector.shape_cast %70 : vector<1x1x4x64xf32> to vector<4x64xf32>
    %72 = vector.shape_cast %69 : vector<4x64xf32> to vector<1x1x4x64xf32>
    tpu.vector_store %arg5[%c0_15, %c0_16, %c0_17, %c0_18], %72 {strides = array<i32>} : memref<1x1x4x64xf32, #tpu.memory_space<vmem>>, vector<1x1x4x64xf32>,
    return
  }
  func.func @transform_0(%arg0: i32, %arg1: i32) -> (i32, i32, i32, i32, i32) {
    %c0_i32 = arith.constant 0 : i32
    %c0_i32_0 = arith.constant 0 : i32
    %c0_i32_1 = arith.constant 0 : i32
    %c0_i32_2 = arith.constant 0 : i32
    return %arg0, %arg1, %c0_i32, %c0_i32_0, %c0_i32_1 : i32, i32, i32, i32, i32
  }
  func.func @transform_1(%arg0: i32, %arg1: i32) -> (i32, i32) {
    %c0_i32 = arith.constant 0 : i32
    %c0_i32_0 = arith.constant 0 : i32
    %c0_i32_1 = arith.constant 0 : i32
    return %c0_i32, %c0_i32_0 : i32, i32
  }
  func.func @transform_2(%arg0: i32, %arg1: i32) -> (i32, i32) {
    %c0_i32 = arith.constant 0 : i32
    %c0_i32_0 = arith.constant 0 : i32
    %c0_i32_1 = arith.constant 0 : i32
    return %c0_i32, %c0_i32_0 : i32, i32
  }
  func.func @transform_3(%arg0: i32, %arg1: i32) -> (i32, i32, i32, i32) {
    %c0_i32 = arith.constant 0 : i32
    %c0_i32_0 = arith.constant 0 : i32
    %c0_i32_1 = arith.constant 0 : i32
    return %arg0, %arg1, %c0_i32, %c0_i32_0 : i32, i32, i32, i32
  }
}

</mosaic_0001>

<bundles_post_ra>
// kernel: tpu_custom_call.1
= control target key start
LH: loop header
LB: loop body
LE: loop exit
PB: predicated region body
PF: predicated region fallthrough
CT: control target
= control target key end

     0   :  { %8 = vsyncpa [#allocation3], 0  ;;  %s8625_s0 = inlined_call_operand.vmem [shape: bf16[2,2,12,20,4], index: 0, kind: input, shape index: {}]   ;;  %s8626_s1 = inlined_call_operand.vmem [shape: bf16[36,4], index: 1, kind: input, shape index: {}]   ;;  %s8627_s2 = inlined_call_operand.vmem [shape: bf16[40,8], index: 2, kind: input, shape index: {}]   ;;  %s8628_s3 = inlined_call_operand.hbm [shape: f32[2,2,4,64], index: 3, kind: output, shape index: {}]  }
   0x1   :  { %10 = vsyncpa [#allocation3 + $0x1], 0  ;;  %s6135_s12 = smov 0   ;;  %s6137_s13 = smov 0  }
   0x2   :  { %s6139_s14 = smov 0   ;;  %s6141_s15 = smov 0  }
   0x3   :  { %s6143_s16 = smov 0   ;;  %s6145_s17 = smov 0  }
   0x4   :  { %s6147_s18 = smov 0   ;;  %s6149_s19 = smov 0  }
   0x5 LB: > { %s5664_s20 = sadd.s32 4294967295, %s6096_s19   ;;  %s5665_s21 = sadd.s32 4294967294, %s6096_s19   ;;  %s6096_s19 = sphi %s6149_s19, %s16_s19   ;;  %s6092_s18 = sphi %s6147_s18, %s8699_s18   ;;  %s6088_s17 = sphi %s6145_s17, %s8698_s17   ;;  %s6084_s16 = sphi %s6143_s16, %s8697_s16   ;;  %s6080_s15 = sphi %s6141_s15, %s8696_s15   ;;  %s6076_s14 = sphi %s6139_s14, %s8695_s14   ;;  %s6072_s13 = sphi %s6137_s13, %s8694_s13   ;;  %s6068_s12 = sphi %s6135_s12, %s8693_s12  }
   0x6   : > { %s25_s22 = sadd.s32 1, %s6088_s17  ;;  %s28_s23 = sadd.s32 1, %s6092_s18 }
   0x7   : > { %p26_p0 = scmp.ge.s32.totalorder %s25_s22, 2  ;;  %p117_p1 = scmp.ne.s32.totalorder %s6076_s14, %s6072_s13 }
   0x8   : > { %p118_p2 = scmp.eq.s32.totalorder %s5664_s20, 3  ;;  %p123_p5 = scmp.ne.s32.totalorder %s6072_s13, %s6068_s12 }
   0x9   : > { %s8701_s22 = smov (%p26_p0, %s25_s22), 0  ;;  %s8703_s23 = smov (!%p26_p0, %s28_s23), %s6092_s18 }
   0xa   : > { %s103_s24 = ssub.s32 %s6088_s17, %s8701_s22  ;;  %p6186_p3 = por %p118_p2, %p117_p1 }
   0xb   : > { %p30_p4 = scmp.ge.s32.totalorder %s8703_s23, 2  ;;  %p124_p6 = scmp.eq.s32.totalorder %s5665_s21, 3 }
   0xc   : > { %p5668_p7 = scmp.ge.s32.totalorder %s6096_s19, 1  ;;  %p160_p9 = scmp.lt.s32.totalorder %s6096_s19, 5 }
   0xd   : > { %s8705_s23 = smov (%p30_p4, %s8703_s23), 0  ;;  %p6195_p8 = por %p124_p6, %p123_p5 }
   0xe   : > { %s102_s27 = ssub.s32 %s6092_s18, %s8705_s23  ;;  %s107_s28 = sadd.s32 1, %s6076_s14 }
   0xf   : > { %s104_s29 = sor.u32 %s103_s24, %s102_s27  ;;  %p161_p10 = pnand %p5668_p7, %p160_p9 }
  0x10   : > { %p105_p11 = scmp.eq.s32.totalorder %s104_s29, 0  ;;  %p188_p12 = scmp.lt.s32.totalorder (!%p161_p10), %s6084_s16, 1 }
  0x11   : > { %164 = sbr.rel (%p161_p10) target bundleno = 1247 (0x4df), region = 32  ;;  %p190_p13 = scmp.lt.s32.totalorder (!%p161_p10), %s6080_s15, 1 }
  0x12   : > { %s6204_s30 = scalar_select %p105_p11, %s6076_s14, %s107_s28  }
  0x13   : > { %s6099_s21 = smov (!%p161_p10), 12   ;;  %s6100_s24 = smov (!%p161_p10), 24  }
  0x14   : > { %s6101_s27 = smov (!%p161_p10), 20   ;;  %s6102_s28 = smov (!%p161_p10), 8  }
  0x15   : > { %s6103_s29 = smov (!%p161_p10), 4   ;;  %s6114_s11 = smov (!%p161_p10), [#allocation2]  }
  0x16   : > { %s189_s4 = scalar_select %p188_p12, %s6084_s16, 1  ;;  %v6098_v3 = vmov 0   ;;  %vm8629_vm0 = vcmask 1046528   ;;  %vm350_vm1 = vsmask.f32 7424  ;;  %vm2493_vm2 = vcmask 1041408  }
  0x17   : > { %s191_s5 = scalar_select %p190_p13, %s6080_s15, 1  ;;  %vm904_vm3 = vcmask 31744   ;;  %vm945_vm4 = vcmask 64512   ;;  %vm986_vm5 = vcmask 97280   ;;  %vm1027_vm6 = vcmask 130048  }
  0x18   : > { %s5870_s6 = smul.u32 72, %s189_s4  ;;  %s6104_s4 = smov 16   ;;  %vm1068_vm7 = vcmask 162816   ;;  %vm1109_vm8 = vcmask 195584   ;;  %vm1150_vm9 = vcmask 228352   ;;  %vm8631_vm10 = vcmask 261120  }
  0x19   : > { %s5869_s7 = smul.u32 36, %s191_s5  ;;  %s6105_s5 = smov 28   ;;  %vm8630_vm11 = vcmask 293888  }
  0x1b   : > { %s194_s8 = sadd.s32 %s5870_s6, %s5869_s7  ;;  %s6106_s6 = smov 32  }
  0x1c   : > { %s5670_s9 = sshll.u32 %s194_s8, 2  ;;  %s5720_s8 = sshll.u32 %s6080_s15, 3 }
  0x1d   : > { %s6213_s20 = scalar_lea.vmem %s8625_s0, %s5670_s9  ;;  %s6109_s9 = smov 36  }
  0x1e   : > { %v204_v0 = vld [vmem:[%s6213_s20 + $0x18] sm:$0xf]  ;;  %v205_v1 = vld [vmem:[%s6213_s20 + $0x1c] sm:$0xf]  ;;  %v201_v2 = vld [vmem:[%s6213_s20 + $0xc] sm:$0xf] }
  0x1f   : > { %v240_v4 = vmax.bf16 %v6098_v3, %v204_v0  ;;  %v241_v5 = vmax.bf16 %v6098_v3, %v205_v1  ;;  %v202_v6 = vld [vmem:[%s6213_s20 + $0x10] sm:$0xf]  ;;  %v237_v7 = vmax.bf16 %v6098_v3, %v201_v2  ;;  %v203_v8 = vld [vmem:[%s6213_s20 + $0x14] sm:$0x3]  ;;  %v206_v9 = vld [vmem:[%s6213_s20 + $0x20] sm:$0x3] }
  0x20   : > { %v238_v10 = vmax.bf16 %v6098_v3, %v202_v6  ;;  %v239_v11 = vmax.bf16 %v6098_v3, %v203_v8  ;;  %v242_v12 = vmax.bf16 %v6098_v3, %v206_v9  ;;  %v198_v13 = vld [vmem:[%s6213_s20] sm:$0xf]  ;;  %v199_v14 = vld [vmem:[%s6213_s20 + $0x4] sm:$0xf]  ;;  %v200_v15 = vld [vmem:[%s6213_s20 + $0x8] sm:$0x3] }
  0x21   : > { %v6230_v16 = vcombine.low %v240_v4, %v241_v5  ;;  %v234_v17 = vmax.bf16 %v6098_v3, %v198_v13  ;;  %v235_v18 = vmax.bf16 %v6098_v3, %v199_v14  ;;  %v236_v19 = vmax.bf16 %v6098_v3, %v200_v15  ;;  %v207_v45 = vld [vmem:[%s6213_s20 + $0x24] sm:$0xf]  ;;  %v208_v46 = vld [vmem:[%s6213_s20 + $0x28] sm:$0xf]  ;;  %v209_v56 = vld [vmem:[%s6213_s20 + $0x2c] sm:$0x3] }
  0x22   : > { %v6235_v20 = vcombine.low %v237_v7, %v238_v10  ;;  %v6237_v21 = vcombine.low %v239_v11, %v239_v11  ;;  %v6239_v22 = vcombine.low %v242_v12, %v242_v12  ;;  %v243_v51 = vmax.bf16 %v6098_v3, %v207_v45  ;;  %v210_v13 = vld [vmem:[%s6213_s20 + $0x30] sm:$0xf]  ;;  %v211_v14 = vld [vmem:[%s6213_s20 + $0x34] sm:$0xf] }
  0x23   : > { %624 = vrot.lane.b32.xlu1 %v6230_v16, %s6099_s21  ;;  %v6243_v23 = vcombine.low %v234_v17, %v235_v18  ;;  %v6245_v24 = vcombine.low %v236_v19, %v236_v19  ;;  %v548_v27 = vrot.slane %v6230_v16, 1  ;;  %v384_v40 = vshll.u32 %v6230_v16, 16  ;;  %v212_v19 = vld [vmem:[%s6213_s20 + $0x38] sm:$0x3] }
  0x24   : > { %620 = vrot.lane.b32.xlu0 %v6235_v20, %s6099_s21  ;;  %v545_v25 = vrot.slane %v6235_v20, 1  ;;  %v6251_v26 = vrot.slane %v6237_v21, 1  ;;  %v6255_v28 = vrot.slane %v6239_v22, 1  ;;  %v369_v36 = vshll.u32 %v6235_v20, 16 }
  0x25   : > { %v542_v29 = vrot.slane %v6243_v23, 1  ;;  %v543_v30 = vrot.slane %v6245_v24, 1  ;;  %v352_v31 = vshrl.u32 %v6243_v23, 16  ;;  %v354_v32 = vshll.u32 %v6243_v23, 16 }
  0x26   : > { %v547_v33 = vsel %vm8629_vm0, %v545_v25, %v6251_v26  ;;  %v359_v34 = vshll.u32 %v6245_v24, 16  ;;  %v6270_v37 = vsel %vm8629_vm0, %v548_v27, %v6255_v28  ;;  %v367_v39 = vshrl.u32 %v6235_v20, 16 }
  0x27   : > { %766 = vrot.lane.b32.xlu1 %v6230_v16, %s6100_s24  ;;  %v356_v35 = vrot.slane %v354_v32, 1  ;;  %v544_v38 = vsel %vm8629_vm0, %v542_v29, %v543_v30  ;;  %v371_v43 = vrot.slane %v369_v36, 1  ;;  %v374_v44 = vshll.u32 %v6237_v21, 16 }
  0x28   : > { %718 = vrot.lane.b32.xlu0 %v547_v33, %s6101_s27  ;;  %v361_v42 = vrot.slane %v359_v34, 1  ;;  %v363_v47 = vshrl.u32 %v6245_v24, 16  ;;  %v382_v48 = vshrl.u32 %v6230_v16, 16  ;;  %v386_v49 = vrot.slane %v384_v40, 1 }
  0x29   : > { %v357_v41 = vor.u32 %v356_v35, %v352_v31  ;;  %v389_v50 = vshll.u32 %v6239_v22, 16  ;;  %v372_v53 = vor.u32 %v371_v43, %v367_v39  ;;  %v376_v54 = vrot.slane %v374_v44, 1  ;;  %v213_v43 = vld [vmem:[%s6213_s20 + $0x3c] sm:$0xf]  ;;  %v214_v44 = vld [vmem:[%s6213_s20 + $0x40] sm:$0xf] }
  0x2a   : > { %v244_v55 = vmax.bf16 %v6098_v3, %v208_v46  ;;  %v365_v57 = vor.u32 %v363_v47, %v361_v42  ;;  %v387_v58 = vor.u32 %v386_v49, %v382_v48  ;;  %v245_v62 = vmax.bf16 %v6098_v3, %v209_v56  ;;  %v215_v49 = vld [vmem:[%s6213_s20 + $0x44] sm:$0x3] }
  0x2b   : > { %572 = vrot.lane.b32.xlu1 %v544_v38, %s6102_s28  ;;  %v362_v52 = vsel %vm350_vm1, %v357_v41, %v361_v42  ;;  %v391_v59 = vrot.slane %v389_v50, 1  ;;  %v377_v60 = vsel %vm350_vm1, %v372_v53, %v376_v54  ;;  %v378_v8 = vshrl.u32 %v6237_v21, 16  ;;  %v5958_v38 = vld [vmem:[%s8626_s1 + $0x10] ss:$0 sps:$4 sm:$0x33]   ;;  %v5959_v41 = vld [vmem:[%s8626_s1 + $0x8] sm:$0xff]  }
  0x2c   : > { %722 = vrot.lane.b32.xlu0 %v6270_v37, %s6101_s27  ;;  %v6291_v61 = vcombine.low %v243_v51, %v244_v55  ;;  %v6297_v0 = vcombine.low %v245_v62, %v245_v62  ;;  %v246_v15 = vmax.bf16 %v6098_v3, %v210_v13  ;;  %v247_v17 = vmax.bf16 %v6098_v3, %v211_v14  ;;  %v5960_v42 = vld [vmem:[%s8626_s1] sm:$0xff]  }
  0x2d   : > { %v392_v63 = vsel %vm350_vm1, %v387_v58, %v391_v59  ;;  %v380_v10 = vor.u32 %v378_v8, %v376_v54  ;;  %v248_v27 = vmax.bf16 %v6098_v3, %v212_v19  ;;  %v393_v31 = vshrl.u32 %v6239_v22, 16  ;;  %5867 = vmatprep.subr.msk.bf16.mxu0 %vm2493_vm2, %v5958_v38 }
  0x2e   : > { %v399_v1 = vshll.u32 %v6291_v61, 16  ;;  %v397_v2 = vshrl.u32 %v6291_v61, 16  ;;  %v404_v5 = vshll.u32 %v6297_v0, 16  ;;  %v551_v11 = vrot.slane %v6291_v61, 1 }
  0x2f   : > { %576 = vrot.lane.b32.xlu1 %v547_v33, %s6102_s28  ;;  %v6320_v12 = vrot.slane %v6297_v0, 1  ;;  %v6333_v25 = vcombine.low %v246_v15, %v247_v17  ;;  %v6340_v29 = vcombine.low %v248_v27, %v248_v27  ;;  %v395_v35 = vor.u32 %v393_v31, %v391_v59 }
  0x30   : > { %501 = vrot.lane.b32.xlu0 %v362_v52, %s6103_s29  ;;  %v401_v4 = vrot.slane %v399_v1, 1  ;;  %v6307_v7 = vrot.slane %v404_v5, 1  ;;  %v2495_v39 = vsel %vm2493_vm2, %v5958_v38, 0  ;;  %v249_v47 = vmax.bf16 %v6098_v3, %v213_v43  ;;  %v216_v5 = vld [vmem:[%s6213_s20 + $0x48] sm:$0xf] }
  0x31   : > { %v553_v18 = vsel %vm8629_vm0, %v551_v11, %v6320_v12  ;;  %v412_v32 = vshrl.u32 %v6333_v25, 16  ;;  %v419_v34 = vshll.u32 %v6340_v29, 16  ;;  %5816 = vmatpush3.bf16.msra.mxu0 %v2495_v39  ;;  %v554_v45 = vrot.slane %v6333_v25, 1 }
  0x32   : > { %v402_v6 = vor.u32 %v401_v4, %v397_v2  ;;  %5817 = vmatprep.subr.bf16.mxu0 %v5959_v41  ;;  %v6377_v46 = vrot.slane %v6340_v29, 1  ;;  %v250_v48 = vmax.bf16 %v6098_v3, %v214_v44  ;;  %v251_v52 = vmax.bf16 %v6098_v3, %v215_v49 }
  0x33   : > { %503 = vrot.lane.b32.xlu1 %v365_v57, %s6103_s29  ;;  %v408_v59 = vshrl.u32 %v6297_v0, 16 }
  0x34   : > { %505 = vrot.lane.b32.xlu0 %v377_v60, %s6103_s29  ;;  %v407_v9 = vsel %vm350_vm1, %v402_v6, %v6307_v7  ;;  %v556_v50 = vsel %vm8629_vm0, %v554_v45, %v6377_v46  ;;  %v6387_v51 = vcombine.low %v249_v47, %v250_v48  ;;  %v6393_v53 = vcombine.low %v251_v52, %v251_v52  ;;  %v217_v6 = vld [vmem:[%s6213_s20 + $0x4c] sm:$0xf] }
  0x35   : > { %5818 = vmatpush3.bf16.msra.mxu0 %v5959_v41  ;;  %v410_v62 = vor.u32 %v408_v59, %v6307_v7  ;;  %v252_v7 = vmax.bf16 %v6098_v3, %v216_v5  ;;  %v253_v8 = vmax.bf16 %v6098_v3, %v217_v6  ;;  %v1256_v45 = vlaneseq  ;;  %v220_v59 = vld [vmem:[%s6213_s20 + $0x58] sm:$0xf] }
  0x36   : > { %5819 = vmatprep.subr.bf16.mxu0 %v5960_v42  ;;  %v429_v54 = vshll.u32 %v6387_v51, 16  ;;  %v434_v56 = vshll.u32 %v6393_v53, 16  ;;  %v6418_v1 = vrot.slane %v6393_v53, 1  ;;  %v256_v6 = vmax.bf16 %v6098_v3, %v220_v59 }
  0x37   : > { %679 = vrot.lane.b32.xlu1 %v392_v63, %s6104_s4  ;;  %v6454_v13 = vcombine.low %v252_v7, %v253_v8 }
  0x38   : > { %675 = vrot.lane.b32.xlu0 %v377_v60, %s6104_s4  ;;  %v431_v55 = vrot.slane %v429_v54, 1  ;;  %v6405_v58 = vrot.slane %v434_v56, 1  ;;  %v438_v56 = vshrl.u32 %v6393_v53, 16 }
  0x39   : > { %5820 = vmatpush3.bf16.msra.mxu0 %v5960_v42  ;;  %v444_v19 = vshll.u32 %v6454_v13, 16  ;;  %v442_v31 = vshrl.u32 %v6454_v13, 16  ;;  %v560_v47 = vrot.slane %v6454_v13, 1 }
  0x3b   : > { %770 = vrot.lane.b32.xlu1 %v6291_v61, %s6100_s24 }
  0x3c   : > { %574 = vrot.lane.b32.xlu0 %v543_v30, %s6102_s28  ;;  %v414_v30 = vshll.u32 %v6333_v25, 16 }
  0x3e   : > { %v416_v33 = vrot.slane %v414_v30, 1 }
  0x3f   : > { %622 = vrot.lane.b32.xlu1 %v6237_v21, %s6099_s21 }
  0x40   : > { %821 = vrot.lane.b32.xlu0 %v392_v63, %s6105_s5  ;;  %v417_v36 = vor.u32 %v416_v33, %v412_v32  ;;  %v446_v32 = vrot.slane %v444_v19, 1 }
  0x43   : > { %864 = vrot.lane.b32.xlu1 %v6270_v37, %s6106_s6 }
  0x44   : > { %825 = vrot.lane.b32.xlu0 %v407_v9, %s6105_s5 }
  0x47   : > { %677 = vrot.lane.b32.xlu1 %v380_v10, %s6104_s4 }
  0x48   : > { %509 = vrot.lane.b32.xlu0 %v392_v63, %s6103_s29  ;;  %v557_v63 = vrot.slane %v6387_v51, 1 }
  0x4a   : > { %v559_v2 = vsel %vm8629_vm0, %v557_v63, %v6418_v1 }
  0x4b   : > { %513 = vrot.lane.b32.xlu1 %v407_v9, %s6103_s29 }
  0x4c   : > { %868 = vrot.lane.b32.xlu0 %v553_v18, %s6106_s6 }
  0x4f   : > { %720 = vrot.lane.b32.xlu1 %v6251_v26, %s6101_s27 }
  0x50   : > { %580 = vrot.lane.b32.xlu0 %v6270_v37, %s6102_s28  ;;  %v6353_v37 = vrot.slane %v419_v34, 1 }
  0x52   : > { %v422_v40 = vsel %vm350_vm1, %v417_v36, %v6353_v37  ;;  %v447_v36 = vor.u32 %v446_v32, %v442_v31 }
  0x53   : > { %628 = vrot.lane.b32.xlu1 %v6291_v61, %s6099_s21 }
  0x54   : > { %584 = vrot.lane.b32.xlu0 %v553_v18, %s6102_s28 }
  0x57   : > { %632 = vrot.lane.b32.xlu1 %v6333_v25, %s6099_s21 }
  0x58   : > { %768 = vrot.lane.b32.xlu0 %v6239_v22, %s6100_s24 }
  0x5b   : > { %823 = vrot.lane.b32.xlu1 %v395_v35, %s6105_s5 }
  0x5c   : > { %683 = vrot.lane.b32.xlu0 %v407_v9, %s6104_s4 }
  0x5f   : > { %687 = vrot.lane.b32.xlu1 %v422_v40, %s6104_s4 }
  0x60   : > { %507 = vrot.lane.b32.xlu0 %v380_v10, %s6103_s29  ;;  %v218_v10 = vld [vmem:[%s6213_s20 + $0x50] sm:$0x3] }
  0x61   : > { %v254_v14 = vmax.bf16 %v6098_v3, %v218_v10  ;;  %v6533_v10 = vor.u32 %v438_v56, %v6405_v58 }
  0x63   : > { %866 = vrot.lane.b32.xlu1 %v6255_v28, %s6106_s6 }
  0x64   : > { %726 = vrot.lane.b32.xlu0 %v553_v18, %s6101_s27  ;;  %v6461_v18 = vcombine.low %v254_v14, %v254_v14 }
  0x66   : > { %v449_v33 = vshll.u32 %v6461_v18, 16  ;;  %v6498_v48 = vrot.slane %v6461_v18, 1 }
  0x67   : > { %578 = vrot.lane.b32.xlu1 %v6251_v26, %s6102_s28  ;;  %v427_v26 = vshrl.u32 %v6387_v51, 16 }
  0x68   : > { %511 = vrot.lane.b32.xlu0 %v395_v35, %s6103_s29 }
  0x69   : > { %v432_v57 = vor.u32 %v431_v55, %v427_v26  ;;  %v6508_v55 = vshrl.u32 %v1256_v45, 7 }
  0x6b   : > { %774 = vrot.lane.b32.xlu1 %v6333_v25, %s6100_s24  ;;  %v437_v60 = vsel %vm350_vm1, %v432_v57, %v6405_v58  ;;  %v219_v57 = vld [vmem:[%s6213_s20 + $0x54] sm:$0xf] }
  0x6c   : > { %730 = vrot.lane.b32.xlu0 %v556_v50, %s6101_s27  ;;  %v255_v5 = vmax.bf16 %v6098_v3, %v219_v57 }
  0x6e   : > { %v6543_v32 = vcombine.low %v255_v5, %v256_v6 }
  0x6f   : > { %626 = vrot.lane.b32.xlu1 %v6239_v22, %s6099_s21 }
  0x70   : > { %582 = vrot.lane.b32.xlu0 %v6255_v28, %s6102_s28 }
  0x73   : > { %829 = vrot.lane.b32.xlu1 %v422_v40, %s6105_s5 }
  0x74   : > { %778 = vrot.lane.b32.xlu0 %v6387_v51, %s6100_s24 }
  0x77   : > { %681 = vrot.lane.b32.xlu1 %v395_v35, %s6104_s4 }
  0x78   : > { %630 = vrot.lane.b32.xlu0 %v6297_v0, %s6099_s21 }
  0x7b   : > { %872 = vrot.lane.b32.xlu1 %v556_v50, %s6106_s6 }
  0x7c   : > { %833 = vrot.lane.b32.xlu0 %v437_v60, %s6105_s5 }
  0x7f   : > { %724 = vrot.lane.b32.xlu1 %v6255_v28, %s6101_s27  ;;  %v423_v28 = vshrl.u32 %v6340_v29, 16 }
  0x80   : > { %685 = vrot.lane.b32.xlu0 %v410_v62, %s6104_s4 }
  0x81   : > { %v6437_v4 = vor.u32 %v423_v28, %v6353_v37  ;;  %v6476_v37 = vrot.slane %v449_v33, 1 }
  0x83   : > { %517 = vrot.lane.b32.xlu1 %v422_v40, %s6103_s29  ;;  %v6487_v41 = vsel %vm350_vm1, %v447_v36, %v6476_v37 }
  0x84   : > { %876 = vrot.lane.b32.xlu0 %v559_v2, %s6106_s6 }
  0x87   : > { %772 = vrot.lane.b32.xlu1 %v6297_v0, %s6100_s24 }
  0x88   : > { %728 = vrot.lane.b32.xlu0 %v6320_v12, %s6101_s27 }
  0x8b   : > { %776 = vrot.lane.b32.xlu1 %v6340_v29, %s6100_s24 }
  0x8c   : > { %588 = vrot.lane.b32.xlu0 %v556_v50, %s6102_s28 }
  0x8f   : > { %521 = vrot.lane.b32.xlu1 %v437_v60, %s6103_s29 }
  0x90   : > { %827 = vrot.lane.b32.xlu0 %v410_v62, %s6105_s5 }
  0x93   : > { %831 = vrot.lane.b32.xlu1 %v6437_v4, %s6105_s5 }
  0x94   : > { %636 = vrot.lane.b32.xlu0 %v6387_v51, %s6099_s21 }
  0x95   : > { %v6448_v9 = vpop.permute.xlu1 %624 }
  0x96   : > { %v621_v11 = vpop.permute.xlu0 %620 }
  0x97   : > { %515 = vrot.lane.b32.xlu1 %v410_v62, %s6103_s29 }
  0x98   : > { %870 = vrot.lane.b32.xlu0 %v6320_v12, %s6106_s6 }
  0x99   : > { %v6457_v15 = vpop.permute.xlu1 %766 }
  0x9a   : > { %v719_v17 = vpop.permute.xlu0 %718 }
  0x9b   : > { %691 = vrot.lane.b32.xlu1 %v437_v60, %s6104_s4  ;;  %v6517_v60 = vsel %vm8629_vm0, %v560_v47, %v6498_v48 }
  0x9c   : > { %592 = vrot.lane.b32.xlu0 %v559_v2, %s6102_s28 }
  0x9d   : > { %v573_v27 = vpop.permute.xlu1 %572 }
  0x9e   : > { %v6464_v30 = vpop.permute.xlu0 %722 }
  0x9f   : > { %519 = vrot.lane.b32.xlu1 %v6437_v4, %s6103_s29 }
  0xa0   : > { %874 = vrot.lane.b32.xlu0 %v6377_v46, %s6106_s6 }
  0xa1   : > { %v577_v34 = vpop.permute.xlu1 %576 }
  0xa2   : > { %v502_v35 = vpop.permute.xlu0 %501 }
  0xa3   : > { %640 = vrot.lane.b32.xlu1 %v6454_v13, %s6099_s21  ;;  %v906_v40 = vsel %vm904_vm3, %v6243_v23, %v502_v35  ;;  %v6107_v23 = vmov 1966171168  }
  0xa4   : > { %586 = vrot.lane.b32.xlu0 %v6320_v12, %s6102_s28  ;;  %v947_v42 = vsel %vm945_vm4, %v906_v40, %v573_v27  ;;  %v1254_v44 = vunpack.c.l.s4 %v6107_v23 }
  0xa5   : > { %v6478_v38 = vpop.permute.xlu1 %503  ;;  %v988_v49 = vsel %vm986_vm5, %v947_v42, %v621_v11 }
  0xa6   : > { %v506_v39 = vpop.permute.xlu0 %505  ;;  %v1255_v26 = vunpack.c.0.s8 %v1254_v44 }
  0xa7   : > { %590 = vrot.lane.b32.xlu1 %v6377_v46, %s6102_s28  ;;  %v910_v7 = vsel %vm904_vm3, %v6235_v20, %v506_v39 }
  0xa8   : > { %734 = vrot.lane.b32.xlu0 %v559_v2, %s6101_s27  ;;  %v221_v2 = vld [vmem:[%s6213_s20 + $0x5c] sm:$0x3]  ;;  %v6530_v8 = vsub.s32 %v1255_v26, %v6508_v55  ;;  %v951_v19 = vsel %vm945_vm4, %v910_v7, %v577_v34 }
  0xa9   : > { %v6489_v12 = vpop.permute.xlu1 %679  ;;  %v257_v14 = vmax.bf16 %v6098_v3, %v221_v2  ;;  %v992_v34 = vsel %vm986_vm5, %v951_v19, %v6448_v9  ;;  %v457_v9 = vshrl.u32 %v6543_v32, 16 }
  0xaa   : > { %v676_v43 = vpop.permute.xlu0 %675  ;;  %v1033_v44 = vsel %vm1027_vm6, %v992_v34, %v6489_v12 }
  0xab   : > { %695 = vrot.lane.b32.xlu1 %v6487_v41, %s6104_s4  ;;  %v1029_v52 = vsel %vm1027_vm6, %v988_v49, %v676_v43  ;;  %v1074_v12 = vsel %vm1068_vm7, %v1033_v44, %v6464_v30  ;;  %v563_v44 = vrot.slane %v6543_v32, 1 }
  0xac   : > { %634 = vrot.lane.b32.xlu0 %v6340_v29, %s6099_s21  ;;  %v1070_v62 = vsel %vm1068_vm7, %v1029_v52, %v719_v17 }
  0xad   : > { %v6501_v50 = vpop.permute.xlu1 %770  ;;  %v1111_v11 = vsel %vm1109_vm8, %v1070_v62, %v6457_v15  ;;  %v459_v15 = vshll.u32 %v6543_v32, 16 }
  0xae   : > { %v6504_v54 = vpop.permute.xlu0 %574 }
  0xaf   : > { %638 = vrot.lane.b32.xlu1 %v6393_v53, %s6099_s21  ;;  %v461_v45 = vrot.slane %v459_v15, 1 }
  0xb0   : > { %782 = vrot.lane.b32.xlu0 %v6454_v13, %s6100_s24 }
  0xb1   : > { %v6520_v63 = vpop.permute.xlu1 %622  ;;  %v462_v5 = vor.u32 %v461_v45, %v457_v9 }
  0xb2   : > { %v822_v28 = vpop.permute.xlu0 %821 }
  0xb3   : > { %738 = vrot.lane.b32.xlu1 %v6517_v60, %s6101_s27  ;;  %v1152_v20 = vsel %vm1150_vm9, %v1111_v11, %v822_v28  ;;  %v1115_v28 = vsel %vm1109_vm8, %v1074_v12, %v6501_v50 }
  0xb4   : > { %689 = vrot.lane.b32.xlu0 %v6437_v4, %s6104_s4  ;;  %v6550_v4 = vcombine.low %v257_v14, %v257_v14 }
  0xb5   : > { %v865_v17 = vpop.permute.xlu1 %864 }
  0xb6   : > { %v1193_v27 = vsel %vm8631_vm10, %v1152_v20, %v865_v17  ;;  %v826_v31 = vpop.permute.xlu0 %825  ;;  %v464_v47 = vshll.u32 %v6550_v4, 16  ;;  %v6617_v9 = vrot.slane %v6550_v4, 1 }
  0xb7   : > { %v1252_v58 = vcombine.high %v1193_v27, %v1193_v27  ;;  %v1259_v33 = vrot.slane %v1193_v27, %v6530_v8  ;;  %693 = vrot.lane.b32.xlu1 %v6533_v10, %s6104_s4  ;;  %v1156_v30 = vsel %vm1150_vm9, %v1115_v28, %v826_v31 }
  0xb8   : > { %837 = vrot.lane.b32.xlu0 %v6487_v41, %s6105_s5  ;;  %v6583_v6 = vrot.slane %v464_v47, 1 }
  0xb9   : > { %v1266_v35 = vrot.slane %v1252_v58, %v6530_v8  ;;  %v1267_v36 = vcombine.high %v1259_v33, %v1259_v33  ;;  %v6556_v39 = vpop.permute.xlu1 %677  ;;  %v1275_v43 = vrot.slane %v1259_v33, %v6530_v8 }
  0xba   : > { %v6558_v40 = vpop.permute.xlu0 %509  ;;  %v6598_v27 = vsel %vm350_vm1, %v462_v5, %v6583_v6 }
  0xbb   : > { %v1268_v42 = vcombine.high %v1266_v35, %v1266_v35  ;;  %v1289_v23 = vrot.slane %v1267_v36, %v6530_v8  ;;  %786 = vrot.lane.b32.xlu1 %v6543_v32, %s6100_s24  ;;  %v1282_v49 = vrot.slane %v1266_v35, %v6530_v8 }
  0xbc   : > { %732 = vrot.lane.b32.xlu0 %v6377_v46, %s6101_s27 }
  0xbd   : > { %v1296_v52 = vrot.slane %v1268_v42, %v6530_v8  ;;  %v1887_v26 = vcombine.low %v1275_v43, %v1289_v23  ;;  %v5695_v56 = vcombine.high %v1275_v43, %v1289_v23  ;;  %v6572_v57 = vpop.permute.xlu1 %513 }
  0xbe   : > { %v869_v59 = vpop.permute.xlu0 %868 }
  0xbf   : > { %v1889_v62 = vcombine.low %v1282_v49, %v1296_v52  ;;  %v5696_v2 = vcombine.high %v1282_v49, %v1296_v52  ;;  %525 = vrot.lane.b32.xlu1 %v6487_v41, %s6103_s29  ;;  %v1897_v46 = vrot.slane %v1887_v26, %v6530_v8  ;;  %v1904_v7 = vrot.slane %v5695_v56, %v6530_v8 }
  0xc0   : > { %880 = vrot.lane.b32.xlu0 %v6517_v60, %s6106_s6  ;;  %v1197_v20 = vsel %vm8631_vm10, %v1156_v30, %v869_v59  ;;  %v6628_v56 = vsel %vm8629_vm0, %v563_v44, %v6617_v9  ;;  %v908_v59 = vsel %vm904_vm3, %v6245_v24, %v6478_v38 }
  0xc1   : > { %v721_v11 = vpop.permute.xlu1 %720  ;;  %v1911_v14 = vrot.slane %v1889_v62, %v6530_v8  ;;  %v1918_v41 = vrot.slane %v5696_v2, %v6530_v8  ;;  %v1919_v50 = vcombine.low %v1897_v46, %v1904_v7  ;;  %v1315_v31 = vcombine.high %v1197_v20, %v1197_v20 }
  0xc2   : > { %v6590_v17 = vpop.permute.xlu0 %580  ;;  %v1322_v58 = vrot.slane %v1197_v20, %v6530_v8  ;;  %v949_v62 = vsel %vm945_vm4, %v908_v59, %v6504_v54 }
  0xc3   : > { %780 = vrot.lane.b32.xlu1 %v6393_v53, %s6100_s24  ;;  %v1920_v19 = vcombine.low %v1911_v14, %v1918_v41  ;;  %v1927_v15 = vrot.slane %v1919_v50, %v6530_v8  ;;  %v1329_v42 = vrot.slane %v1315_v31, %v6530_v8  ;;  %v990_v2 = vsel %vm986_vm5, %v949_v62, %v6520_v63 }
  0xc4   : > { %736 = vrot.lane.b32.xlu0 %v6418_v1, %s6101_s27  ;;  %v1330_v43 = vcombine.high %v1322_v58, %v1322_v58  ;;  %v1338_v28 = vrot.slane %v1322_v58, %v6530_v8  ;;  %v1031_v7 = vsel %vm1027_vm6, %v990_v2, %v6556_v39  ;;  %v224_v2 = vld [vmem:[%s6213_s20 + $0x68] sm:$0x3] }
  0xc5   : > { %v6601_v33 = vpop.permute.xlu1 %628  ;;  %v1934_v34 = vrot.slane %v1920_v19, %v6530_v8  ;;  %v1331_v47 = vcombine.high %v1329_v42, %v1329_v42  ;;  %v1345_v49 = vrot.slane %v1329_v42, %v6530_v8  ;;  %v1072_v63 = vsel %vm1068_vm7, %v1031_v7, %v721_v11 }
  0xc6   : > { %v6605_v35 = vpop.permute.xlu0 %584  ;;  %v1352_v52 = vrot.slane %v1330_v43, %v6530_v8  ;;  %v1360_v14 = vcombine.high %v1338_v28, %v1338_v28  ;;  %v222_v43 = vld [vmem:[%s6213_s20 + $0x60] sm:$0xf] }
  0xc7   : > { %596 = vrot.lane.b32.xlu1 %v6517_v60, %s6102_s28  ;;  %v1935_v36 = vcombine.low %v1927_v15, %v1934_v34  ;;  %v453_v60 = vshrl.u32 %v6461_v18, 16  ;;  %v6648_v24 = vrot.slane %v1331_v47, %v6530_v8  ;;  %v1361_v38 = vcombine.high %v1345_v49, %v1345_v49 }
  0xc8   : > { %841 = vrot.lane.b32.xlu0 %v6598_v27, %s6105_s5  ;;  %v1362_v5 = vcombine.high %v1352_v52, %v1352_v52  ;;  %v1937_v58 = vcombine.low %v1352_v52, %v1360_v14 }
  0xc9   : > { %v6612_v23 = vpop.permute.xlu1 %632  ;;  %5821 = vmatprep.mubr.msk.bf16.mxu0 %vm8630_vm11, %v1935_v36  ;;  %v6644_v46 = vor.u32 %v453_v60, %v6476_v37  ;;  %v1939_v20 = vcombine.low %v6648_v24, %v1361_v38 }
  0xca   : > { %v769_v45 = vpop.permute.xlu0 %768  ;;  %v1938_v41 = vcombine.low %v1362_v5, %v1345_v49  ;;  %v1953_v47 = vrot.slane %v1937_v58, %v6530_v8 }
  0xcb   : > { %835 = vrot.lane.b32.xlu1 %v6533_v10, %s6105_s5  ;;  %v1113_v37 = vsel %vm1109_vm8, %v1072_v63, %v769_v45  ;;  %v1967_v34 = vrot.slane %v1939_v20, %v6530_v8  ;;  %v223_v45 = vld [vmem:[%s6213_s20 + $0x64] sm:$0xf] }
  0xcc   : > { %784 = vrot.lane.b32.xlu0 %v6461_v18, %s6100_s24  ;;  %v1960_v15 = vrot.slane %v1938_v41, %v6530_v8  ;;  %v259_v59 = vmax.bf16 %v6098_v3, %v223_v45 }
  0xcd   : > { %v824_v26 = vpop.permute.xlu1 %823 }
  0xce   : > { %v6633_v12 = vpop.permute.xlu0 %683  ;;  %v1154_v39 = vsel %vm1150_vm9, %v1113_v37, %v824_v26  ;;  %v1969_v26 = vcombine.low %v1960_v15, %v1967_v34  ;;  %v260_v37 = vmax.bf16 %v6098_v3, %v224_v2  ;;  %v468_v34 = vshrl.u32 %v6550_v4, 16 }
  0xcf   : > { %644 = vrot.lane.b32.xlu1 %v6543_v32, %s6099_s21 }
  0xd0   : > { %884 = vrot.lane.b32.xlu0 %v6628_v56, %s6106_s6  ;;  %v1983_v7 = vrot.slane %v1969_v26, %v6530_v8 }
  0xd1   : > { %v6650_v54 = vpop.permute.xlu1 %687 }
  0xd2   : > { %v6654_v30 = vpop.permute.xlu0 %507 }
  0xd3   : > { %878 = vrot.lane.b32.xlu1 %v6418_v1, %s6106_s6 }
  0xd4   : > { %839 = vrot.lane.b32.xlu0 %v6644_v46, %s6105_s5 }
  0xd5   : > { %v867_v50 = vpop.permute.xlu1 %866 }
  0xd6   : > { %v1195_v19 = vsel %vm8631_vm10, %v1154_v39, %v867_v50  ;;  %v6665_v11 = vpop.permute.xlu0 %726 }
  0xd7   : > { %v1307_v31 = vrot.slane %v1195_v19, %v6530_v8  ;;  %699 = vrot.lane.b32.xlu1 %v6598_v27, %s6104_s4 }
  0xd8   : > { %523 = vrot.lane.b32.xlu0 %v6533_v10, %s6103_s29  ;;  %v258_v10 = vmax.bf16 %v6098_v3, %v222_v43 }
  0xd9   : > { %v1314_v36 = vrot.slane %v1307_v31, %v6530_v8  ;;  %v6675_v42 = vpop.permute.xlu1 %578 }
  0xda   : > { %v6678_v44 = vpop.permute.xlu0 %511  ;;  %v6700_v63 = vcombine.low %v258_v10, %v259_v59  ;;  %v914_v10 = vsel %vm904_vm3, %v6230_v16, %v6558_v40  ;;  %v225_v40 = vld [vmem:[%s6213_s20 + $0x6c] sm:$0xf] }
  0xdb   : > { %v1936_v60 = vcombine.low %v1314_v36, %v1338_v28  ;;  %527 = vrot.lane.b32.xlu1 %v6644_v46, %s6103_s29 }
  0xdc   : > { %882 = vrot.lane.b32.xlu0 %v6498_v48, %s6106_s6  ;;  %v474_v20 = vshll.u32 %v6700_v63, 16  ;;  %v472_v19 = vshrl.u32 %v6700_v63, 16 }
  0xdd   : > { %v1946_v49 = vrot.slane %v1936_v60, %v6530_v8  ;;  %v775_v52 = vpop.permute.xlu1 %774  ;;  %v6733_v60 = vor.u32 %v468_v34, %v6583_v6 }
  0xde   : > { %v6689_v62 = vpop.permute.xlu0 %730  ;;  %v476_v31 = vrot.slane %v474_v20, 1  ;;  %v227_v20 = vld [vmem:[%s6213_s20 + $0x74] sm:$0x3] }
  0xdf   : > { %v1968_v28 = vcombine.low %v1946_v49, %v1953_v47  ;;  %594 = vrot.lane.b32.xlu1 %v6418_v1, %s6102_s28  ;;  %v955_v47 = vsel %vm945_vm4, %v914_v10, %v6590_v17  ;;  %v226_v17 = vld [vmem:[%s6213_s20 + $0x70] sm:$0xf] }
  0xe0   : > { %529 = vrot.lane.b32.xlu0 %v6598_v27, %s6103_s29  ;;  %v6710_v27 = vcombine.low %v260_v37, %v260_v37  ;;  %v477_v43 = vor.u32 %v476_v31, %v472_v19 }
  0xe1   : > { %v6696_v38 = vpop.permute.xlu1 %626  ;;  %v1976_v5 = vrot.slane %v1968_v28, %v6530_v8 }
  0xe2   : > { %v6703_v14 = vpop.permute.xlu0 %582  ;;  %v479_v58 = vshll.u32 %v6710_v27, 16 }
  0xe3   : > { %598 = vrot.lane.b32.xlu1 %v6498_v48, %s6102_s28  ;;  %v1984_v41 = vcombine.low %v1976_v5, %v1983_v7  ;;  %v6764_v5 = vrot.slane %v6710_v27, 1 }
  0xe4   : > { %742 = vrot.lane.b32.xlu0 %v6628_v56, %s6101_s27 }
  0xe5   : > { %v830_v1 = vpop.permute.xlu1 %829  ;;  %5822 = vmatmul.mubr.msk.bf16.vlgmr.msra.gmra.mxu0 %vm8630_vm11, %v1984_v41  ;;  %v262_v41 = vmax.bf16 %v6098_v3, %v226_v17 }
  0xe6   : > { %v779_v39 = vpop.permute.xlu0 %778 }
  0xe7   : > { %642 = vrot.lane.b32.xlu1 %v6461_v18, %s6099_s21 }
  0xe8   : > { %600 = vrot.lane.b32.xlu0 %v6628_v56, %s6102_s28  ;;  %v6728_v56 = vrot.slane %v479_v58, 1 }
  0xe9   : > { %v6717_v50 = vpop.permute.xlu1 %681 }
  0xea   : > { %v6721_v15 = vpop.permute.xlu0 %630  ;;  %v482_v26 = vsel %vm350_vm1, %v477_v43, %v6728_v56 }
  0xeb   : > { %646 = vrot.lane.b32.xlu1 %v6550_v4, %s6099_s21 }
  0xec   : > { %790 = vrot.lane.b32.xlu0 %v6700_v63, %s6100_s24 }
  0xed   : > { %v873_v36 = vpop.permute.xlu1 %872 }
  0xee   : > { %v834_v45 = vpop.permute.xlu0 %833 }
  0xef   : > { %697 = vrot.lane.b32.xlu1 %v6644_v46, %s6104_s4  ;;  %v996_v46 = vsel %vm986_vm5, %v955_v47, %v6601_v33  ;;  %v566_v33 = vrot.slane %v6700_v63, 1 }
  0xf0   : > { %648 = vrot.lane.b32.xlu0 %v6700_v63, %s6099_s21  ;;  %v1037_v59 = vsel %vm1027_vm6, %v996_v46, %v6633_v12 }
  0xf1   : > { %v6742_v49 = vpop.permute.xlu1 %724  ;;  %v1078_v16 = vsel %vm1068_vm7, %v1037_v59, %v6665_v11  ;;  %v261_v11 = vmax.bf16 %v6098_v3, %v225_v40  ;;  %v568_v31 = vsel %vm8629_vm0, %v566_v33, %v6764_v5 }
  0xf2   : > { %v6748_v6 = vpop.permute.xlu0 %685  ;;  %v1119_v2 = vsel %vm1109_vm8, %v1078_v16, %v775_v52  ;;  %v918_v52 = vsel %vm904_vm3, %v6291_v61, %v6572_v57  ;;  %v263_v57 = vmax.bf16 %v6098_v3, %v227_v20 }
  0xf3   : > { %701 = vrot.lane.b32.xlu1 %v6733_v60, %s6104_s4  ;;  %v1160_v12 = vsel %vm1150_vm9, %v1119_v2, %v830_v1  ;;  %v959_v1 = vsel %vm945_vm4, %v918_v52, %v6605_v35  ;;  %v6788_v61 = vcombine.low %v261_v11, %v262_v41 }
  0xf4   : > { %845 = vrot.lane.b32.xlu0 %v482_v26, %s6105_s5  ;;  %v1201_v37 = vsel %vm8631_vm10, %v1160_v12, %v873_v36  ;;  %v6804_v59 = vcombine.low %v263_v57, %v263_v57 }
  0xf5   : > { %v6760_v28 = vpop.permute.xlu1 %517  ;;  %v1378_v58 = vcombine.high %v1201_v37, %v1201_v37  ;;  %v487_v2 = vshrl.u32 %v6788_v61, 16 }
  0xf6   : > { %v877_v7 = vpop.permute.xlu0 %876  ;;  %v494_v12 = vshll.u32 %v6804_v59, 16 }
  0xf7   : > { %740 = vrot.lane.b32.xlu1 %v6498_v48, %s6101_s27  ;;  %v1000_v48 = vsel %vm986_vm5, %v959_v1, %v6612_v23  ;;  %v1392_v10 = vrot.slane %v1378_v58, %v6530_v8 }
  0xf8   : > { %703 = vrot.lane.b32.xlu0 %v482_v26, %s6104_s4  ;;  %v1041_v36 = vsel %vm1027_vm6, %v1000_v48, %v6650_v54  ;;  %v6835_v48 = vrot.slane %v494_v12, 1  ;;  %v1363_v12 = vcombine.high %v6648_v24, %v6648_v24 }
  0xf9   : > { %v773_v19 = vpop.permute.xlu1 %772  ;;  %v1082_v35 = vsel %vm1068_vm7, %v1041_v36, %v6689_v62  ;;  %v489_v62 = vshll.u32 %v6788_v61, 16  ;;  %v1394_v16 = vcombine.high %v1392_v10, %v1392_v10 }
  0xfa   : > { %v6783_v34 = vpop.permute.xlu0 %728  ;;  %v1123_v43 = vsel %vm1109_vm8, %v1082_v35, %v779_v39 }
  0xfb   : > { %533 = vrot.lane.b32.xlu1 %v482_v26, %s6103_s29  ;;  %v1164_v47 = vsel %vm1150_vm9, %v1123_v43, %v834_v45  ;;  %v1385_v26 = vrot.slane %v1201_v37, %v6530_v8  ;;  %v491_v33 = vrot.slane %v489_v62, 1  ;;  %v6825_v52 = vrot.slane %v1394_v16, %v6530_v8 }
  0xfc   : > { %888 = vrot.lane.b32.xlu0 %v568_v31, %s6106_s6  ;;  %v1205_v46 = vsel %vm8631_vm10, %v1164_v47, %v877_v7  ;;  %v912_v7 = vsel %vm904_vm3, %v6237_v21, %v6654_v30 }
  0xfd   : > { %v6795_v23 = vpop.permute.xlu1 %776  ;;  %v1448_v45 = vrot.slane %v1205_v46, %v6530_v8  ;;  %v1393_v17 = vcombine.high %v1385_v26, %v1385_v26  ;;  %v953_v37 = vsel %vm945_vm4, %v912_v7, %v6675_v42  ;;  %v492_v42 = vor.u32 %v491_v33, %v487_v2 }
  0xfe   : > { %v6799_v54 = vpop.permute.xlu0 %588  ;;  %v994_v41 = vsel %vm986_vm5, %v953_v37, %v6696_v38  ;;  %v6838_v38 = vrot.slane %v1392_v10, %v6530_v8  ;;  %v1441_v36 = vcombine.high %v1205_v46, %v1205_v46  ;;  %v916_v46 = vsel %vm904_vm3, %v6239_v22, %v6678_v44 }
  0xff   : > { %746 = vrot.lane.b32.xlu1 %v568_v31, %s6101_s27  ;;  %v1456_v20 = vcombine.high %v1448_v45, %v1448_v45  ;;  %v1035_v21 = vsel %vm1027_vm6, %v994_v41, %v6717_v50  ;;  %v1415_v30 = vrot.slane %v1393_v17, %v6530_v8  ;;  %v1401_v50 = vrot.slane %v1385_v26, %v6530_v8 }
 0x100   : > { %744 = vrot.lane.b32.xlu0 %v6617_v9, %s6101_s27  ;;  %v1076_v58 = vsel %vm1068_vm7, %v1035_v21, %v6742_v49  ;;  %v1988_v43 = vcombine.low %v6838_v38, %v6825_v52  ;;  %v6857_v26 = vsel %vm350_vm1, %v492_v42, %v6835_v48  ;;  %v1464_v17 = vrot.slane %v1448_v45, %v6530_v8 }
 0x101   : > { %v6809_v39 = vpop.permute.xlu1 %521  ;;  %v1117_v57 = vsel %vm1109_vm8, %v1076_v58, %v773_v19  ;;  %v1478_v47 = vrot.slane %v1456_v20, %v6530_v8  ;;  %v5697_v16 = vcombine.high %v1401_v50, %v1415_v30  ;;  %v957_v33 = vsel %vm945_vm4, %v916_v46, %v6703_v14  ;;  %v228_v20 = vld [vmem:[%s6213_s20 + $0x78] sm:$0xf] }
 0x102   : > { %v828_v40 = vpop.permute.xlu0 %827  ;;  %v998_v22 = vsel %vm986_vm5, %v957_v33, %v6721_v15  ;;  %v2016_v44 = vrot.slane %v1988_v43, %v6530_v8  ;;  %v1486_v15 = vcombine.high %v1464_v17, %v1464_v17 }
 0x103   : > { %604 = vrot.lane.b32.xlu1 %v568_v31, %s6102_s28  ;;  %v483_v31 = vshrl.u32 %v6710_v27, 16  ;;  %v1158_v10 = vsel %vm1150_vm9, %v1117_v57, %v828_v40  ;;  %v6866_v40 = vrot.slane %v1441_v36, %v6530_v8  ;;  %v1488_v45 = vcombine.high %v1478_v47, %v1478_v47 }
 0x104   : > { %788 = vrot.lane.b32.xlu0 %v6550_v4, %s6100_s24  ;;  %v2009_v14 = vrot.slane %v5697_v16, %v6530_v8  ;;  %v1039_v21 = vsel %vm1027_vm6, %v998_v22, %v6748_v6  ;;  %v6922_v22 = vrot.slane %v6804_v59, 1 }
 0x105   : > { %v832_v11 = vpop.permute.xlu1 %831  ;;  %v6860_v19 = vor.u32 %v483_v31, %v6728_v56  ;;  %v1986_v56 = vcombine.low %v1401_v50, %v1415_v30  ;;  %v229_v31 = vld [vmem:[%s6213_s20 + $0x7c] sm:$0xf]  ;;  %v6893_v24 = vrot.slane %v6866_v40, %v6530_v8  ;;  %v1080_v30 = vsel %vm1068_vm7, %v1039_v21, %v6783_v34 }
 0x106   : > { %v6827_v1 = vpop.permute.xlu0 %636  ;;  %v1121_v6 = vsel %vm1109_vm8, %v1080_v30, %v6795_v23  ;;  %v264_v50 = vmax.bf16 %v6098_v3, %v228_v20  ;;  %v265_v57 = vmax.bf16 %v6098_v3, %v229_v31  ;;  %v2018_v43 = vcombine.low %v2009_v14, %v2016_v44 }
 0x107   : > { %794 = vrot.lane.b32.xlu1 %v6788_v61, %s6100_s24  ;;  %v2002_v58 = vrot.slane %v1986_v56, %v6530_v8  ;;  %v1162_v34 = vsel %vm1150_vm9, %v1121_v6, %v832_v11  ;;  %v2036_v23 = vcombine.low %v1478_v47, %v1486_v15  ;;  %v569_v56 = vrot.slane %v6788_v61, 1 }
 0x108   : > { %792 = vrot.lane.b32.xlu0 %v6710_v27, %s6100_s24  ;;  %v5698_v11 = vcombine.high %v6838_v38, %v6825_v52  ;;  %v6924_v44 = vcombine.low %v264_v50, %v265_v57  ;;  %v2032_v31 = vrot.slane %v2018_v43, %v6530_v8 }
 0x109   : > { %v6846_v35 = vpop.permute.xlu1 %515  ;;  %v2058_v52 = vrot.slane %v2036_v23, %v6530_v8  ;;  %v571_v15 = vsel %vm8629_vm0, %v569_v56, %v6922_v22 }
 0x10a   : > { %v871_v62 = vpop.permute.xlu0 %870 }
 0x10b   : > { %v1199_v49 = vsel %vm8631_vm10, %v1158_v10, %v871_v62  ;;  %652 = vrot.lane.b32.xlu1 %v6788_v61, %s6099_s21  ;;  %v2037_v10 = vcombine.low %v1488_v45, %v6893_v24 }
 0x10c   : > { %v1370_v2 = vrot.slane %v1199_v49, %v6530_v8  ;;  %843 = vrot.lane.b32.xlu0 %v6733_v60, %s6105_s5  ;;  %v230_v49 = vld [vmem:[%s6213_s20 + $0x80] sm:$0x3] }
 0x10d   : > { %v6876_v7 = vpop.permute.xlu1 %691  ;;  %v2065_v47 = vrot.slane %v2037_v10, %v6530_v8  ;;  %v661_v10 = vshrl.u32 %v6924_v44, 16 }
 0x10e   : > { %v1377_v37 = vrot.slane %v1370_v2, %v6530_v8  ;;  %v6882_v41 = vpop.permute.xlu0 %592 }
 0x10f   : > { %849 = vrot.lane.b32.xlu1 %v6857_v26, %s6105_s5  ;;  %v2067_v50 = vcombine.low %v2058_v52, %v2065_v47  ;;  %v231_v52 = vld [vmem:[%s6213_s20 + $0x84] sm:$0xf] }
 0x110   : > { %v1985_v42 = vcombine.low %v1363_v12, %v1377_v37  ;;  %847 = vrot.lane.b32.xlu0 %v6860_v19, %s6105_s5 }
 0x111   : > { %v6902_v36 = vpop.permute.xlu1 %519 }
 0x112   : > { %v1995_v62 = vrot.slane %v1985_v42, %v6530_v8  ;;  %v875_v16 = vpop.permute.xlu0 %874  ;;  %v663_v42 = vshll.u32 %v6924_v44, 16 }
 0x113   : > { %v1203_v46 = vsel %vm8631_vm10, %v1162_v34, %v875_v16  ;;  %531 = vrot.lane.b32.xlu1 %v6733_v60, %s6103_s29  ;;  %v266_v60 = vmax.bf16 %v6098_v3, %v230_v49 }
 0x114   : > { %v2017_v2 = vcombine.low %v1995_v62, %v2002_v58  ;;  %v1433_v33 = vrot.slane %v1203_v46, %v6530_v8  ;;  %886 = vrot.lane.b32.xlu0 %v6617_v9, %s6106_s6  ;;  %v2044_v58 = vrot.slane %v5698_v11, %v6530_v8  ;;  %v665_v34 = vrot.slane %v663_v42, 1 }
 0x115   : > { %v6919_v12 = vpop.permute.xlu1 %640  ;;  %v6942_v30 = vcombine.low %v266_v60, %v266_v60  ;;  %v2081_v46 = vrot.slane %v2067_v50, %v6530_v8  ;;  %v715_v11 = vrot.slane %v6924_v44, 1 }
 0x116   : > { %v1440_v45 = vrot.slane %v1433_v33, %v6530_v8  ;;  %v6929_v37 = vpop.permute.xlu0 %586  ;;  %v2025_v20 = vrot.slane %v2017_v2, %v6530_v8  ;;  %v666_v2 = vor.u32 %v665_v34, %v661_v10  ;;  %v922_v34 = vsel %vm904_vm3, %v6333_v25, %v6760_v28 }
 0x117   : > { %890 = vrot.lane.b32.xlu1 %v6764_v5, %s6106_s6  ;;  %v668_v62 = vshll.u32 %v6942_v30, 16  ;;  %v6973_v60 = vrot.slane %v6942_v30, 1 }
 0x118   : > { %v2035_v38 = vcombine.low %v1440_v45, %v1464_v17  ;;  %707 = vrot.lane.b32.xlu0 %v6857_v26, %s6104_s4  ;;  %v2033_v14 = vcombine.low %v2025_v20, %v2032_v31 }
 0x119   : > { %v6938_v21 = vpop.permute.xlu1 %590  ;;  %v6964_v33 = vrot.slane %v668_v62, 1  ;;  %v717_v31 = vsel %vm8629_vm0, %v715_v11, %v6973_v60 }
 0x11a   : > { %v2051_v6 = vrot.slane %v2035_v38, %v6530_v8  ;;  %5825 = vmatprep.mubr.msk.bf16.mxu0 %vm8630_vm11, %v2033_v14  ;;  %v735_v17 = vpop.permute.xlu0 %734  ;;  %v232_v38 = vld [vmem:[%s6213_s20 + $0x88] sm:$0xf] }
 0x11b   : > { %602 = vrot.lane.b32.xlu1 %v6617_v9, %s6102_s28  ;;  %v671_v45 = vsel %vm350_vm1, %v666_v2, %v6964_v33  ;;  %v268_v50 = vmax.bf16 %v6098_v3, %v232_v38 }
 0x11c   : > { %v2066_v57 = vcombine.low %v2044_v58, %v2051_v6  ;;  %892 = vrot.lane.b32.xlu0 %v571_v15, %s6106_s6  ;;  %v498_v58 = vshrl.u32 %v6804_v59, 16  ;;  %v267_v6 = vmax.bf16 %v6098_v3, %v231_v52 }
 0x11d   : > { %v6951_v43 = vpop.permute.xlu1 %695 }
 0x11e   : > { %v6955_v16 = vpop.permute.xlu0 %634  ;;  %v2074_v49 = vrot.slane %v2066_v57, %v6530_v8  ;;  %v7003_v62 = vor.u32 %v498_v58, %v6835_v48 }
 0x11f   : > { %650 = vrot.lane.b32.xlu1 %v6710_v27, %s6099_s21 }
 0x120   : > { %750 = vrot.lane.b32.xlu0 %v571_v15, %s6101_s27  ;;  %v2082_v9 = vcombine.low %v2074_v49, %v2081_v46  ;;  %v7005_v49 = vcombine.low %v267_v6, %v268_v50 }
 0x121   : > { %v6962_v23 = vpop.permute.xlu1 %638 }
 0x122   : > { %5826 = vmatmul.mubr.msk.bf16.gmra.mxu0 %vm8630_vm11, %v2082_v9  ;;  %v783_v56 = vpop.permute.xlu0 %782  ;;  %v963_v9 = vsel %vm945_vm4, %v922_v34, %v6799_v54  ;;  %v809_v54 = vshll.u32 %v7005_v49, 16  ;;  %v926_v34 = vsel %vm904_vm3, %v6387_v51, %v6809_v39 }
 0x123   : > { %705 = vrot.lane.b32.xlu1 %v6860_v19, %s6104_s4  ;;  %v1004_v2 = vsel %vm986_vm5, %v963_v9, %v6827_v1 }
 0x124   : > { %798 = vrot.lane.b32.xlu0 %v6924_v44, %s6100_s24  ;;  %v1045_v25 = vsel %vm1027_vm6, %v1004_v2, %v6876_v7  ;;  %v811_v58 = vrot.slane %v809_v54, 1 }
 0x125   : > { %v6975_v47 = vpop.permute.xlu1 %738  ;;  %v1086_v48 = vsel %vm1068_vm7, %v1045_v25, %v735_v17  ;;  %v807_v17 = vshrl.u32 %v7005_v49, 16 }
 0x126   : > { %v6979_v20 = vpop.permute.xlu0 %689 }
 0x127   : > { %537 = vrot.lane.b32.xlu1 %v6857_v26, %s6103_s29  ;;  %v233_v26 = vld [vmem:[%s6213_s20 + $0x8c] sm:$0x3]  ;;  %v812_v50 = vor.u32 %v811_v58, %v807_v17 }
 0x128   : > { %853 = vrot.lane.b32.xlu0 %v671_v45, %s6105_s5  ;;  %v269_v46 = vmax.bf16 %v6098_v3, %v233_v26 }
 0x129   : > { %v6988_v14 = vpop.permute.xlu1 %693 }
 0x12a   : > { %v838_v42 = vpop.permute.xlu0 %837  ;;  %v7020_v3 = vcombine.low %v269_v46, %v269_v46 }
 0x12b   : > { %896 = vrot.lane.b32.xlu1 %v717_v31, %s6106_s6 }
 0x12c   : > { %748 = vrot.lane.b32.xlu0 %v6764_v5, %s6101_s27  ;;  %v814_v6 = vshll.u32 %v7020_v3, 16 }
 0x12d   : > { %v787_v57 = vpop.permute.xlu1 %786 }
 0x12e   : > { %v733_v10 = vpop.permute.xlu0 %732  ;;  %v7039_v26 = vrot.slane %v814_v6, 1 }
 0x12f   : > { %796 = vrot.lane.b32.xlu1 %v6804_v59, %s6100_s24 }
 0x130   : > { %608 = vrot.lane.b32.xlu0 %v571_v15, %s6102_s28  ;;  %v1127_v15 = vsel %vm1109_vm8, %v1086_v48, %v783_v56  ;;  %v817_v39 = vsel %vm350_vm1, %v812_v50, %v7039_v26 }
 0x131   : > { %v7013_v11 = vpop.permute.xlu1 %525  ;;  %v1168_v1 = vsel %vm1150_vm9, %v1127_v15, %v838_v42 }
 0x132   : > { %v881_v28 = vpop.permute.xlu0 %880 }
 0x133   : > { %851 = vrot.lane.b32.xlu1 %v7003_v62, %s6105_s5  ;;  %v1209_v7 = vsel %vm8631_vm10, %v1168_v1, %v881_v28  ;;  %v920_v28 = vsel %vm904_vm3, %v6297_v0, %v6846_v35  ;;  %v862_v35 = vrot.slane %v7020_v3, 1 }
 0x134   : > { %656 = vrot.lane.b32.xlu0 %v6924_v44, %s6099_s21  ;;  %v1511_v56 = vrot.slane %v1209_v7, %v6530_v8  ;;  %v1504_v46 = vcombine.high %v1209_v7, %v1209_v7  ;;  %v1487_v7 = vcombine.high %v6893_v24, %v6893_v24 }
 0x135   : > { %v781_v52 = vpop.permute.xlu1 %780 }
 0x136   : > { %v7028_v38 = vpop.permute.xlu0 %736  ;;  %v1519_v9 = vcombine.high %v1511_v56, %v1511_v56  ;;  %v1527_v1 = vrot.slane %v1511_v56, %v6530_v8 }
 0x137   : > { %894 = vrot.lane.b32.xlu1 %v6922_v22, %s6106_s6 }
 0x138   : > { %711 = vrot.lane.b32.xlu0 %v671_v45, %s6104_s4  ;;  %v967_v45 = vsel %vm945_vm4, %v926_v34, %v6882_v41  ;;  %v1457_v41 = vcombine.high %v6866_v40, %v6866_v40  ;;  %v1541_v40 = vrot.slane %v1519_v9, %v6530_v8 }
 0x139   : > { %v7036_v44 = vpop.permute.xlu1 %596  ;;  %v1008_v25 = vsel %vm986_vm5, %v967_v45, %v6919_v12  ;;  %v961_v12 = vsel %vm945_vm4, %v920_v28, %v6929_v37 }
 0x13a   : > { %v842_v42 = vpop.permute.xlu0 %841  ;;  %v1049_v51 = vsel %vm1027_vm6, %v1008_v25, %v6951_v43  ;;  %v1002_v43 = vsel %vm986_vm5, %v961_v12, %v6955_v16  ;;  %v2085_v58 = vcombine.low %v1527_v1, %v1541_v40  ;;  %v5699_v6 = vcombine.high %v1527_v1, %v1541_v40 }
 0x13b   : > { %754 = vrot.lane.b32.xlu1 %v717_v31, %s6101_s27  ;;  %v1090_v0 = vsel %vm1068_vm7, %v1049_v51, %v6975_v47  ;;  %v1043_v37 = vsel %vm1027_vm6, %v1002_v43, %v6979_v20 }
 0x13c   : > { %535 = vrot.lane.b32.xlu0 %v6860_v19, %s6103_s29  ;;  %v861_v19 = vrot.slane %v7005_v49, 1  ;;  %v1131_v48 = vsel %vm1109_vm8, %v1090_v0, %v787_v57  ;;  %v1485_v57 = vrot.slane %v1457_v41, %v6530_v8  ;;  %v2107_v28 = vrot.slane %v2085_v58, %v6530_v8 }
 0x13d   : > { %v836_v2 = vpop.permute.xlu1 %835  ;;  %v1172_v47 = vsel %vm1150_vm9, %v1131_v48, %v842_v42  ;;  %v2114_v51 = vrot.slane %v5699_v6, %v6530_v8 }
 0x13e   : > { %v7050_v31 = vpop.permute.xlu0 %784  ;;  %v863_v20 = vsel %vm8629_vm0, %v861_v19, %v862_v35  ;;  %vm3165_vm0 = vcmp.ge.s32.totalorder %v6508_v55, 1 }
 0x13f   : > { %802 = vrot.lane.b32.xlu1 %v7005_v49, %s6100_s24  ;;  %v1518_v49 = vrot.slane %v1504_v46, %v6530_v8  ;;  %v2083_v46 = vcombine.low %v1485_v57, %v1487_v7 }
 0x140   : > { %606 = vrot.lane.b32.xlu0 %v6764_v5, %s6102_s28  ;;  %v1084_v5 = vsel %vm1068_vm7, %v1043_v37, %v733_v10  ;;  %v2116_v37 = vcombine.low %v2107_v28, %v2114_v51 }
 0x141   : > { %v7076_v54 = vpop.permute.xlu1 %644  ;;  %v1125_v17 = vsel %vm1109_vm8, %v1084_v5, %v781_v52  ;;  %v1520_v10 = vcombine.high %v1518_v49, %v1518_v49  ;;  %v924_v52 = vsel %vm904_vm3, %v6340_v29, %v6902_v36  ;;  %v1534_v0 = vrot.slane %v1518_v49, %v6530_v8 }
 0x142   : > { %v885_v15 = vpop.permute.xlu0 %884  ;;  %v1166_v56 = vsel %vm1150_vm9, %v1125_v17, %v836_v2  ;;  %v965_v9 = vsel %vm945_vm4, %v924_v52, %v6938_v21  ;;  %v1489_v2 = vcombine.high %v1485_v57, %v1485_v57  ;;  %v2093_v40 = vrot.slane %v2083_v46, %v6530_v8 }
 0x143   : > { %v7084_v16 = vsel %vm8631_vm10, %v1172_v47, %v885_v15  ;;  %857 = vrot.lane.b32.xlu1 %v817_v39, %s6105_s5  ;;  %v1548_v25 = vrot.slane %v1520_v10, %v6530_v8  ;;  %v1006_v39 = vsel %vm986_vm5, %v965_v9, %v6962_v23  ;;  %v672_v23 = vshrl.u32 %v6942_v30, 16 }
 0x144   : > { %654 = vrot.lane.b32.xlu0 %v6804_v59, %s6099_s21  ;;  %v1574_v50 = vrot.slane %v7084_v16, %v6530_v8  ;;  %v1047_v12 = vsel %vm1027_vm6, %v1006_v39, %v6988_v14  ;;  %v2130_v6 = vrot.slane %v2116_v37, %v6530_v8 }
 0x145   : > { %v879_v42 = vpop.permute.xlu1 %878  ;;  %v1088_v48 = vsel %vm1068_vm7, %v1047_v12, %v7028_v38  ;;  %v2132_v47 = vcombine.low %v1534_v0, %v1548_v25 }
 0x146   : > { %v1207_v24 = vsel %vm8631_vm10, %v1166_v56, %v879_v42  ;;  %v840_v34 = vpop.permute.xlu0 %839  ;;  %v1582_v19 = vcombine.high %v1574_v50, %v1574_v50  ;;  %v1590_v21 = vrot.slane %v1574_v50, %v6530_v8  ;;  %v1129_v14 = vsel %vm1109_vm8, %v1088_v48, %v7050_v31 }
 0x147   : > { %v1496_v45 = vrot.slane %v1207_v24, %v6530_v8  ;;  %900 = vrot.lane.b32.xlu1 %v863_v20, %s6106_s6  ;;  %v1170_v1 = vsel %vm1150_vm9, %v1129_v14, %v840_v34  ;;  %v674_v20 = vor.u32 %v672_v23, %v6964_v33  ;;  %v2142_v56 = vrot.slane %v2132_v47, %v6530_v8 }
 0x148   : > { %709 = vrot.lane.b32.xlu0 %v7003_v62, %s6104_s4  ;;  %v7137_v5 = vrot.slane %v1582_v19, %v6530_v8  ;;  %v1612_v38 = vcombine.high %v1590_v21, %v1590_v21 }
 0x149   : > { %v1503_v29 = vrot.slane %v1496_v45, %v6530_v8  ;;  %v7113_v36 = vpop.permute.xlu1 %699 }
 0x14a   : > { %v7118_v41 = vpop.permute.xlu0 %523  ;;  %v2135_v50 = vcombine.low %v7137_v5, %v1612_v38 }
 0x14b   : > { %v2084_v43 = vcombine.low %v1489_v2, %v1503_v29  ;;  %539 = vrot.lane.b32.xlu1 %v7003_v62, %s6103_s29  ;;  %v5700_v62 = vcombine.high %v1534_v0, %v1548_v25 }
 0x14c   : > { %752 = vrot.lane.b32.xlu0 %v6922_v22, %s6101_s27  ;;  %v2163_v45 = vrot.slane %v2135_v50, %v6530_v8  ;;  %v928_v50 = vsel %vm904_vm3, %v6393_v53, %v7118_v41 }
 0x14d   : > { %v2100_v49 = vrot.slane %v2084_v43, %v6530_v8  ;;  %v7134_v15 = vpop.permute.xlu1 %527  ;;  %v2149_v42 = vrot.slane %v5700_v62, %v6530_v8  ;;  %v1567_v62 = vcombine.high %v7084_v16, %v7084_v16 }
 0x14e   : > { %v883_v57 = vpop.permute.xlu0 %882 }
 0x14f   : > { %v2115_v7 = vcombine.low %v2093_v40, %v2100_v49  ;;  %v1211_v17 = vsel %vm8631_vm10, %v1170_v1, %v883_v57  ;;  %610 = vrot.lane.b32.xlu1 %v6922_v22, %s6102_s28  ;;  %v2164_v2 = vcombine.low %v2142_v56, %v2149_v42 }
 0x150   : > { %v1559_v31 = vrot.slane %v1211_v17, %v6530_v8  ;;  %800 = vrot.lane.b32.xlu0 %v6942_v30, %s6100_s24 }
 0x151   : > { %v7147_v10 = vpop.permute.xlu1 %594  ;;  %v2123_v58 = vrot.slane %v2115_v7, %v6530_v8  ;;  %v2172_v29 = vrot.slane %v2164_v2, %v6530_v8 }
 0x152   : > { %v1566_v22 = vrot.slane %v1559_v31, %v6530_v8  ;;  %v7155_v24 = vpop.permute.xlu0 %529  ;;  %v1581_v31 = vrot.slane %v1567_v62, %v6530_v8 }
 0x153   : > { %658 = vrot.lane.b32.xlu1 %v6942_v30, %s6099_s21  ;;  %v2131_v33 = vcombine.low %v2123_v58, %v2130_v6  ;;  %v818_v30 = vshrl.u32 %v7020_v3, 16 }
 0x154   : > { %v2134_v34 = vcombine.low %v1566_v22, %v1590_v21  ;;  %855 = vrot.lane.b32.xlu0 %v674_v20, %s6105_s5  ;;  %v1583_v58 = vcombine.high %v1581_v31, %v1581_v31  ;;  %v1597_v6 = vrot.slane %v1581_v31, %v6530_v8 }
 0x155   : > { %v7160_v52 = vpop.permute.xlu1 %598  ;;  %5829 = vmatprep.mubr.msk.bf16.mxu0 %vm8630_vm11, %v2131_v33  ;;  %v820_v21 = vor.u32 %v818_v30, %v7039_v26 }
 0x156   : > { %v2156_v46 = vrot.slane %v2134_v34, %v6530_v8  ;;  %v743_v9 = vpop.permute.xlu0 %742  ;;  %v1611_v22 = vrot.slane %v1583_v58, %v6530_v8  ;;  %v1613_v33 = vcombine.high %v1597_v6, %v1597_v6  ;;  %v1614_v34 = vcombine.high %v7137_v5, %v7137_v5 }
 0x157   : > { %713 = vrot.lane.b32.xlu1 %v674_v20, %s6104_s4  ;;  %v932_v5 = vsel %vm904_vm3, %v6461_v18, %v7134_v15  ;;  %v934_v18 = vsel %vm904_vm3, %v6543_v32, %v7155_v24 }
 0x158   : > { %v2165_v25 = vcombine.low %v2156_v46, %v2163_v45  ;;  %898 = vrot.lane.b32.xlu0 %v6973_v60, %s6106_s6  ;;  %v969_v45 = vsel %vm945_vm4, %v928_v50, %v7147_v10  ;;  %v2181_v41 = vcombine.low %v1614_v34, %v1597_v6 }
 0x159   : > { %v643_v28 = vpop.permute.xlu1 %642 }
 0x15a   : > { %v7169_v51 = vpop.permute.xlu0 %600  ;;  %v2179_v39 = vrot.slane %v2165_v25, %v6530_v8  ;;  %v2191_v62 = vrot.slane %v2181_v41, %v6530_v8 }
 0x15b   : > { %804 = vrot.lane.b32.xlu1 %v7020_v3, %s6100_s24  ;;  %v930_v3 = vsel %vm904_vm3, %v6454_v13, %v7013_v11 }
 0x15c   : > { %756 = vrot.lane.b32.xlu0 %v6973_v60, %s6101_s27  ;;  %v2180_v19 = vcombine.low %v2172_v29, %v2179_v39  ;;  %v2182_v39 = vcombine.low %v1611_v22, %v1613_v33 }
 0x15d   : > { %v647_v12 = vpop.permute.xlu1 %646 }
 0x15e   : > { %5830 = vmatmul.mubr.msk.bf16.gmra.mxu0 %vm8630_vm11, %v2180_v19  ;;  %v791_v0 = vpop.permute.xlu0 %790 }
 0x15f   : > { %902 = vrot.lane.b32.xlu1 %v862_v35, %s6106_s6  ;;  %v971_v35 = vsel %vm945_vm4, %v930_v3, %v7036_v44 }
 0x160   : > { %859 = vrot.lane.b32.xlu0 %v820_v21, %s6105_s5  ;;  %v1012_v1 = vsel %vm986_vm5, %v971_v35, %v7076_v54 }
 0x161   : > { %v698_v43 = vpop.permute.xlu1 %697  ;;  %v1053_v7 = vsel %vm1027_vm6, %v1012_v1, %v7113_v36  ;;  %v2198_v1 = vrot.slane %v2182_v39, %v6530_v8 }
 0x162   : > { %v7183_v48 = vpop.permute.xlu0 %648  ;;  %v1094_v17 = vsel %vm1068_vm7, %v1053_v7, %v743_v9  ;;  %v1010_v9 = vsel %vm986_vm5, %v969_v45, %v643_v28  ;;  %v973_v28 = vsel %vm945_vm4, %v932_v5, %v7160_v52 }
 0x163   : > { %v1135_v13 = vsel %vm1109_vm8, %v1094_v17, %v791_v0  ;;  %v1051_v30 = vsel %vm1027_vm6, %v1010_v9, %v698_v43  ;;  %v2213_v50 = vcombine.low %v2191_v62, %v2198_v1 }
 0x165   : > { %v702_v40 = vpop.permute.xlu1 %701 }
 0x166   : > { %v846_v23 = vpop.permute.xlu0 %845 }
 0x167   : > { %v1176_v44 = vsel %vm1150_vm9, %v1135_v13, %v846_v23  ;;  %v1014_v23 = vsel %vm986_vm5, %v973_v28, %v647_v12  ;;  %v975_v12 = vsel %vm945_vm4, %v934_v18, %v7169_v51 }
 0x168   : > { %v1055_v15 = vsel %vm1027_vm6, %v1014_v23, %v702_v40  ;;  %v1016_v17 = vsel %vm986_vm5, %v975_v12, %v7183_v48 }
 0x169   : > { %v741_v37 = vpop.permute.xlu1 %740 }
 0x16a   : > { %v7185_v60 = vpop.permute.xlu0 %703  ;;  %v1092_v53 = vsel %vm1068_vm7, %v1051_v30, %v741_v37 }
 0x16b   : > { %v1057_v13 = vsel %vm1027_vm6, %v1016_v17, %v7185_v60 }
 0x16d   : > { %v7187_v47 = vpop.permute.xlu1 %533 }
 0x16e   : > { %v889_v26 = vpop.permute.xlu0 %888 }
 0x16f   : > { %v1217_v16 = vsel %vm8631_vm10, %v1176_v44, %v889_v26  ;;  %v1615_v26 = vcombine.high %v1611_v22, %v1611_v22 }
 0x170   : > { %v1637_v56 = vrot.slane %v1217_v16, %v6530_v8  ;;  %v1630_v42 = vcombine.high %v1217_v16, %v1217_v16 }
 0x171   : > { %v7189_v14 = vpop.permute.xlu1 %746 }
 0x172   : > { %v745_v49 = vpop.permute.xlu0 %744  ;;  %v1645_v2 = vcombine.high %v1637_v56, %v1637_v56  ;;  %v1644_v29 = vrot.slane %v1630_v42, %v6530_v8  ;;  %v1653_v35 = vrot.slane %v1637_v56, %v6530_v8  ;;  %v1098_v51 = vsel %vm1068_vm7, %v1057_v13, %v7189_v14 }
 0x174   : > { %v1667_v21 = vrot.slane %v1645_v2, %v6530_v8  ;;  %v1646_v37 = vcombine.high %v1644_v29, %v1644_v29  ;;  %v1660_v48 = vrot.slane %v1644_v29, %v6530_v8 }
 0x175   : > { %v7198_v38 = vpop.permute.xlu1 %604 }
 0x176   : > { %v789_v57 = vpop.permute.xlu0 %788  ;;  %v2184_v32 = vcombine.low %v1653_v35, %v1667_v21  ;;  %v1674_v44 = vrot.slane %v1646_v37, %v6530_v8  ;;  %v5701_v9 = vcombine.high %v1653_v35, %v1667_v21 }
 0x177   : > { %v1133_v19 = vsel %vm1109_vm8, %v1092_v53, %v789_v57  ;;  %v1096_v57 = vsel %vm1068_vm7, %v1055_v15, %v745_v49 }
 0x178   : > { %v2212_v56 = vrot.slane %v2184_v32, %v6530_v8  ;;  %v2231_v22 = vcombine.low %v1660_v48, %v1674_v44  ;;  %v5702_v30 = vcombine.high %v1660_v48, %v1674_v44  ;;  %v2240_v39 = vrot.slane %v5701_v9, %v6530_v8 }
 0x179   : > { %v795_v11 = vpop.permute.xlu1 %794  ;;  %v6108_v32 = vmov 1983009808   ;;  %v7314_v9 = vstv %s5720_s8 }
 0x17a   : > { %v793_v20 = vpop.permute.xlu0 %792  ;;  %v2247_v29 = vrot.slane %v2231_v22, %v6530_v8  ;;  %vm3135_vm12 = vcmp.ge.s32.totalorder %v7314_v9, 1  ;;  %vm3145_vm13 = vcmp.le.s32.totalorder %v7314_v9, 16 }
 0x17b   : > { %v1137_v24 = vsel %vm1109_vm8, %v1096_v57, %v793_v20  ;;  %v1139_v20 = vsel %vm1109_vm8, %v1098_v51, %v795_v11  ;;  %vm7346_vm15 = vmand %vm3135_vm12, %vm3145_vm13 }
 0x17c   : > { %v2262_v23 = vcombine.low %v2240_v39, %v2247_v29 }
 0x17d   : > { %v7210_v54 = vpop.permute.xlu1 %652 }
 0x17e   : > { %v844_v36 = vpop.permute.xlu0 %843 }
 0x17f   : > { %v1174_v0 = vsel %vm1150_vm9, %v1133_v19, %v844_v36 }
 0x181   : > { %v850_v46 = vpop.permute.xlu1 %849 }
 0x182   : > { %v848_v25 = vpop.permute.xlu0 %847  ;;  %v1180_v36 = vsel %vm1150_vm9, %v1139_v20, %v850_v46  ;;  %v2221_v46 = vrot.slane %v2213_v50, %v6530_v8 }
 0x183   : > { %v1178_v16 = vsel %vm1150_vm9, %v1137_v24, %v848_v25  ;;  %v2650_v24 = vunpack.c.l.s4 %v6108_v32 }
 0x185   : > { %v7229_v10 = vpop.permute.xlu1 %531  ;;  %v2651_v51 = vunpack.c.0.s8 %v2650_v24 }
 0x186   : > { %v887_v43 = vpop.permute.xlu0 %886 }
 0x187   : > { %v1215_v3 = vsel %vm8631_vm10, %v1174_v0, %v887_v43  ;;  %v938_v0 = vsel %vm904_vm3, %v6700_v63, %v7187_v47  ;;  %v2254_v43 = vrot.slane %v5702_v30, %v6530_v8  ;;  %v2270_v47 = vrot.slane %v2262_v23, %v6530_v8 }
 0x188   : > { %v1622_v52 = vrot.slane %v1215_v3, %v6530_v8  ;;  %v7306_v22 = vsub.s32 %v2651_v51, %v6508_v55 }
 0x189   : > { %v891_v7 = vpop.permute.xlu1 %890 }
 0x18a   : > { %v1629_v40 = vrot.slane %v1622_v52, %v6530_v8  ;;  %v708_v31 = vpop.permute.xlu0 %707  ;;  %v1219_v58 = vsel %vm8631_vm10, %v1178_v16, %v891_v7 }
 0x18b   : > { %v1685_v33 = vrot.slane %v1219_v58, %v6530_v8  ;;  %v936_v58 = vsel %vm904_vm3, %v6550_v4, %v7229_v10 }
 0x18c   : > { %v2183_v49 = vcombine.low %v1615_v26, %v1629_v40  ;;  %v979_v26 = vsel %vm945_vm4, %v938_v0, %v7198_v38 }
 0x18d   : > { %v603_v6 = vpop.permute.xlu1 %602  ;;  %v1692_v53 = vrot.slane %v1685_v33, %v6530_v8  ;;  %v1020_v3 = vsel %vm986_vm5, %v979_v26, %v7210_v54 }
 0x18e   : > { %v2205_v60 = vrot.slane %v2183_v49, %v6530_v8  ;;  %v893_v42 = vpop.permute.xlu0 %892  ;;  %v1061_v35 = vsel %vm1027_vm6, %v1020_v3, %v708_v31  ;;  %v977_v20 = vsel %vm945_vm4, %v936_v58, %v603_v6 }
 0x18f   : > { %v1221_v14 = vsel %vm8631_vm10, %v1180_v36, %v893_v42 }
 0x190   : > { %v2214_v34 = vcombine.low %v2205_v60, %v2212_v56  ;;  %v1700_v45 = vrot.slane %v1221_v14, %v6530_v8  ;;  %v1693_v12 = vcombine.high %v1221_v14, %v1221_v14 }
 0x191   : > { %v651_v2 = vpop.permute.xlu1 %650 }
 0x192   : > { %v7268_v11 = vrot.slane %v1700_v45, %v6530_v8  ;;  %v751_v25 = vpop.permute.xlu0 %750  ;;  %v2228_v41 = vrot.slane %v2214_v34, %v6530_v8  ;;  %v1708_v40 = vcombine.high %v1700_v45, %v1700_v45  ;;  %v1707_v31 = vrot.slane %v1693_v12, %v6530_v8 }
 0x193   : > { %v1102_v63 = vsel %vm1068_vm7, %v1061_v35, %v751_v25  ;;  %v1018_v50 = vsel %vm986_vm5, %v977_v20, %v651_v2 }
 0x194   : > { %v2233_v5 = vcombine.low %v1692_v53, %v7268_v11  ;;  %v2229_v28 = vcombine.low %v2221_v46, %v2228_v41  ;;  %v1730_v49 = vrot.slane %v1708_v40, %v6530_v8  ;;  %v1709_v56 = vcombine.high %v1707_v31, %v1707_v31 }
 0x195   : > { %v706_v19 = vpop.permute.xlu1 %705  ;;  %v1723_v36 = vrot.slane %v1707_v31, %v6530_v8  ;;  %v1738_v6 = vcombine.high %v7268_v11, %v7268_v11 }
 0x196   : > { %v799_v21 = vpop.permute.xlu0 %798  ;;  %v2261_v37 = vrot.slane %v2233_v5, %v6530_v8  ;;  %5833 = vmatprep.mubr.msk.bf16.mxu0 %vm8630_vm11, %v2229_v28  ;;  %v1740_v14 = vcombine.high %v1730_v49, %v1730_v49  ;;  %v1059_v4 = vsel %vm1027_vm6, %v1018_v50, %v706_v19  ;;  %v1737_v25 = vrot.slane %v1709_v56, %v6530_v8 }
 0x197   : > { %v1143_v1 = vsel %vm1109_vm8, %v1102_v63, %v799_v21  ;;  %v1739_v2 = vcombine.high %v1723_v36, %v1723_v36  ;;  %v7327_v28 = vadd.s32 16, %v6508_v55 }
 0x198   : > { %v2263_v18 = vcombine.low %v2254_v43, %v2261_v37  ;;  %v2280_v5 = vcombine.low %v1740_v14, %v1723_v36 }
 0x199   : > { %v538_v15 = vpop.permute.xlu1 %537  ;;  %v2281_v43 = vcombine.low %v1737_v25, %v1739_v2  ;;  %vm3200_vm14 = vcmp.le.s32.totalorder %v7327_v28, 16 }
 0x19a   : > { %v854_v52 = vpop.permute.xlu0 %853  ;;  %v2277_v62 = vrot.slane %v2263_v18, %v6530_v8  ;;  %v942_v53 = vsel %vm904_vm3, %v6788_v61, %v538_v15  ;;  %v2279_v61 = vcombine.low %v1730_v49, %v1738_v6  ;;  %v1741_v15 = vcombine.high %v1737_v25, %v1737_v25  ;;  %vm3203_vm1 = vmand %vm7346_vm15, %vm3200_vm14 }
 0x19b   : > { %v1184_v57 = vsel %vm1150_vm9, %v1143_v1, %v854_v52  ;;  %v2296_v63 = vrot.slane %v2280_v5, %v6530_v8  ;;  %v2303_v40 = vrot.slane %v2281_v43, %v6530_v8 }
 0x19c   : > { %v2278_v7 = vcombine.low %v2270_v47, %v2277_v62  ;;  %v2289_v32 = vrot.slane %v2279_v61, %v6530_v8 }
 0x19d   : > { %v897_v38 = vpop.permute.xlu1 %896 }
 0x19e   : > { %v1225_v54 = vsel %vm8631_vm10, %v1184_v57, %v897_v38  ;;  %v749_v17 = vpop.permute.xlu0 %748  ;;  %5834 = vmatmul.mubr.msk.bf16.gmra.mxu0 %vm8630_vm11, %v2278_v7  ;;  %v2311_v58 = vcombine.low %v2289_v32, %v2296_v63 }
 0x19f   : > { %v1756_v13 = vcombine.high %v1225_v54, %v1225_v54  ;;  %v1763_v48 = vrot.slane %v1225_v54, %v6530_v8  ;;  %v1100_v45 = vsel %vm1068_vm7, %v1059_v4, %v749_v17 }
 0x1a1   : > { %v797_v44 = vpop.permute.xlu1 %796  ;;  %v1770_v60 = vrot.slane %v1756_v13, %v6530_v8  ;;  %v1771_v34 = vcombine.high %v1763_v48, %v1763_v48  ;;  %v1779_v3 = vrot.slane %v1763_v48, %v6530_v8 }
 0x1a2   : > { %v609_v16 = vpop.permute.xlu0 %608  ;;  %v1141_v30 = vsel %vm1109_vm8, %v1100_v45, %v797_v44 }
 0x1a3   : > { %v1772_v46 = vcombine.high %v1770_v60, %v1770_v60  ;;  %v1793_v21 = vrot.slane %v1771_v34, %v6530_v8  ;;  %v983_v37 = vsel %vm945_vm4, %v942_v53, %v609_v16  ;;  %v1786_v47 = vrot.slane %v1770_v60, %v6530_v8 }
 0x1a4   : > { %v2319_v34 = vrot.slane %v2311_v58, %v6530_v8 }
 0x1a5   : > { %v852_v42 = vpop.permute.xlu1 %851  ;;  %v7309_v10 = vpop.f32.mrf.mxu0  ;;  %v1800_v23 = vrot.slane %v1772_v46, %v6530_v8  ;;  %v2328_v62 = vcombine.low %v1779_v3, %v1793_v21  ;;  %v5703_v1 = vcombine.high %v1779_v3, %v1793_v21 }
 0x1a6   : > { %v657_v33 = vpop.permute.xlu0 %656  ;;  %v1182_v41 = vsel %vm1150_vm9, %v1141_v30, %v852_v42  ;;  %v7323_v11 = vrot.slane %v7309_v10, %v7306_v22 }
 0x1a7   : > { %v1024_v12 = vsel %vm986_vm5, %v983_v37, %v657_v33  ;;  %v2330_v7 = vcombine.low %v1786_v47, %v1800_v23  ;;  %v5704_v54 = vcombine.high %v1786_v47, %v1800_v23  ;;  %v2338_v16 = vrot.slane %v2328_v62, %v6530_v8 }
 0x1a8   : > { %v3239_v18 = vmax.f32 %v7323_v11, 0.0  ;;  %v2345_v51 = vrot.slane %v5703_v1, %v6530_v8 }
 0x1a9   : > { %v895_v29 = vpop.permute.xlu1 %894  ;;  %v2352_v48 = vrot.slane %v2330_v7, %v6530_v8  ;;  %v2359_v20 = vrot.slane %v5704_v54, %v6530_v8 }
 0x1aa   : > { %v712_v39 = vpop.permute.xlu0 %711  ;;  %v1223_v19 = vsel %vm8631_vm10, %v1182_v41, %v895_v29  ;;  %v3511_v24 = vrot.slane %v3239_v18, %v7306_v22  ;;  %v2360_v4 = vcombine.low %v2338_v16, %v2345_v51 }
 0x1ab   : > { %v1748_v0 = vrot.slane %v1223_v19, %v6530_v8  ;;  %v1065_v44 = vsel %vm1027_vm6, %v1024_v12, %v712_v39  ;;  %v2361_v2 = vcombine.low %v2352_v48, %v2359_v20 }
 0x1ac   : > { %v3913_v42 = vsel %vm3203_vm1, %v3511_v24, 0.0  ;;  %v2368_v5 = vrot.slane %v2360_v4, %v6530_v8 }
 0x1ad   : > { %v755_v26 = vpop.permute.xlu1 %754  ;;  %v1755_v35 = vrot.slane %v1748_v0, %v6530_v8  ;;  %v7366_v33 = vpack.c.bf16 %v3913_v42, %v3913_v42  ;;  %v2375_v19 = vrot.slane %v2361_v2, %v6530_v8 }
 0x1ae   : > { %v536_v52 = vpop.permute.xlu0 %535  ;;  %v1106_v60 = vsel %vm1068_vm7, %v1065_v44, %v755_v26 }
 0x1af   : > { %v2282_v57 = vcombine.low %v1741_v15, %v1755_v35  ;;  %v940_v36 = vsel %vm904_vm3, %v6710_v27, %v536_v52  ;;  %4188 = vrot.lane.b32.xlu1 %v7366_v33, %s6099_s21  ;;  %v2376_v43 = vcombine.low %v2368_v5, %v2375_v19 }
 0x1b1   : > { %v803_v17 = vpop.permute.xlu1 %802  ;;  %v2310_v31 = vrot.slane %v2282_v57, %v6530_v8 }
 0x1b2   : > { %v607_v13 = vpop.permute.xlu0 %606  ;;  %v1147_v14 = vsel %vm1109_vm8, %v1106_v60, %v803_v17 }
 0x1b3   : > { %v2312_v49 = vcombine.low %v2303_v40, %v2310_v31  ;;  %v981_v27 = vsel %vm945_vm4, %v940_v36, %v607_v13  ;;  %v2531_v31 = vpop.f32.mrf.mxu0 }
 0x1b5   : > { %v858_v56 = vpop.permute.xlu1 %857  ;;  %v2326_v45 = vrot.slane %v2312_v49, %v6530_v8  ;;  %v5824_v20 = vpop.f32.mrf.mxu0 }
 0x1b6   : > { %v655_v50 = vpop.permute.xlu0 %654  ;;  %v1188_v6 = vsel %vm1150_vm9, %v1147_v14, %v858_v56 }
 0x1b7   : > { %v2327_v46 = vcombine.low %v2319_v34, %v2326_v45  ;;  %v1022_v39 = vsel %vm986_vm5, %v981_v27, %v655_v50  ;;  %v2534_v45 = vpop.f32.mrf.mxu0 }
 0x1b9   : > { %v901_v25 = vpop.permute.xlu1 %900  ;;  %5837 = vmatprep.mubr.msk.bf16.mxu0 %vm8630_vm11, %v2327_v46 }
 0x1ba   : > { %v710_v30 = vpop.permute.xlu0 %709  ;;  %v1229_v29 = vsel %vm8631_vm10, %v1188_v6, %v901_v25  ;;  %5838 = vmatmul.mubr.msk.bf16.gmra.mxu0 %vm8630_vm11, %v2376_v43  ;;  %v2682_v43 = vcombine.high %v7309_v10, %v7309_v10 }
 0x1bb   : > { %v1819_v53 = vcombine.high %v1229_v29, %v1229_v29  ;;  %v1826_v41 = vrot.slane %v1229_v29, %v6530_v8  ;;  %v1063_v37 = vsel %vm1027_vm6, %v1022_v39, %v710_v30 }
 0x1bd   : > { %v540_v21 = vpop.permute.xlu1 %539  ;;  %v1833_v0 = vrot.slane %v1819_v53, %v6530_v8  ;;  %v1834_v61 = vcombine.high %v1826_v41, %v1826_v41  ;;  %v1842_v47 = vrot.slane %v1826_v41, %v6530_v8  ;;  %v2665_v41 = vcombine.high %v2534_v45, %v2534_v45 }
 0x1be   : > { %v753_v23 = vpop.permute.xlu0 %752  ;;  %v944_v63 = vsel %vm904_vm3, %v6804_v59, %v540_v21  ;;  %v2648_v21 = vcombine.high %v2531_v31, %v2531_v31 }
 0x1bf   : > { %v1835_v3 = vcombine.high %v1833_v0, %v1833_v0  ;;  %v1849_v18 = vrot.slane %v1833_v0, %v6530_v8  ;;  %v1856_v15 = vrot.slane %v1834_v61, %v6530_v8  ;;  %v1104_v35 = vsel %vm1068_vm7, %v1063_v37, %v753_v23 }
 0x1c0   : > { %v1864_v13 = vcombine.high %v1842_v47, %v1842_v47  ;;  %v2679_v37 = vrot.slane %v2665_v41, %v7306_v22 }
 0x1c1   : > { %v611_v26 = vpop.permute.xlu1 %610  ;;  %v1863_v12 = vrot.slane %v1835_v3, %v6530_v8  ;;  %v1865_v57 = vcombine.high %v1849_v18, %v1849_v18  ;;  %v1866_v7 = vcombine.high %v1856_v15, %v1856_v15  ;;  %v2662_v3 = vrot.slane %v2648_v21, %v7306_v22 }
 0x1c2   : > { %v801_v52 = vpop.permute.xlu0 %800  ;;  %v985_v54 = vsel %vm945_vm4, %v944_v63, %v611_v26  ;;  %v2378_v56 = vcombine.low %v1856_v15, %v1864_v13  ;;  %v2655_v63 = vrot.slane %v2531_v31, %v7306_v22  ;;  %v3237_v13 = vmax.f32 %v2679_v37, 0.0 }
 0x1c3   : > { %v1145_v62 = vsel %vm1109_vm8, %v1104_v35, %v801_v52  ;;  %v2379_v59 = vcombine.low %v1866_v7, %v1849_v18  ;;  %v2380_v44 = vcombine.low %v1863_v12, %v1865_v57  ;;  %v1867_v0 = vcombine.high %v1863_v12, %v1863_v12 }
 0x1c4   : > { %v2394_v27 = vrot.slane %v2378_v56, %v6530_v8  ;;  %v2672_v18 = vrot.slane %v2534_v45, %v7306_v22  ;;  %v2696_v35 = vrot.slane %v2682_v43, %v7306_v22  ;;  %v2699_v52 = vcombine.high %v5824_v20, %v5824_v20 }
 0x1c5   : > { %v659_v1 = vpop.permute.xlu1 %658  ;;  %v2401_v36 = vrot.slane %v2379_v59, %v6530_v8  ;;  %v2408_v60 = vrot.slane %v2380_v44, %v6530_v8  ;;  %v2664_v12 = vcombine.high %v2662_v3, %v2662_v3  ;;  %v2697_v44 = vcombine.high %v7323_v11, %v7323_v11 }
 0x1c6   : > { %v856_v17 = vpop.permute.xlu0 %855  ;;  %v1026_v24 = vsel %vm986_vm5, %v985_v54, %v659_v1  ;;  %v3123_v1 = vadd.s32 2, %v7314_v9  ;;  %v2680_v57 = vcombine.high %v2672_v18, %v2672_v18  ;;  %v2698_v7 = vcombine.high %v2696_v35, %v2696_v35 }
 0x1c7   : > { %v1186_v32 = vsel %vm1150_vm9, %v1145_v62, %v856_v17  ;;  %v2410_v46 = vcombine.low %v2401_v36, %v2408_v60  ;;  %v2706_v62 = vrot.slane %v5824_v20, %v7306_v22  ;;  %v2713_v54 = vrot.slane %v2699_v52, %v7306_v22 }
 0x1c8   : > { %v2663_v17 = vcombine.high %v2655_v63, %v2655_v63  ;;  %vm3137_vm2 = vcmp.ge.s32.totalorder %v3123_v1, 1  ;;  %vm3147_vm12 = vcmp.le.s32.totalorder %v3123_v1, 16  ;;  %v3234_v31 = vmax.f32 %v2664_v12, 0.0 }
 0x1c9   : > { %v714_v40 = vpop.permute.xlu1 %713  ;;  %v2424_v19 = vrot.slane %v2410_v46, %v6530_v8  ;;  %v3235_v20 = vmax.f32 %v2672_v18, 0.0  ;;  %v3231_v60 = vmax.f32 %v2655_v63, 0.0  ;;  %v3240_v45 = vmax.f32 %v2697_v44, 0.0  ;;  %vm7441_vm13 = vmand %vm3137_vm2, %vm3147_vm12 }
 0x1ca   : > { %v899_v16 = vpop.permute.xlu0 %898  ;;  %v1067_v58 = vsel %vm1027_vm6, %v1026_v24, %v714_v40  ;;  %v2714_v24 = vcombine.high %v2706_v62, %v2706_v62  ;;  %vm3209_vm1 = vmand %vm7441_vm13, %vm3200_vm14 }
 0x1cb   : > { %v1227_v51 = vsel %vm8631_vm10, %v1186_v32, %v899_v16  ;;  %v3242_v16 = vmax.f32 %v2698_v7, 0.0 }
 0x1cc   : > { %v1811_v49 = vrot.slane %v1227_v51, %v6530_v8  ;;  %v3233_v51 = vmax.f32 %v2662_v3, 0.0 }
 0x1cd   : > { %v805_v48 = vpop.permute.xlu1 %804 }
 0x1ce   : > { %v1818_v42 = vrot.slane %v1811_v49, %v6530_v8  ;;  %v757_v50 = vpop.permute.xlu0 %756  ;;  %v2715_v49 = vcombine.high %v2713_v54, %v2713_v54 }
 0x1cf   : > { %v1108_v14 = vsel %vm1068_vm7, %v1067_v58, %v757_v50  ;;  %v3244_v50 = vmax.f32 %v2714_v24, 0.0 }
 0x1d0   : > { %v2377_v4 = vcombine.low %v1818_v42, %v1842_v47  ;;  %v1149_v6 = vsel %vm1109_vm8, %v1108_v14, %v805_v48  ;;  %v2681_v47 = vcombine.high %v2679_v37, %v2679_v37  ;;  %v3232_v48 = vmax.f32 %v2663_v17, 0.0 }
 0x1d1   : > { %v903_v34 = vpop.permute.xlu1 %902  ;;  %v3243_v42 = vmax.f32 %v2706_v62, 0.0 }
 0x1d2   : > { %v2387_v25 = vrot.slane %v2377_v4, %v6530_v8  ;;  %v860_v2 = vpop.permute.xlu0 %859  ;;  %v3238_v32 = vmax.f32 %v2681_v47, 0.0  ;;  %v3472_v4 = vcombine.low %v3233_v51, %v3234_v31 }
 0x1d3   : > { %v1190_v30 = vsel %vm1150_vm9, %v1149_v6, %v860_v2  ;;  %v3245_v6 = vmax.f32 %v2713_v54, 0.0 }
 0x1d4   : > { %v2409_v29 = vcombine.low %v2387_v25, %v2394_v27  ;;  %v1231_v53 = vsel %vm8631_vm10, %v1190_v30, %v903_v34  ;;  %v3489_v56 = vcombine.low %v3237_v13, %v3238_v32  ;;  %v3241_v27 = vmax.f32 %v2696_v35, 0.0 }
 0x1d5   : > { %v1874_v39 = vrot.slane %v1231_v53, %v6530_v8  ;;  %v3246_v25 = vmax.f32 %v2715_v49, 0.0  ;;  %v3471_v30 = vcombine.low %v3231_v60, %v3232_v48  ;;  %v3486_v21 = vrot.slane %v3472_v4, %v7306_v22 }
 0x1d6   : > { %v2417_v5 = vrot.slane %v2409_v29, %v6530_v8  ;;  %v3503_v29 = vrot.slane %v3489_v56, %v7306_v22 }
 0x1d7   : > { %v1881_v61 = vrot.slane %v1874_v39, %v6530_v8  ;;  %v3479_v37 = vrot.slane %v3471_v30, %v7306_v22 }
 0x1d8   : > { %v2425_v23 = vcombine.low %v2417_v5, %v2424_v19  ;;  %v3122_v19 = vadd.s32 1, %v7314_v9 }
 0x1d9   : > { %v2426_v26 = vcombine.low %v1867_v0, %v1881_v61  ;;  %v3513_v0 = vcombine.low %v3242_v16, %v3243_v42  ;;  %v3529_v61 = vcombine.low %v3244_v50, %v3245_v6  ;;  %v3487_v52 = vcombine.low %v3479_v37, %v3486_v21 }
 0x1da   : > { %5841 = vmatprep.mubr.msk.bf16.mxu0 %vm8630_vm11, %v2425_v23  ;;  %v3512_v23 = vcombine.low %v3240_v45, %v3241_v27  ;;  %vm3136_vm2 = vcmp.ge.s32.totalorder %v3122_v19, 1  ;;  %vm3146_vm12 = vcmp.le.s32.totalorder %v3122_v19, 16 }
 0x1db   : > { %v2433_v15 = vrot.slane %v2426_v26, %v6530_v8  ;;  %v3527_v63 = vrot.slane %v3513_v0, %v7306_v22  ;;  %v3537_v47 = vrot.slane %v3529_v61, %v7306_v22 }
 0x1dd   : > { %v2440_v10 = vrot.slane %v2433_v15, %v6530_v8  ;;  %v3236_v8 = vmax.f32 %v2680_v57, 0.0 }
 0x1df   : > { %5842 = vmatmul.mubr.msk.bf16.gmra.mxu0 %vm8630_vm11, %v2440_v10  ;;  %v3488_v11 = vcombine.low %v3235_v20, %v3236_v8  ;;  %v3520_v10 = vrot.slane %v3512_v23, %v7306_v22  ;;  %vm3168_vm11 = vmand %vm7346_vm15, %vm3165_vm0 }
 0x1e0   : > { %v3911_v32 = vsel %vm3168_vm11, %v3487_v52, 0.0  ;;  %vm3174_vm11 = vmand %vm7441_vm13, %vm3165_vm0 }
 0x1e1   : > { %v3496_v43 = vrot.slane %v3488_v11, %v7306_v22  ;;  %v3528_v17 = vcombine.low %v3520_v10, %v3527_v63 }
 0x1e2   : > { %v7425_v40 = vpop.f32.mrf.mxu0 }
 0x1e3   : > { %v2750_v59 = vcombine.high %v7425_v40, %v7425_v40  ;;  %v3504_v26 = vcombine.low %v3496_v43, %v3503_v29 }
 0x1e4   : > { %v7431_v58 = vpop.f32.mrf.mxu0 }
 0x1e5   : > { %v7434_v36 = vrot.slane %v2750_v59, %v7306_v22  ;;  %v2723_v14 = vrot.slane %v7431_v58, %v7306_v22  ;;  %v3912_v7 = vsel %vm7346_vm15, %v3504_v26, 0.0  ;;  %v2716_v24 = vcombine.high %v7431_v58, %v7431_v58 }
 0x1e6   : > { %v7447_v5 = vpop.f32.mrf.mxu0  ;;  %v3941_v38 = vpack.c.bf16 %v3912_v7, %v3911_v32  ;;  %v2757_v59 = vrot.slane %v7425_v40, %v7306_v22 }
 0x1e7   : > { %v3257_v34 = vmax.f32 %v7434_v36, 0.0  ;;  %v3247_v2 = vmax.f32 %v2723_v14, 0.0  ;;  %v2731_v53 = vcombine.high %v2723_v14, %v2723_v14  ;;  %v2730_v58 = vrot.slane %v2716_v24, %v7306_v22 }
 0x1e8   : > { %v2550_v15 = vpop.f32.mrf.mxu0  ;;  %v2765_v20 = vcombine.high %v2757_v59, %v2757_v59  ;;  %v4059_v60 = vshrl.u32 %v3941_v38, 16  ;;  %v3255_v6 = vmax.f32 %v2757_v59, 0.0  ;;  %v4062_v43 = vshll.u32 %v3941_v38, 16 }
 0x1e9   : > { %v3593_v41 = vrot.slane %v3257_v34, %v7306_v22  ;;  %v3530_v39 = vcombine.low %v3246_v25, %v3247_v2  ;;  %v3248_v3 = vmax.f32 %v2731_v53, 0.0  ;;  %v2733_v57 = vcombine.high %v2550_v15, %v2550_v15 }
 0x1ea   : > { %v2740_v44 = vrot.slane %v2550_v15, %v7306_v22  ;;  %v2732_v42 = vcombine.high %v2730_v58, %v2730_v58  ;;  %v3256_v40 = vmax.f32 %v2765_v20, 0.0  ;;  %v4033_v34 = vrot.slane %v3941_v38, 7 }
 0x1eb   : > { %v3544_v18 = vrot.slane %v3530_v39, %v7306_v22  ;;  %v3919_v35 = vsel %vm3209_vm1, %v3593_v41, 0.0  ;;  %v3552_v12 = vrot.slane %v3248_v3, %v7306_v22  ;;  %vm7471_vm1 = vmand %vm3136_vm2, %vm3146_vm12  ;;  %v2747_v31 = vrot.slane %v2733_v57, %v7306_v22 }
 0x1ec   : > { %v7462_v62 = vpack.c.bf16 %v3919_v35, %v3919_v35  ;;  %vm3206_vm10 = vmand %vm7471_vm1, %vm3200_vm14  ;;  %v2748_v56 = vcombine.high %v2740_v44, %v2740_v44  ;;  %v4061_v45 = vrot.slane %v4059_v60, 7  ;;  %v3250_v27 = vmax.f32 %v2732_v42, 0.0 }
 0x1ed   : > { %v3545_v1 = vcombine.low %v3537_v47, %v3544_v18  ;;  %vm3171_vm15 = vmand %vm7471_vm1, %vm3165_vm0  ;;  %v3916_v8 = vsel %vm3206_vm10, %v3552_v12, 0.0  ;;  %v2749_v48 = vcombine.high %v2747_v31, %v2747_v31  ;;  %v3253_v4 = vmax.f32 %v2747_v31, 0.0 }
 0x1ee   : > { %4376 = vrot.lane.b32.xlu0 %v7462_v62, %s6109_s9  ;;  %4286 = vrot.lane.b32.xlu1 %v7462_v62, %s6100_s24  ;;  %v3914_v16 = vsel %vm3171_vm15, %v3528_v17, 0.0  ;;  %v3944_v51 = vpack.c.bf16 %v3916_v8, %v3916_v8  ;;  %v3252_v14 = vmax.f32 %v2748_v56, 0.0  ;;  %v3251_v25 = vmax.f32 %v2740_v44, 0.0 }
 0x1ef   : > { %v3915_v13 = vsel %vm7471_vm1, %v3545_v1, 0.0  ;;  %v3254_v50 = vmax.f32 %v2749_v48, 0.0  ;;  %vm4057_vm10 = vsmask.f32 256  ;;  %v3571_v29 = vcombine.low %v3255_v6, %v3256_v40 }
 0x1f0   : > { %v3943_v49 = vpack.c.bf16 %v3915_v13, %v3914_v16  ;;  %v3249_v53 = vmax.f32 %v2730_v58, 0.0  ;;  %v3554_v41 = vcombine.low %v3251_v25, %v3252_v14  ;;  %v4066_v39 = vshll.u32 %v7366_v33, 16 }
 0x1f1   : > { %v3570_v2 = vcombine.low %v3253_v4, %v3254_v50  ;;  %v3585_v23 = vrot.slane %v3571_v29, %v7306_v22  ;;  %v4077_v26 = vshll.u32 %v3944_v51, 16  ;;  %v4064_v3 = vor.u32 %v4062_v43, %v4061_v45 }
 0x1f2   : > { %4196 = vrot.lane.b32.xlu1 %v7462_v62, %s6099_s21  ;;  %4186 = vrot.lane.b32.xlu0 %v3941_v38, %s6099_s21  ;;  %v4034_v11 = vrot.slane %v3943_v49, 7  ;;  %v4070_v30 = vshrl.u32 %v3943_v49, 16  ;;  %v3553_v19 = vcombine.low %v3249_v53, %v3250_v27  ;;  %v4068_v0 = vsel %vm4057_vm10, %v4061_v45, %v4066_v39 }
 0x1f3   : > { %v3578_v21 = vrot.slane %v3570_v2, %v7306_v22  ;;  %v3568_v37 = vrot.slane %v3554_v41, %v7306_v22  ;;  %v4073_v35 = vshll.u32 %v3943_v49, 16  ;;  %v2767_v12 = vcombine.high %v7447_v5, %v7447_v5 }
 0x1f4   : > { %v4072_v61 = vrot.slane %v4070_v30, 7  ;;  %v3561_v18 = vrot.slane %v3553_v19, %v7306_v22  ;;  %v2774_v57 = vrot.slane %v7447_v5, %v7306_v22  ;;  %v2766_v54 = vcombine.high %v7434_v36, %v7434_v36 }
 0x1f5   : > { %v3586_v33 = vcombine.low %v3578_v21, %v3585_v23  ;;  %v2781_v46 = vrot.slane %v2767_v12, %v7306_v22  ;;  %v3124_v8 = vadd.s32 3, %v7314_v9 }
 0x1f6   : > { %4192 = vrot.lane.b32.xlu1 %v3944_v51, %s6099_s21  ;;  %4190 = vrot.lane.b32.xlu0 %v3943_v49, %s6099_s21  ;;  %v4079_v15 = vsel %vm4057_vm10, %v4072_v61, %v4077_v26  ;;  %v3569_v52 = vcombine.low %v3561_v18, %v3568_v37  ;;  %v4075_v63 = vor.u32 %v4073_v35, %v4072_v61  ;;  %v3258_v5 = vmax.f32 %v2766_v54, 0.0 }
 0x1f7   : > { %v3918_v47 = vsel %vm7441_vm13, %v3586_v33, 0.0  ;;  %v2782_v7 = vcombine.high %v2774_v57, %v2774_v57  ;;  %v3261_v38 = vmax.f32 %v2781_v46, 0.0  ;;  %v3259_v31 = vmax.f32 %v2774_v57, 0.0 }
 0x1f8   : > { %v3917_v10 = vsel %vm3174_vm11, %v3569_v52, 0.0  ;;  %v2783_v13 = vcombine.high %v2781_v46, %v2781_v46  ;;  %vm3138_vm13 = vcmp.ge.s32.totalorder %v3124_v8, 1  ;;  %vm3148_vm2 = vcmp.le.s32.totalorder %v3124_v8, 16 }
 0x1f9   : > { %v7524_v1 = vpack.c.bf16 %v3918_v47, %v3917_v10  ;;  %v3260_v32 = vmax.f32 %v2782_v7, 0.0  ;;  %v3594_v36 = vcombine.low %v3258_v5, %v3259_v31  ;;  %vm7550_vm12 = vmand %vm3138_vm13, %vm3148_vm2  ;;  %v3125_v5 = vadd.s32 4, %v7314_v9 }
 0x1fa   : > { %4282 = vrot.lane.b32.xlu1 %v3944_v51, %s6100_s24  ;;  %4280 = vrot.lane.b32.xlu0 %v3943_v49, %s6100_s24  ;;  %v3262_v48 = vmax.f32 %v2783_v13, 0.0  ;;  %vm3212_vm1 = vmand %vm7550_vm12, %vm3200_vm14  ;;  %v4088_v13 = vshll.u32 %v7462_v62, 16  ;;  %v5969_v62 = vld [vmem:[%s8627_s2 + $0x10] ss:$0 sps:$4 sm:$0xff]   ;;  %vm4771_vm2 = vcmask 1043456  }
 0x1fb   : > { %v4035_v17 = vrot.slane %v7524_v1, 7  ;;  %v3595_v44 = vcombine.low %v3260_v32, %v3261_v38  ;;  %v3602_v4 = vrot.slane %v3594_v36, %v7306_v22  ;;  %vm3177_vm15 = vmand %vm7550_vm12, %vm3165_vm0  ;;  %v4081_v39 = vshrl.u32 %v7524_v1, 16  ;;  %5868 = vmatprep.subr.msk.bf16.mxu1 %vm4771_vm2, %v5969_v62 }
 0x1fc   : > { %vm3139_vm11 = vcmp.ge.s32.totalorder %v3125_v5, 1  ;;  %vm3149_vm13 = vcmp.le.s32.totalorder %v3125_v5, 16 }
 0x1fd   : > { %v3609_v60 = vrot.slane %v3595_v44, %v7306_v22  ;;  %v4083_v18 = vrot.slane %v4081_v39, 7 }
 0x1fe   : > { %4043 = vrot.lane.b32.xlu1 %v4034_v11, %s6103_s29  ;;  %4041 = vrot.lane.b32.xlu0 %v4033_v34, %s6103_s29 }
 0x1ff   : > { %v3610_v27 = vcombine.low %v3602_v4, %v3609_v60  ;;  %v5970_v4 = vld [vmem:[%s8627_s2 + $0x8] sm:$0xff]  }
 0x201   : > { %v3920_v23 = vsel %vm3177_vm15, %v3610_v27, 0.0 }
 0x202   : > { %4148 = vrot.lane.b32.xlu1 %v4068_v0, %s6102_s28  ;;  %4220 = vrot.lane.b32.xlu0 %v4034_v11, %s6104_s4 }
 0x206   : > { %4152 = vrot.lane.b32.xlu1 %v4079_v15, %s6102_s28  ;;  %4146 = vrot.lane.b32.xlu0 %v4064_v3, %s6102_s28 }
 0x20a   : > { %4249 = vrot.lane.b32.xlu1 %v4079_v15, %s6101_s27  ;;  %4150 = vrot.lane.b32.xlu0 %v4075_v63, %s6102_s28  ;;  %v4084_v15 = vshll.u32 %v7524_v1, 16 }
 0x20c   : > { %v4086_v47 = vor.u32 %v4084_v15, %v4083_v18 }
 0x20e   : > { %4374 = vrot.lane.b32.xlu1 %v7524_v1, %s6109_s9  ;;  %4247 = vrot.lane.b32.xlu0 %v4075_v63, %s6101_s27 }
 0x212   : > { %4284 = vrot.lane.b32.xlu0 %v7524_v1, %s6100_s24 }
 0x216   : > { %4194 = vrot.lane.b32.xlu0 %v7524_v1, %s6099_s21 }
 0x21a   : > { %4314 = vrot.lane.b32.xlu0 %v4035_v17, %s6105_s5 }
 0x21e   : > { %v5831_v24 = vpop.f32.mrf.mxu0  ;;  %4045 = vrot.lane.b32.xlu0 %v4035_v17, %s6103_s29 }
 0x21f   : > { %v2818_v2 = vcombine.high %v5831_v24, %v5831_v24  ;;  %v2825_v26 = vrot.slane %v5831_v24, %v7306_v22 }
 0x220   : > { %v2563_v59 = vpop.f32.mrf.mxu0 }
 0x221   : > { %v2784_v16 = vcombine.high %v2563_v59, %v2563_v59  ;;  %v2791_v51 = vrot.slane %v2563_v59, %v7306_v22  ;;  %v2832_v61 = vrot.slane %v2818_v2, %v7306_v22  ;;  %v2833_v63 = vcombine.high %v2825_v26, %v2825_v26 }
 0x222   : > { %v7546_v58 = vpop.f32.mrf.mxu0 }
 0x223   : > { %v2798_v49 = vrot.slane %v2784_v16, %v7306_v22  ;;  %v2799_v20 = vcombine.high %v2791_v51, %v2791_v51  ;;  %v3263_v56 = vmax.f32 %v2791_v51, 0.0  ;;  %v2834_v35 = vcombine.high %v2832_v61, %v2832_v61 }
 0x224   : > { %v2566_v11 = vpop.f32.mrf.mxu0  ;;  %v3272_v54 = vmax.f32 %v2833_v63, 0.0  ;;  %v3273_v32 = vmax.f32 %v2832_v61, 0.0  ;;  %v4090_v51 = vsel %vm4057_vm10, %v4083_v18, %v4088_v13 }
 0x225   : > { %v2800_v42 = vcombine.high %v2798_v49, %v2798_v49  ;;  %v3265_v50 = vmax.f32 %v2798_v49, 0.0  ;;  %v3264_v40 = vmax.f32 %v2799_v20, 0.0  ;;  %v3611_v14 = vcombine.low %v3262_v48, %v3263_v56 }
 0x226   : > { %v2801_v53 = vcombine.high %v2566_v11, %v2566_v11  ;;  %v2808_v43 = vrot.slane %v2566_v11, %v7306_v22  ;;  %v3274_v57 = vmax.f32 %v2834_v35, 0.0 }
 0x227   : > { %v3266_v6 = vmax.f32 %v2800_v42, 0.0  ;;  %v3612_v45 = vcombine.low %v3264_v40, %v3265_v50  ;;  %v3619_v30 = vrot.slane %v3611_v14, %v7306_v22  ;;  %v4773_v50 = vsel %vm4771_vm2, %v5969_v62, 0 }
 0x228   : > { %v2815_v21 = vrot.slane %v2801_v53, %v7306_v22  ;;  %v2816_v52 = vcombine.high %v2808_v43, %v2808_v43  ;;  %v3267_v38 = vmax.f32 %v2808_v43, 0.0  ;;  %v3653_v31 = vcombine.low %v3273_v32, %v3274_v57  ;;  %5846 = vmatpush3.bf16.msra.mxu1 %v4773_v50 }
 0x229   : > { %v3634_v25 = vrot.slane %v3266_v6, %v7306_v22  ;;  %v3626_v29 = vrot.slane %v3612_v45, %v7306_v22  ;;  %5847 = vmatprep.subr.bf16.mxu1 %v5970_v4  ;;  %v5971_v45 = vld [vmem:[%s8627_s2] sm:$0xff]   ;;  %v2835_v43 = vcombine.high %v7546_v58, %v7546_v58 }
 0x22a   : > { %v2817_v33 = vcombine.high %v2815_v21, %v2815_v21  ;;  %v3268_v46 = vmax.f32 %v2816_v52, 0.0  ;;  %v3269_v7 = vmax.f32 %v2815_v21, 0.0  ;;  %v3667_v36 = vrot.slane %v3653_v31, %v7306_v22 }
 0x22b   : > { %v3922_v41 = vsel %vm3212_vm1, %v3634_v25, 0.0  ;;  %v3627_v19 = vcombine.low %v3619_v30, %v3626_v29  ;;  %v2842_v25 = vrot.slane %v7546_v58, %v7306_v22 }
 0x22c   : > { %v7567_v0 = vpack.c.bf16 %v3922_v41, %v3922_v41  ;;  %v3270_v10 = vmax.f32 %v2817_v33, 0.0  ;;  %v3635_v8 = vcombine.low %v3267_v38, %v3268_v46  ;;  %5848 = vmatpush3.bf16.msra.mxu1 %v5970_v4 }
 0x22d   : > { %v3921_v37 = vsel %vm7550_vm12, %v3627_v19, 0.0  ;;  %vm7601_vm12 = vmand %vm3139_vm11, %vm3149_vm13  ;;  %5849 = vmatprep.subr.bf16.mxu1 %v5971_v45  ;;  %v3275_v30 = vmax.f32 %v2842_v25, 0.0  ;;  %v2850_v33 = vcombine.high %v2842_v25, %v2842_v25 }
 0x22e   : > { %v7574_v3 = vpack.c.bf16 %v3921_v37, %v3920_v23  ;;  %4380 = vrot.lane.b32.xlu1 %v7567_v0, %s6109_s9  ;;  %v3636_v1 = vcombine.low %v3269_v7, %v3270_v10  ;;  %v3643_v49 = vrot.slane %v3635_v8, %v7306_v22  ;;  %v4099_v48 = vshll.u32 %v7567_v0, 16  ;;  %vm3180_vm1 = vmand %vm7601_vm12, %vm3165_vm0 }
 0x22f   : > { %v3675_v53 = vrot.slane %v3275_v30, %v7306_v22  ;;  %vm3215_vm15 = vmand %vm7601_vm12, %vm3200_vm14  ;;  %v3276_v57 = vmax.f32 %v2850_v33, 0.0 }
 0x230   : > { %4378 = vrot.lane.b32.xlu0 %v7574_v3, %s6109_s9  ;;  %v4036_v12 = vrot.slane %v7574_v3, 7  ;;  %v4092_v24 = vshrl.u32 %v7574_v3, 16  ;;  %v3650_v44 = vrot.slane %v3636_v1, %v7306_v22  ;;  %v4095_v40 = vshll.u32 %v7574_v3, 16  ;;  %5850 = vmatpush3.bf16.msra.mxu1 %v5971_v45  ;;  %v7682_v1 = vpop.permute.xlu1 %4188 }
 0x231   : > { %v3925_v19 = vsel %vm3215_vm15, %v3675_v53, 0.0 }
 0x232   : > { %4222 = vrot.lane.b32.xlu1 %v4035_v17, %s6104_s4  ;;  %v3271_v17 = vmax.f32 %v2825_v26, 0.0  ;;  %v4094_v16 = vrot.slane %v4092_v24, 7  ;;  %v3651_v60 = vcombine.low %v3643_v49, %v3650_v44  ;;  %v7648_v61 = vpack.c.bf16 %v3925_v19, %v3925_v19 }
 0x233   : > { %v2849_v26 = vrot.slane %v2835_v43, %v7306_v22 }
 0x234   : > { %4251 = vrot.lane.b32.xlu0 %v4086_v47, %s6101_s27  ;;  %v3652_v59 = vcombine.low %v3271_v17, %v3272_v54  ;;  %v4101_v42 = vsel %vm4057_vm10, %v4094_v16, %v4099_v48  ;;  %v4097_v6 = vor.u32 %v4095_v40, %v4094_v16  ;;  %v3923_v11 = vsel %vm3180_vm1, %v3651_v60, 0.0 }
 0x235   : > { %v4110_v23 = vshll.u32 %v7648_v61, 16  ;;  %v2851_v15 = vcombine.high %v2849_v26, %v2849_v26  ;;  %v3277_v46 = vmax.f32 %v2849_v26, 0.0 }
 0x236   : > { %4316 = vrot.lane.b32.xlu1 %v4036_v12, %s6105_s5  ;;  %v3660_v20 = vrot.slane %v3652_v59, %v7306_v22 }
 0x237   : > { %v3278_v7 = vmax.f32 %v2851_v15, 0.0  ;;  %v3676_v8 = vcombine.low %v3276_v57, %v3277_v46 }
 0x238   : > { %4341 = vrot.lane.b32.xlu0 %v4086_v47, %s6106_s6  ;;  %v3668_v14 = vcombine.low %v3660_v20, %v3667_v36 }
 0x239   : > { %v3684_v62 = vrot.slane %v3676_v8, %v7306_v22 }
 0x23a   : > { %4047 = vrot.lane.b32.xlu1 %v4036_v12, %s6103_s29  ;;  %v3924_v34 = vsel %vm7601_vm12, %v3668_v14, 0.0 }
 0x23b   : > { %v7622_v27 = vpack.c.bf16 %v3924_v34, %v3923_v11 }
 0x23c   : > { %4154 = vrot.lane.b32.xlu0 %v4086_v47, %s6102_s28 }
 0x23d   : > { %v4103_v2 = vshrl.u32 %v7622_v27, 16  ;;  %v4106_v41 = vshll.u32 %v7622_v27, 16  ;;  %v4037_v21 = vrot.slane %v7622_v27, 7 }
 0x23e   : > { %4253 = vrot.lane.b32.xlu1 %v4090_v51, %s6101_s27 }
 0x23f   : > { %v4105_v29 = vrot.slane %v4103_v2, 7 }
 0x240   : > { %4347 = vrot.lane.b32.xlu0 %v4101_v42, %s6106_s6 }
 0x241   : > { %v7642_v39 = vor.u32 %v4106_v41, %v4105_v29  ;;  %v7659_v37 = vsel %vm4057_vm10, %v4105_v29, %v4110_v23 }
 0x242   : > { %4343 = vrot.lane.b32.xlu1 %v4090_v51, %s6106_s6 }
 0x244   : > { %4158 = vrot.lane.b32.xlu0 %v4097_v6, %s6102_s28 }
 0x246   : > { %4156 = vrot.lane.b32.xlu1 %v4090_v51, %s6102_s28 }
 0x248   : > { %4198 = vrot.lane.b32.xlu0 %v7574_v3, %s6099_s21 }
 0x24a   : > { %4160 = vrot.lane.b32.xlu1 %v4101_v42, %s6102_s28 }
 0x24c   : > { %4224 = vrot.lane.b32.xlu0 %v4036_v12, %s6104_s4 }
 0x24e   : > { %4345 = vrot.lane.b32.xlu1 %v4097_v6, %s6106_s6 }
 0x250   : > { %4255 = vrot.lane.b32.xlu0 %v4097_v6, %s6101_s27 }
 0x252   : > { %4200 = vrot.lane.b32.xlu1 %v7567_v0, %s6099_s21 }
 0x254   : > { %4259 = vrot.lane.b32.xlu0 %v7642_v39, %s6101_s27 }
 0x256   : > { %4226 = vrot.lane.b32.xlu1 %v4037_v21, %s6104_s4 }
 0x258   : > { %4288 = vrot.lane.b32.xlu0 %v7574_v3, %s6100_s24 }
 0x25a   : > { %4257 = vrot.lane.b32.xlu1 %v4101_v42, %s6101_s27 }
 0x25c   : > { %4292 = vrot.lane.b32.xlu0 %v7622_v27, %s6100_s24 }
 0x25e   : > { %4261 = vrot.lane.b32.xlu1 %v7659_v37, %s6101_s27  ;;  %v7664_v18 = vpop.f32.mrf.mxu0 }
 0x25f   : > { %v2886_v53 = vcombine.high %v7664_v18, %v7664_v18  ;;  %v2893_v26 = vrot.slane %v7664_v18, %v7306_v22 }
 0x260   : > { %4318 = vrot.lane.b32.xlu0 %v4037_v21, %s6105_s5  ;;  %v2579_v58 = vpop.f32.mrf.mxu0  ;;  %v7673_v47 = vpop.permute.xlu0 %4376 }
 0x261   : > { %v2852_v3 = vcombine.high %v2579_v58, %v2579_v58  ;;  %v2859_v35 = vrot.slane %v2579_v58, %v7306_v22  ;;  %v7688_v51 = vpop.permute.xlu1 %4286  ;;  %v2900_v15 = vrot.slane %v2886_v53, %v7306_v22  ;;  %v2901_v18 = vcombine.high %v2893_v26, %v2893_v26 }
 0x262   : > { %4290 = vrot.lane.b32.xlu1 %v7567_v0, %s6100_s24  ;;  %v7670_v52 = vpop.f32.mrf.mxu0  ;;  %v3126_v0 = vadd.s32 5, %v7314_v9  ;;  %v3287_v8 = vmax.f32 %v2893_v26, 0.0 }
 0x263   : > { %v2866_v63 = vrot.slane %v2852_v3, %v7306_v22  ;;  %v2867_v10 = vcombine.high %v2859_v35, %v2859_v35  ;;  %v3279_v12 = vmax.f32 %v2859_v35, 0.0  ;;  %v2910_v58 = vrot.slane %v7670_v52, %v7306_v22 }
 0x264   : > { %4349 = vrot.lane.b32.xlu0 %v7642_v39, %s6106_s6  ;;  %v2582_v32 = vpop.f32.mrf.mxu0  ;;  %v7680_v38 = vpop.permute.xlu0 %4186  ;;  %vm3140_vm11 = vcmp.ge.s32.totalorder %v3126_v0, 1  ;;  %vm3150_vm13 = vcmp.le.s32.totalorder %v3126_v0, 16 }
 0x265   : > { %v2868_v54 = vcombine.high %v2866_v63, %v2866_v63  ;;  %v3280_v24 = vmax.f32 %v2867_v10, 0.0  ;;  %v3281_v5 = vmax.f32 %v2866_v63, 0.0  ;;  %v3677_v17 = vcombine.low %v3278_v7, %v3279_v12  ;;  %vm7692_vm2 = vmand %vm3140_vm11, %vm3150_vm13  ;;  %v7709_v4 = vpop.permute.xlu1 %4196 }
 0x266   : > { %4294 = vrot.lane.b32.xlu1 %v7648_v61, %s6100_s24  ;;  %v2876_v31 = vrot.slane %v2582_v32, %v7306_v22  ;;  %vm3218_vm12 = vmand %vm7692_vm2, %vm3200_vm14  ;;  %v2869_v34 = vcombine.high %v2582_v32, %v2582_v32  ;;  %v2918_v12 = vcombine.high %v2910_v58, %v2910_v58  ;;  %v2902_v7 = vcombine.high %v2900_v15, %v2900_v15 }
 0x267   : > { %v3282_v13 = vmax.f32 %v2868_v54, 0.0  ;;  %v3691_v36 = vrot.slane %v3677_v17, %v7306_v22  ;;  %v3693_v49 = vcombine.low %v3280_v24, %v3281_v5  ;;  %vm3183_vm1 = vmand %vm7692_vm2, %vm3165_vm0  ;;  %v3288_v5 = vmax.f32 %v2901_v18, 0.0 }
 0x268   : > { %4049 = vrot.lane.b32.xlu0 %v4037_v21, %s6103_s29  ;;  %v2884_v59 = vcombine.high %v2876_v31, %v2876_v31  ;;  %v3283_v44 = vmax.f32 %v2876_v31, 0.0  ;;  %v7686_v16 = vpop.permute.xlu0 %4190  ;;  %v2883_v41 = vrot.slane %v2869_v34, %v7306_v22  ;;  %v3292_v17 = vmax.f32 %v2918_v12, 0.0 }
 0x269   : > { %v3692_v50 = vcombine.low %v3684_v62, %v3691_v36  ;;  %v3701_v40 = vrot.slane %v3693_v49, %v7306_v22  ;;  %v7728_v23 = vpop.permute.xlu1 %4192  ;;  %v3127_v36 = vadd.s32 6, %v7314_v9  ;;  %v3289_v62 = vmax.f32 %v2900_v15, 0.0 }
 0x26a   : > { %v3284_v48 = vmax.f32 %v2884_v59, 0.0  ;;  %v3694_v56 = vcombine.low %v3282_v13, %v3283_v44  ;;  %v2885_v35 = vcombine.high %v2883_v41, %v2883_v41  ;;  %v3285_v31 = vmax.f32 %v2883_v41, 0.0 }
 0x26b   : > { %v3926_v25 = vsel %vm3183_vm1, %v3692_v50, 0.0  ;;  %v3290_v13 = vmax.f32 %v2902_v7, 0.0  ;;  %v3291_v59 = vmax.f32 %v2910_v58, 0.0  ;;  %v3718_v20 = vcombine.low %v3287_v8, %v3288_v5 }
 0x26c   : > { %v3716_v60 = vrot.slane %v3284_v48, %v7306_v22  ;;  %v7701_v42 = vpop.permute.xlu0 %4280  ;;  %v3708_v14 = vrot.slane %v3694_v56, %v7306_v22  ;;  %v3286_v54 = vmax.f32 %v2885_v35, 0.0  ;;  %vm3141_vm15 = vcmp.ge.s32.totalorder %v3127_v36, 1 }
 0x26d   : > { %v7748_v46 = vpop.permute.xlu1 %4282  ;;  %v3735_v56 = vcombine.low %v3291_v59, %v3292_v17  ;;  %v3734_v50 = vcombine.low %v3289_v62, %v3290_v13  ;;  %vm3151_vm11 = vcmp.le.s32.totalorder %v3127_v36, 16 }
 0x26e   : > { %v3709_v6 = vcombine.low %v3701_v40, %v3708_v14  ;;  %v3928_v11 = vsel %vm3218_vm12, %v3716_v60, 0.0  ;;  %v3717_v44 = vcombine.low %v3285_v31, %v3286_v54  ;;  %vm7781_vm13 = vmand %vm3141_vm15, %vm3151_vm11 }
 0x26f   : > { %v7717_v29 = vpack.c.bf16 %v3928_v11, %v3928_v11  ;;  %v3742_v34 = vrot.slane %v3734_v50, %v7306_v22  ;;  %vm3221_vm12 = vmand %vm7781_vm13, %vm3200_vm14 }
 0x270   : > { %v7711_v45 = vpop.permute.xlu0 %4041  ;;  %v3927_v2 = vsel %vm7692_vm2, %v3709_v6, 0.0  ;;  %v3725_v40 = vrot.slane %v3717_v44, %v7306_v22  ;;  %v3749_v6 = vrot.slane %v3735_v56, %v7306_v22  ;;  %vm7789_vm2 = vmand %vm7781_vm13, %vm3165_vm0 }
 0x271   : > { %v7715_v30 = vpack.c.bf16 %v3927_v2, %v3926_v25  ;;  %v4121_v33 = vshll.u32 %v7717_v29, 16  ;;  %v7761_v49 = vpop.permute.xlu1 %4043 }
 0x272   : > { %v3750_v26 = vcombine.low %v3742_v34, %v3749_v6 }
 0x273   : > { %v7723_v19 = vrot.slane %v7715_v30, 7  ;;  %v4114_v43 = vshrl.u32 %v7715_v30, 16  ;;  %v4117_v57 = vshll.u32 %v7715_v30, 16 }
 0x274   : > { %v7725_v21 = vpop.permute.xlu0 %4220  ;;  %v3930_v12 = vsel %vm7781_vm13, %v3750_v26, 0.0 }
 0x275   : > { %4320 = vrot.lane.b32.xlu1 %v7723_v19, %s6105_s5  ;;  %v4116_v3 = vrot.slane %v4114_v43, 7  ;;  %v7778_v11 = vpop.permute.xlu1 %4148 }
 0x277   : > { %v7739_v63 = vsel %vm4057_vm10, %v4116_v3, %v4121_v33  ;;  %v7750_v32 = vor.u32 %v4117_v57, %v4116_v3  ;;  %v2903_v3 = vcombine.high %v7670_v52, %v7670_v52 }
 0x278   : > { %v7741_v10 = vpop.permute.xlu0 %4146  ;;  %4355 = vrot.lane.b32.xlu0 %v7739_v63, %s6106_s6 }
 0x279   : > { %4351 = vrot.lane.b32.xlu1 %v7659_v37, %s6106_s6  ;;  %v7804_v18 = vpop.permute.xlu1 %4152  ;;  %v2917_v54 = vrot.slane %v2903_v3, %v7306_v22 }
 0x27a   : > { %v7754_v0 = vpop.f32.mrf.mxu0 }
 0x27b   : > { %v3293_v59 = vmax.f32 %v2917_v54, 0.0 }
 0x27c   : > { %4384 = vrot.lane.b32.xlu0 %v7648_v61, %s6109_s9  ;;  %v7756_v24 = vpop.permute.xlu0 %4150  ;;  %v2595_v48 = vpop.f32.mrf.mxu0 }
 0x27d   : > { %4353 = vrot.lane.b32.xlu1 %v7750_v32, %s6106_s6  ;;  %v2920_v58 = vcombine.high %v2595_v48, %v2595_v48  ;;  %v2927_v57 = vrot.slane %v2595_v48, %v7306_v22  ;;  %v7826_v8 = vpop.permute.xlu1 %4249  ;;  %v2919_v48 = vcombine.high %v2917_v54, %v2917_v54  ;;  %v3757_v6 = vrot.slane %v3293_v59, %v7306_v22 }
 0x27e   : > { %v7770_v14 = vpop.f32.mrf.mxu0 }
 0x27f   : > { %v2935_v17 = vcombine.high %v2927_v57, %v2927_v57  ;;  %v3295_v34 = vmax.f32 %v2927_v57, 0.0  ;;  %v5980_v57 = vld [vmem:[%s6213_s20 + $0x18] sm:$0xf] }
 0x280   : > { %4162 = vrot.lane.b32.xlu0 %v7642_v39, %s6102_s28  ;;  %v7767_v60 = vpop.permute.xlu0 %4247  ;;  %v3732_v39 = vrot.slane %v3718_v20, %v7306_v22  ;;  %v2598_v41 = vpop.f32.mrf.mxu0 }
 0x281   : > { %4382 = vrot.lane.b32.xlu1 %v7622_v27, %s6109_s9  ;;  %v2937_v15 = vcombine.high %v2598_v41, %v2598_v41  ;;  %v2944_v35 = vrot.slane %v2598_v41, %v7306_v22  ;;  %v3296_v20 = vmax.f32 %v2935_v17, 0.0  ;;  %v7842_v53 = vpop.permute.xlu1 %4374  ;;  %v3294_v41 = vmax.f32 %v2919_v48, 0.0 }
 0x282   : > { %v3733_v2 = vcombine.low %v3725_v40, %v3732_v39 }
 0x283   : > { %v7820_v5 = vrot.slane %v2937_v15, %v7306_v22  ;;  %v3299_v40 = vmax.f32 %v2944_v35, 0.0  ;;  %v3931_v15 = vsel %vm3221_vm12, %v3757_v6, 0.0  ;;  %vm8654_vm12 = vcmask 261120  }
 0x284   : > { %4386 = vrot.lane.b32.xlu0 %v7715_v30, %s6109_s9  ;;  %v7793_v43 = vpop.permute.xlu0 %4284  ;;  %v3929_v33 = vsel %vm7789_vm2, %v3733_v2, 0.0 }
 0x285   : > { %4051 = vrot.lane.b32.xlu1 %v7723_v19, %s6103_s29  ;;  %v7814_v52 = vpack.c.bf16 %v3930_v12, %v3929_v33  ;;  %v3301_v36 = vmax.f32 %v7820_v5, 0.0 }
 0x287   : > { %v4125_v13 = vshrl.u32 %v7814_v52, 16 }
 0x288   : > { %4166 = vrot.lane.b32.xlu0 %v7750_v32, %s6102_s28  ;;  %v7816_v7 = vpop.permute.xlu0 %4194 }
 0x289   : > { %4164 = vrot.lane.b32.xlu1 %v7659_v37, %s6102_s28  ;;  %v2934_v37 = vrot.slane %v2920_v58, %v7306_v22  ;;  %v4127_v39 = vrot.slane %v4125_v13, 7  ;;  %v2953_v13 = vcombine.high %v7820_v5, %v7820_v5 }
 0x28b   : > { %v2936_v31 = vcombine.high %v2934_v37, %v2934_v37  ;;  %v3297_v56 = vmax.f32 %v2934_v37, 0.0  ;;  %v5981_v37 = vld [vmem:[%s6213_s20 + $0x1c] sm:$0xf] }
 0x28c   : > { %4202 = vrot.lane.b32.xlu0 %v7622_v27, %s6099_s21  ;;  %v2952_v27 = vcombine.high %v2944_v35, %v2944_v35  ;;  %v7830_v62 = vpop.permute.xlu0 %4314  ;;  %v3758_v35 = vcombine.low %v3294_v41, %v3295_v34  ;;  %v5721_v54 = vcombine.low %v5980_v57, %v5981_v37 }
 0x28d   : > { %4388 = vrot.lane.b32.xlu1 %v7717_v29, %s6109_s9  ;;  %v3298_v50 = vmax.f32 %v2936_v31, 0.0  ;;  %v3759_v26 = vcombine.low %v3296_v20, %v3297_v56  ;;  %v5982_v20 = vld [vmem:[%s6213_s20 + $0x20] sm:$0x3] }
 0x28e   : > { %v3300_v44 = vmax.f32 %v2952_v27, 0.0  ;;  %v5722_v56 = vcombine.low %v5982_v20, %v5982_v20  ;;  %v4408_v5 = vsel %vm904_vm3, %v5721_v54, %v7711_v45  ;;  %v5985_v20 = vld [vmem:[%s6213_s20 + $0x28] sm:$0xf] }
 0x28f   : > { %v3775_v58 = vcombine.low %v3298_v50, %v3299_v40  ;;  %v3773_v31 = vrot.slane %v3759_v26, %v7306_v22  ;;  %v3766_v40 = vrot.slane %v3758_v35, %v7306_v22 }
 0x290   : > { %4206 = vrot.lane.b32.xlu0 %v7715_v30, %s6099_s21  ;;  %v3776_v2 = vcombine.low %v3300_v44, %v3301_v36  ;;  %v7849_v3 = vpop.permute.xlu0 %4045  ;;  %v7873_v44 = vpack.c.bf16 %v3931_v15, %v3931_v15 }
 0x291   : > { %4168 = vrot.lane.b32.xlu1 %v7739_v63, %s6102_s28  ;;  %v3783_v59 = vrot.slane %v3775_v58, %v7306_v22 }
 0x292   : > { %v3790_v12 = vrot.slane %v3776_v2, %v7306_v22  ;;  %v4447_v2 = vsel %vm945_vm4, %v4408_v5, %v7741_v10  ;;  %v4410_v10 = vsel %vm904_vm3, %v5722_v56, %v7711_v45 }
 0x293   : > { %v4479_v15 = vsel %vm986_vm5, %v4447_v2, %v7680_v38 }
 0x294   : > { %4228 = vrot.lane.b32.xlu0 %v7723_v19, %s6104_s4  ;;  %v3128_v19 = vadd.s32 7, %v7314_v9  ;;  %v3791_v6 = vcombine.low %v3783_v59, %v3790_v12 }
 0x295   : > { %4204 = vrot.lane.b32.xlu1 %v7648_v61, %s6099_s21  ;;  %v4128_v61 = vshll.u32 %v7814_v52, 16 }
 0x296   : > { %vm3142_vm1 = vcmp.ge.s32.totalorder %v3128_v19, 1  ;;  %vm3152_vm15 = vcmp.le.s32.totalorder %v3128_v19, 16  ;;  %v3774_v19 = vcombine.low %v3766_v40, %v3773_v31  ;;  %v4511_v31 = vsel %vm1027_vm6, %v4479_v15, %v7725_v21 }
 0x297   : > { %v7851_v25 = vor.u32 %v4128_v61, %v4127_v39  ;;  %vm7878_vm11 = vmand %vm3142_vm1, %vm3152_vm15  ;;  %v3302_v61 = vmax.f32 %v2953_v13, 0.0  ;;  %v4535_v13 = vsel %vm1068_vm7, %v4511_v31, %v7767_v60  ;;  %v2971_v60 = vcombine.high %v7770_v14, %v7770_v14 }
 0x298   : > { %4263 = vrot.lane.b32.xlu0 %v7750_v32, %s6101_s27  ;;  %v7857_v32 = vrot.slane %v7814_v52, 7  ;;  %vm7897_vm13 = vmand %vm7878_vm11, %vm3165_vm0  ;;  %v3933_v58 = vsel %vm7878_vm11, %v3791_v6, 0.0  ;;  %vm8655_vm1 = vcmask 293888   ;;  %v2978_v31 = vrot.slane %v7770_v14, %v7306_v22 }
 0x299   : > { %4208 = vrot.lane.b32.xlu1 %v7717_v29, %s6099_s21  ;;  %v3932_v45 = vsel %vm7897_vm13, %v3774_v19, 0.0  ;;  %v3798_v57 = vrot.slane %v3302_v61, %v7306_v22  ;;  %vm3224_vm2 = vmand %vm7878_vm11, %vm3200_vm14  ;;  %v2954_v19 = vcombine.high %v7754_v0, %v7754_v0  ;;  %v4567_v61 = vsel %vm1109_vm8, %v4535_v13, %v7701_v42 }
 0x29a   : > { %v4599_v41 = vsel %vm1150_vm9, %v4567_v61, %v7830_v62  ;;  %vm8656_vm15 = vmmov %vm8654_vm12  ;;  %vm4746_vm11 = vcmask 326656  }
 0x29b   : > { %v3934_v50 = vsel %vm3224_vm2, %v3798_v57, 0.0  ;;  %vm8657_vm13 = vmmov %vm8655_vm1  ;;  %vm8658_vm2 = vcmask 1046528  }
 0x29c   : > { %4267 = vrot.lane.b32.xlu0 %v7851_v25, %s6101_s27 }
 0x29d   : > { %4230 = vrot.lane.b32.xlu1 %v7857_v32, %s6104_s4 }
 0x29f   : > { %v7853_v33 = vpop.f32.mrf.mxu0 }
 0x2a0   : > { %v7863_v27 = vpop.permute.xlu1 %4380  ;;  %4296 = vrot.lane.b32.xlu0 %v7715_v30, %s6100_s24  ;;  %v4132_v30 = vshll.u32 %v7873_v44, 16 }
 0x2a1   : > { %v7865_v17 = vpop.f32.mrf.mxu0  ;;  %4265 = vrot.lane.b32.xlu1 %v7739_v63, %s6101_s27  ;;  %v4449_v63 = vsel %vm945_vm4, %v4410_v10, %v7778_v11  ;;  %v5983_v11 = vld [vmem:[%s6213_s20 + $0x2c] sm:$0x3] }
 0x2a2   : > { %v7875_v36 = vpop.permute.xlu0 %4378  ;;  %v7915_v35 = vsel %vm4057_vm10, %v4127_v39, %v4132_v30  ;;  %v5724_v38 = vcombine.low %v5983_v11, %v5983_v11  ;;  %v7929_v39 = vpack.c.bf16 %v3933_v58, %v3932_v45  ;;  %v4481_v54 = vsel %vm986_vm5, %v4449_v63, %v7682_v1 }
 0x2a3   : > { %v5844_v48 = vpop.f32.mrf.mxu0  ;;  %v4512_v40 = vsel %vm1027_vm6, %v4481_v54, %v7725_v21  ;;  %v7962_v21 = vpack.c.bf16 %v3934_v50, %v3934_v50  ;;  %v2985_v58 = vrot.slane %v2971_v60, %v7306_v22  ;;  %v2968_v45 = vrot.slane %v2954_v19, %v7306_v22 }
 0x2a4   : > { %v7887_v34 = vpop.permute.xlu1 %4222  ;;  %4300 = vrot.lane.b32.xlu0 %v7814_v52, %s6100_s24  ;;  %v5984_v48 = vld [vmem:[%s6213_s20 + $0x24] sm:$0xf]  ;;  %v4415_v1 = vsel %vm904_vm3, %v5724_v38, %v7761_v49  ;;  %v4136_v5 = vshrl.u32 %v7929_v39, 16  ;;  %v7984_v11 = vrot.slane %v7929_v39, 7  ;;  %v2961_v54 = vrot.slane %v7754_v0, %v7306_v22 }
 0x2a5   : > { %4269 = vrot.lane.b32.xlu1 %v7915_v35, %s6101_s27  ;;  %v5723_v56 = vcombine.low %v5984_v48, %v5985_v20  ;;  %v4453_v2 = vsel %vm945_vm4, %v4415_v1, %v7804_v18  ;;  %v2970_v1 = vcombine.high %v2968_v45, %v2968_v45 }
 0x2a6   : > { %v7902_v26 = vpop.permute.xlu0 %4251  ;;  %v4485_v42 = vsel %vm986_vm5, %v4453_v2, %v7728_v23  ;;  %v4138_v15 = vrot.slane %v4136_v5, 7 }
 0x2a7   : > { %v4413_v18 = vsel %vm904_vm3, %v5723_v56, %v7761_v49  ;;  %v4515_v57 = vsel %vm1027_vm6, %v4485_v42, %v7887_v34  ;;  %v3306_v61 = vmax.f32 %v2970_v1, 0.0 }
 0x2a8   : > { %v7917_v12 = vpop.permute.xlu1 %4316  ;;  %4322 = vrot.lane.b32.xlu0 %v7857_v32, %s6105_s5  ;;  %v4451_v49 = vsel %vm945_vm4, %v4413_v18, %v7756_v24  ;;  %v3309_v18 = vmax.f32 %v2985_v58, 0.0 }
 0x2a9   : > { %4298 = vrot.lane.b32.xlu1 %v7717_v29, %s6100_s24  ;;  %v4537_v29 = vsel %vm1068_vm7, %v4512_v40, %v7826_v8  ;;  %v2986_v40 = vcombine.high %v2978_v31, %v2978_v31 }
 0x2aa   : > { %v4342_v37 = vpop.permute.xlu0 %4341  ;;  %v4569_v8 = vsel %vm1109_vm8, %v4537_v29, %v7748_v46 }
 0x2ab   : > { %v4623_v10 = vsel %vm8654_vm12, %v4599_v41, %v4342_v37  ;;  %v4600_v23 = vsel %vm1150_vm9, %v4569_v8, %v7830_v62  ;;  %v4143_v37 = vshll.u32 %v7962_v21, 16  ;;  %v3305_v8 = vmax.f32 %v2968_v45, 0.0 }
 0x2ac   : > { %v7939_v59 = vpop.permute.xlu1 %4047  ;;  %4357 = vrot.lane.b32.xlu0 %v7851_v25, %s6106_s6  ;;  %v4655_v46 = vsel %vm8655_vm1, %v4623_v10, %v7842_v53  ;;  %v4483_v53 = vsel %vm986_vm5, %v4451_v49, %v7686_v16 }
 0x2ad   : > { %4302 = vrot.lane.b32.xlu1 %v7873_v44, %s6100_s24  ;;  %v8004_v13 = vsel %vm4057_vm10, %v4138_v15, %v4143_v37  ;;  %v4514_v14 = vsel %vm1027_vm6, %v4483_v53, %v7887_v34  ;;  %v4702_v20 = vrot.slane %v4655_v46, 1  ;;  %v2969_v34 = vcombine.high %v2961_v54, %v2961_v54 }
 0x2ae   : > { %v7951_v6 = vpop.permute.xlu0 %4154  ;;  %v4539_v5 = vsel %vm1068_vm7, %v4514_v14, %v7902_v26  ;;  %v3129_v46 = vadd.s32 8, %v7314_v9  ;;  %v3800_v37 = vcombine.low %v3305_v8, %v3306_v61  ;;  %v8091_v61 = vrot.slane %v7853_v33, %v7306_v22 }
 0x2af   : > { %v4571_v26 = vsel %vm1109_vm8, %v4539_v5, %v7793_v43  ;;  %v3304_v42 = vmax.f32 %v2969_v34, 0.0  ;;  %v2995_v5 = vrot.slane %v7865_v17, %v7306_v22 }
 0x2b0   : > { %v4254_v30 = vpop.permute.xlu1 %4253  ;;  %4053 = vrot.lane.b32.xlu0 %v7857_v32, %s6103_s29  ;;  %v2987_v32 = vcombine.high %v2985_v58, %v2985_v58  ;;  %v3319_v33 = vmax.f32 %v8091_v61, 0.0 }
 0x2b1   : > { %v4541_v38 = vsel %vm1068_vm7, %v4515_v57, %v4254_v30  ;;  %4324 = vrot.lane.b32.xlu1 %v7984_v11, %s6105_s5  ;;  %v3308_v30 = vmax.f32 %v2986_v40, 0.0  ;;  %v2614_v57 = vpop.f32.mrf.mxu0 }
 0x2b2   : > { %v4348_v63 = vpop.permute.xlu0 %4347  ;;  %v4573_v56 = vsel %vm1109_vm8, %v4541_v38, %v7688_v51  ;;  %v3310_v19 = vmax.f32 %v2987_v32, 0.0  ;;  %v4602_v38 = vsel %vm1150_vm9, %v4571_v26, %v7917_v12 }
 0x2b3   : > { %v4603_v51 = vsel %vm1150_vm9, %v4573_v56, %v7917_v12 }
 0x2b4   : > { %v4344_v24 = vpop.permute.xlu1 %4343  ;;  %4363 = vrot.lane.b32.xlu0 %v8004_v13, %s6106_s6  ;;  %v4629_v10 = vsel %vm8654_vm12, %v4603_v51, %v4348_v63  ;;  %v3817_v49 = vcombine.low %v3309_v18, %v3310_v19 }
 0x2b5   : > { %v4625_v62 = vsel %vm8656_vm15, %v4600_v23, %v4344_v24  ;;  %4359 = vrot.lane.b32.xlu1 %v7915_v35, %s6106_s6  ;;  %v3303_v23 = vmax.f32 %v2961_v54, 0.0  ;;  %v4661_v58 = vsel %vm8655_vm1, %v4629_v10, %v7863_v27  ;;  %vm8659_vm15 = vmmov %vm8654_vm12  ;;  %v3005_v27 = vcombine.high %v2614_v57, %v2614_v57 }
 0x2b6   : > { %v4657_v48 = vsel %vm8657_vm13, %v4625_v62, %v7673_v47  ;;  %v8008_v0 = vpop.permute.xlu0 %4158  ;;  %v4139_v47 = vshll.u32 %v7929_v39, 16  ;;  %vm8660_vm13 = vmmov %vm8655_vm1  ;;  %v4706_v62 = vrot.slane %v4661_v58, 1  ;;  %vm3153_vm12 = vcmp.le.s32.totalorder %v3129_v46, 16 }
 0x2b7   : > { %v4703_v50 = vrot.slane %v4657_v48, 1  ;;  %v3799_v54 = vcombine.low %v3303_v23, %v3304_v42  ;;  %v2988_v48 = vcombine.high %v7865_v17, %v7865_v17  ;;  %vm8661_vm1 = vcmask 1046528  }
 0x2b8   : > { %v8016_v16 = vpop.permute.xlu1 %4156  ;;  %v8029_v29 = vor.u32 %v4139_v47, %v4138_v15  ;;  %4392 = vrot.lane.b32.xlu0 %v7873_v44, %s6109_s9  ;;  %v3307_v15 = vmax.f32 %v2978_v31, 0.0  ;;  %v3831_v31 = vrot.slane %v3817_v49, %v7306_v22  ;;  %v3019_v1 = vrot.slane %v3005_v27, %v7306_v22 }
 0x2b9   : > { %v4704_v60 = vsel %vm8658_vm2, %v4702_v20, %v4703_v50  ;;  %vm3143_vm2 = vcmp.ge.s32.totalorder %v3129_v46, 1  ;;  %v3807_v20 = vrot.slane %v3799_v54, %v7306_v22  ;;  %v3002_v47 = vrot.slane %v2988_v48, %v7306_v22 }
 0x2ba   : > { %5851 = vmatprep.mubr.msk.bf16.mxu1 %vm4746_vm11, %v4704_v60  ;;  %v8027_v2 = vpop.permute.xlu0 %4198  ;;  %4361 = vrot.lane.b32.xlu1 %v8029_v29, %s6106_s6  ;;  %v3816_v45 = vcombine.low %v3307_v15, %v3308_v30  ;;  %v3012_v60 = vrot.slane %v2614_v57, %v7306_v22  ;;  %v3021_v19 = vcombine.high %v3019_v1, %v3019_v1  ;;  %v3311_v15 = vmax.f32 %v2995_v5, 0.0 }
 0x2bb   : > { %v3003_v10 = vcombine.high %v2995_v5, %v2995_v5  ;;  %v3317_v23 = vmax.f32 %v3019_v1, 0.0 }
 0x2bc   : > { %v8033_v41 = vpop.permute.xlu1 %4160  ;;  %4170 = vrot.lane.b32.xlu0 %v7851_v25, %s6102_s28  ;;  %v3814_v25 = vrot.slane %v3800_v37, %v7306_v22  ;;  %v3824_v32 = vrot.slane %v3816_v45, %v7306_v22  ;;  %v3020_v26 = vcombine.high %v3012_v60, %v3012_v60  ;;  %v3318_v42 = vmax.f32 %v3021_v19, 0.0 }
 0x2bd   : > { %v3312_v58 = vmax.f32 %v3003_v10, 0.0  ;;  %v3839_v45 = vrot.slane %v3311_v15, %v7306_v22  ;;  %v5986_v10 = vld [vmem:[%s6213_s20 + $0x38] sm:$0x3] }
 0x2be   : > { %v8047_v43 = vpop.permute.xlu0 %4224  ;;  %4390 = vrot.lane.b32.xlu1 %v7814_v52, %s6109_s9  ;;  %v3832_v56 = vcombine.low %v3824_v32, %v3831_v31  ;;  %v3815_v40 = vcombine.low %v3807_v20, %v3814_v25  ;;  %v3316_v57 = vmax.f32 %v3020_v26, 0.0  ;;  %v3858_v37 = vcombine.low %v3318_v42, %v3319_v33 }
 0x2bf   : > { %v3130_v31 = vadd.s32 9, %v7314_v9  ;;  %v5726_v42 = vcombine.low %v5986_v10, %v5986_v10 }
 0x2c0   : > { %v4346_v63 = vpop.permute.xlu1 %4345  ;;  %4394 = vrot.lane.b32.xlu0 %v7929_v39, %s6109_s9  ;;  %v3857_v54 = vcombine.low %v3316_v57, %v3317_v23 }
 0x2c1   : > { %v4627_v24 = vsel %vm8659_vm15, %v4602_v38, %v4346_v63  ;;  %vm8068_vm15 = vmand %vm3143_vm2, %vm3153_vm12  ;;  %v3313_v63 = vmax.f32 %v3002_v47, 0.0  ;;  %vm3144_vm12 = vcmp.ge.s32.totalorder %v3130_v31, 1  ;;  %v4420_v57 = vsel %vm904_vm3, %v5726_v42, %v7849_v3 }
 0x2c2   : > { %v4659_v12 = vsel %vm8660_vm13, %v4627_v24, %v7875_v36  ;;  %4055 = vrot.lane.b32.xlu1 %v7984_v11, %s6103_s29  ;;  %v8064_v14 = vpop.permute.xlu0 %4255  ;;  %vm3192_vm13 = vmand %vm8068_vm15, %vm3165_vm0  ;;  %v3936_v51 = vsel %vm8068_vm15, %v3832_v56, 0.0  ;;  %v3865_v9 = vrot.slane %v3857_v54, %v7306_v22  ;;  %s5785_s29 = sshll.u32 %s6084_s16, 1 }
 0x2c3   : > { %v4705_v53 = vrot.slane %v4659_v12, 1  ;;  %v3935_v18 = vsel %vm3192_vm13, %v3815_v40, 0.0  ;;  %vm3227_vm2 = vmand %vm8068_vm15, %vm3200_vm14 }
 0x2c4   : > { %4174 = vrot.lane.b32.xlu0 %v8029_v29, %s6102_s28  ;;  %v8077_v34 = vpop.permute.xlu1 %4200  ;;  %v8099_v17 = vpack.c.bf16 %v3936_v51, %v3935_v18  ;;  %v3937_v32 = vsel %vm3227_vm2, %v3839_v45, 0.0  ;;  %v3029_v18 = vcombine.high %v8091_v61, %v8091_v61  ;;  %v5988_v61 = vld [vmem:[%s6213_s20 + $0x34] sm:$0xf]  ;;  %vm8667_vm2 = vcmask 293888  }
 0x2c5   : > { %v4707_v36 = vsel %vm8661_vm1, %v4705_v53, %v4706_v62  ;;  %v3840_v62 = vcombine.low %v3312_v58, %v3313_v63  ;;  %vm3154_vm1 = vcmp.le.s32.totalorder %v3130_v31, 16  ;;  %v8137_v50 = vpack.c.bf16 %v3937_v32, %v3937_v32 }
 0x2c6   : > { %5852 = vmatmul.mubr.msk.bf16.vlgmr.msra.gmra.mxu1 %vm4746_vm11, %v4707_v36  ;;  %4172 = vrot.lane.b32.xlu1 %v7915_v35, %s6102_s28  ;;  %v8093_v30 = vpop.permute.xlu0 %4259  ;;  %v3004_v35 = vcombine.high %v3002_v47, %v3002_v47  ;;  %v4237_v38 = vshrl.u32 %v8099_v17, 16  ;;  %v4240_v25 = vshll.u32 %v8099_v17, 16  ;;  %vm8140_vm15 = vmand %vm3144_vm12, %vm3154_vm1  ;;  %v3320_v15 = vmax.f32 %v3029_v18, 0.0 }
 0x2c7   : > { %v3848_v36 = vrot.slane %v3840_v62, %v7306_v22  ;;  %vm3195_vm13 = vmand %vm8140_vm15, %vm3165_vm0  ;;  %v4244_v5 = vshll.u32 %v8137_v50, 16  ;;  %v4457_v63 = vsel %vm945_vm4, %v4420_v57, %v8016_v16 }
 0x2c8   : > { %4210 = vrot.lane.b32.xlu0 %v7814_v52, %s6099_s21  ;;  %v8101_v8 = vpop.permute.xlu1 %4226  ;;  %v3314_v49 = vmax.f32 %v3004_v35, 0.0  ;;  %v3315_v52 = vmax.f32 %v3012_v60, 0.0  ;;  %v4239_v27 = vrot.slane %v4237_v38, 7  ;;  %v3880_v58 = vrot.slane %v3320_v15, %v7306_v22  ;;  %vm3230_vm0 = vmand %vm8140_vm15, %vm3200_vm14 }
 0x2c9   : > { %v4489_v16 = vsel %vm986_vm5, %v4457_v63, %v7709_v4  ;;  %vm8666_vm14 = vcmask 261120   ;;  %vm8669_vm1 = vmmov %vm8667_vm2 }
 0x2ca   : > { %4396 = vrot.lane.b32.xlu1 %v7962_v21, %s6109_s9  ;;  %v8108_v46 = vpop.permute.xlu0 %4288  ;;  %v3841_v24 = vcombine.low %v3314_v49, %v3315_v52  ;;  %v4242_v48 = vor.u32 %v4240_v25, %v4239_v27  ;;  %v3940_v54 = vsel %vm3230_vm0, %v3880_v58, 0.0  ;;  %vm8668_vm12 = vmmov %vm8666_vm14 }
 0x2cb   : > { %v3960_v25 = vpack.c.bf16 %v3940_v54, %v3940_v54 }
 0x2cc   : > { %4214 = vrot.lane.b32.xlu0 %v7929_v39, %s6099_s21  ;;  %v8114_v12 = vpop.permute.xlu1 %4257 }
 0x2ce   : > { %4176 = vrot.lane.b32.xlu1 %v8004_v13, %s6102_s28  ;;  %v8124_v53 = vpop.permute.xlu0 %4292 }
 0x2d0   : > { %4232 = vrot.lane.b32.xlu0 %v7984_v11, %s6104_s4  ;;  %v3872_v11 = vrot.slane %v3858_v37, %v7306_v22  ;;  %v8134_v56 = vpop.permute.xlu1 %4261 }
 0x2d2   : > { %4212 = vrot.lane.b32.xlu1 %v7873_v44, %s6099_s21  ;;  %v3855_v44 = vrot.slane %v3841_v24, %v7306_v22  ;;  %v3873_v20 = vcombine.low %v3865_v9, %v3872_v11  ;;  %v4319_v47 = vpop.permute.xlu0 %4318 }
 0x2d4   : > { %4271 = vrot.lane.b32.xlu0 %v8029_v29, %s6101_s27  ;;  %v4219_v29 = vrot.slane %v8099_v17, 7  ;;  %v3856_v40 = vcombine.low %v3848_v36, %v3855_v44  ;;  %v3939_v60 = vsel %vm8140_vm15, %v3873_v20, 0.0  ;;  %v4291_v19 = vpop.permute.xlu1 %4290  ;;  %v5990_v36 = vld [vmem:[%s6213_s20 + $0x40] sm:$0xf]  ;;  %vm8670_vm15 = vcmask 1046528  }
 0x2d6   : > { %4216 = vrot.lane.b32.xlu1 %v7962_v21, %s6099_s21  ;;  %v3938_v51 = vsel %vm3195_vm13, %v3856_v40, 0.0  ;;  %v4350_v26 = vpop.permute.xlu0 %4349  ;;  %vm8672_vm13 = vmmov %vm8669_vm1  ;;  %s6112_s21 = smov 48  }
 0x2d7   : > { %v8156_v35 = vpack.c.bf16 %v3939_v60, %v3938_v51 }
 0x2d8   : > { %4275 = vrot.lane.b32.xlu0 %v4242_v48, %s6101_s27  ;;  %v8166_v49 = vpop.permute.xlu1 %4294 }
 0x2d9   : > { %v4331_v33 = vshrl.u32 %v8156_v35, 16  ;;  %v4313_v11 = vrot.slane %v8156_v35, 7 }
 0x2da   : > { %4234 = vrot.lane.b32.xlu1 %v4219_v29, %s6104_s4  ;;  %v8175_v23 = vpop.permute.xlu0 %4049 }
 0x2db   : > { %v4333_v38 = vrot.slane %v4331_v33, 7 }
 0x2dc   : > { %4304 = vrot.lane.b32.xlu0 %v7929_v39, %s6100_s24  ;;  %v4246_v39 = vsel %vm4057_vm10, %v4239_v27, %v4244_v5  ;;  %v4518_v27 = vsel %vm1027_vm6, %v4489_v16, %v8047_v43  ;;  %v4338_v5 = vshll.u32 %v3960_v25, 16 }
 0x2de   : > { %4273 = vrot.lane.b32.xlu1 %v8004_v13, %s6101_s27  ;;  %v5987_v13 = vld [vmem:[%s6213_s20 + $0x30] sm:$0xf] }
 0x2df   : > { %v5725_v52 = vcombine.low %v5987_v13, %v5988_v61 }
 0x2e0   : > { %4308 = vrot.lane.b32.xlu0 %v8099_v17, %s6100_s24 }
 0x2e1   : > { %v4418_v45 = vsel %vm904_vm3, %v5725_v52, %v7849_v3  ;;  %v4545_v3 = vsel %vm1068_vm7, %v4518_v27, %v8114_v12 }
 0x2e2   : > { %4277 = vrot.lane.b32.xlu1 %v4246_v39, %s6101_s27  ;;  %v4455_v31 = vsel %vm945_vm4, %v4418_v45, %v7951_v6  ;;  %v4577_v4 = vsel %vm1109_vm8, %v4545_v3, %v4291_v19  ;;  %v5991_v19 = vld [vmem:[%s6213_s20 + $0x44] sm:$0x3]  ;;  %s185_s27 = sand.u32 1, %s6072_s13  }
 0x2e3   : > { %v4487_v32 = vsel %vm986_vm5, %v4455_v31, %v7816_v7  ;;  %v5728_v18 = vcombine.low %v5991_v19, %v5991_v19 }
 0x2e4   : > { %4326 = vrot.lane.b32.xlu0 %v4219_v29, %s6105_s5  ;;  %v4517_v44 = vsel %vm1027_vm6, %v4487_v32, %v8047_v43  ;;  %v4606_v29 = vsel %vm1150_vm9, %v4577_v4, %v4319_v47 }
 0x2e5   : > { %v4543_v12 = vsel %vm1068_vm7, %v4517_v44, %v8064_v14  ;;  %v4425_v61 = vsel %vm904_vm3, %v5728_v18, %v7939_v59 }
 0x2e6   : > { %4306 = vrot.lane.b32.xlu1 %v7962_v21, %s6100_s24  ;;  %v4334_v21 = vshll.u32 %v8156_v35, 16  ;;  %v4575_v7 = vsel %vm1109_vm8, %v4543_v12, %v8108_v46 }
 0x2e7   : > { %v8180_v37 = vpop.permute.xlu1 %4320  ;;  %v4605_v43 = vsel %vm1150_vm9, %v4575_v7, %v4319_v47  ;;  %v4340_v47 = vsel %vm4057_vm10, %v4333_v38, %v4338_v5  ;;  %vm8671_vm10 = vmmov %vm8668_vm12  ;;  %v5994_v5 = vld [vmem:[%s6213_s20 + $0x4c] sm:$0xf] }
 0x2e8   : > { %4365 = vrot.lane.b32.xlu0 %v4242_v48, %s6106_s6  ;;  %v4336_v28 = vor.u32 %v4334_v21, %v4333_v38  ;;  %v5989_v48 = vld [vmem:[%s6213_s20 + $0x3c] sm:$0xf]  ;;  %v4631_v14 = vsel %vm8668_vm12, %v4605_v43, %v4350_v26  ;;  %vm8673_vm0 = vmmov %vm8671_vm10 }
 0x2e9   : > { %v5727_v20 = vcombine.low %v5989_v48, %v5990_v36  ;;  %v5992_v48 = vld [vmem:[%s6213_s20 + $0x50] sm:$0x3]  ;;  %vm8676_vm12 = vmmov %vm8673_vm0 }
 0x2ea   : > { %4310 = vrot.lane.b32.xlu1 %v8137_v50, %s6100_s24  ;;  %v8194_v24 = vpop.permute.xlu0 %4355  ;;  %v5730_v36 = vcombine.low %v5992_v48, %v5992_v48 }
 0x2eb   : > { %v4352_v62 = vpop.permute.xlu1 %4351 }
 0x2ec   : > { %4369 = vrot.lane.b32.xlu0 %v4336_v28, %s6106_s6  ;;  %v4633_v1 = vsel %vm8666_vm14, %v4606_v29, %v4352_v62  ;;  %vm8674_vm14 = vmmov %vm8669_vm1  ;;  %v4430_v29 = vsel %vm904_vm3, %v5730_v36, %v8175_v23 }
 0x2ee   : > { %4328 = vrot.lane.b32.xlu1 %v4313_v11, %s6105_s5  ;;  %v4385_v6 = vpop.permute.xlu0 %4384 }
 0x2ef   : > { %v4354_v9 = vpop.permute.xlu1 %4353  ;;  %v4665_v40 = vsel %vm8667_vm2, %v4633_v1, %v4385_v6  ;;  %vm8675_vm2 = vmmov %vm8670_vm15 }
 0x2f0   : > { %4398 = vrot.lane.b32.xlu0 %v8099_v17, %s6109_s9  ;;  %v4423_v17 = vsel %vm904_vm3, %v5727_v20, %v7939_v59  ;;  %v4709_v10 = vrot.slane %v4665_v40, 1  ;;  %v5993_v40 = vld [vmem:[%s6213_s20 + $0x48] sm:$0xf] }
 0x2f2   : > { %4367 = vrot.lane.b32.xlu1 %v4246_v39, %s6106_s6  ;;  %v8223_v60 = vpop.permute.xlu0 %4162  ;;  %v4459_v39 = vsel %vm945_vm4, %v4423_v17, %v8008_v0  ;;  %v4461_v0 = vsel %vm945_vm4, %v4425_v61, %v8033_v41  ;;  %v5996_v61 = vld [vmem:[%s6213_s20 + $0x58] sm:$0xf] }
 0x2f3   : > { %v4383_v51 = vpop.permute.xlu1 %4382  ;;  %v4491_v26 = vsel %vm986_vm5, %v4459_v39, %v8027_v2  ;;  %v4493_v2 = vsel %vm986_vm5, %v4461_v0, %v8077_v34 }
 0x2f4   : > { %v4663_v46 = vsel %vm8669_vm1, %v4631_v14, %v4383_v51  ;;  %4402 = vrot.lane.b32.xlu0 %v8156_v35, %s6109_s9  ;;  %v4520_v15 = vsel %vm1027_vm6, %v4491_v26, %v8101_v8  ;;  %v4521_v38 = vsel %vm1027_vm6, %v4493_v2, %v8101_v8  ;;  %v5729_v14 = vcombine.low %v5993_v40, %v5994_v5 }
 0x2f5   : > { %v4708_v42 = vrot.slane %v4663_v46, 1  ;;  %v4547_v52 = vsel %vm1068_vm7, %v4520_v15, %v8093_v30  ;;  %v4549_v41 = vsel %vm1068_vm7, %v4521_v38, %v8134_v56 }
 0x2f6   : > { %4371 = vrot.lane.b32.xlu1 %v4340_v47, %s6106_s6  ;;  %v4387_v33 = vpop.permute.xlu0 %4386  ;;  %v4579_v59 = vsel %vm1109_vm8, %v4547_v52, %v8124_v53  ;;  %v4581_v34 = vsel %vm1109_vm8, %v4549_v41, %v8166_v49  ;;  %v4428_v46 = vsel %vm904_vm3, %v5729_v14, %v8175_v23 }
 0x2f7   : > { %v8240_v13 = vpop.permute.xlu1 %4051  ;;  %v4710_v35 = vsel %vm8670_vm15, %v4708_v42, %v4709_v10  ;;  %v4609_v8 = vsel %vm1150_vm9, %v4581_v34, %v8180_v37  ;;  %v4463_v39 = vsel %vm945_vm4, %v4428_v46, %v8223_v60  ;;  %vm8677_vm15 = vmmov %vm8673_vm0  ;;  %v5997_v34 = vld [vmem:[%s6213_s20 + $0x5c] sm:$0x3] }
 0x2f8   : > { %5855 = vmatprep.mubr.msk.bf16.mxu1 %vm4746_vm11, %v4710_v35  ;;  %v4637_v21 = vsel %vm8673_vm0, %v4609_v8, %v8194_v24  ;;  %v5995_v35 = vld [vmem:[%s6213_s20 + $0x54] sm:$0xf] }
 0x2f9   : > { %v5731_v0 = vcombine.low %v5995_v35, %v5996_v61  ;;  %v5998_v35 = vld [vmem:[%s6213_s20 + $0x68] sm:$0x3] }
 0x2fa   : > { %4400 = vrot.lane.b32.xlu1 %v8137_v50, %s6109_s9  ;;  %v8254_v57 = vpop.permute.xlu0 %4166  ;;  %v4608_v50 = vsel %vm1150_vm9, %v4579_v59, %v8180_v37  ;;  %v5734_v61 = vcombine.low %v5998_v35, %v5998_v35 }
 0x2fb   : > { %v4165_v58 = vpop.permute.xlu1 %4164  ;;  %v4635_v30 = vsel %vm8671_vm10, %v4608_v50, %v4354_v9  ;;  %v4433_v8 = vsel %vm904_vm3, %v5731_v0, %v8240_v13  ;;  %vm8678_vm10 = vmmov %vm8669_vm1  ;;  %v5999_v0 = vld [vmem:[%s6213_s20 + $0x60] sm:$0xf] }
 0x2fc   : > { %v4667_v63 = vsel %vm8672_vm13, %v4635_v30, %v4387_v33  ;;  %v4465_v1 = vsel %vm945_vm4, %v4430_v29, %v4165_v58  ;;  %v5732_v30 = vcombine.low %v5997_v34, %v5997_v34  ;;  %vm8679_vm13 = vmmov %vm8675_vm2 }
 0x2fd   : > { %v4711_v16 = vrot.slane %v4667_v63, 1 }
 0x2fe   : > { %4404 = vrot.lane.b32.xlu1 %v3960_v25, %s6109_s9  ;;  %v4203_v53 = vpop.permute.xlu0 %4202 }
 0x2ff   : > { %v4389_v56 = vpop.permute.xlu1 %4388  ;;  %v4495_v42 = vsel %vm986_vm5, %v4463_v39, %v4203_v53  ;;  %v4467_v53 = vsel %vm945_vm4, %v4433_v8, %v8254_v57 }
 0x300   : > { %v4669_v45 = vsel %vm8674_vm14, %v4637_v21, %v4389_v56  ;;  %vm8680_vm14 = vmmov %vm8669_vm1 }
 0x301   : > { %v4712_v28 = vrot.slane %v4669_v45, 1 }
 0x302   : > { %v4207_v54 = vpop.permute.xlu0 %4206 }
 0x303   : > { %v8274_v49 = vpop.permute.xlu1 %4168  ;;  %v4713_v31 = vsel %vm8675_vm2, %v4711_v16, %v4712_v28  ;;  %v4499_v45 = vsel %vm986_vm5, %v4467_v53, %v4207_v54  ;;  %vm8681_vm2 = vmmov %vm8673_vm0 }
 0x304   : > { %5856 = vmatmul.mubr.msk.bf16.gmra.mxu1 %vm4746_vm11, %v4713_v31 }
 0x306   : > { %v4229_v37 = vpop.permute.xlu0 %4228 }
 0x307   : > { %v4205_v27 = vpop.permute.xlu1 %4204  ;;  %v4523_v33 = vsel %vm1027_vm6, %v4495_v42, %v4229_v37 }
 0x308   : > { %v4497_v51 = vsel %vm986_vm5, %v4465_v1, %v4205_v27  ;;  %v4435_v27 = vsel %vm904_vm3, %v5732_v30, %v8240_v13 }
 0x309   : > { %v4524_v18 = vsel %vm1027_vm6, %v4497_v51, %v4229_v37 }
 0x30a   : > { %v4264_v62 = vpop.permute.xlu0 %4263 }
 0x30b   : > { %v4209_v11 = vpop.permute.xlu1 %4208  ;;  %v4551_v2 = vsel %vm1068_vm7, %v4523_v33, %v4264_v62  ;;  %v4469_v62 = vsel %vm945_vm4, %v4435_v27, %v8274_v49 }
 0x30c   : > { %v4501_v57 = vsel %vm986_vm5, %v4469_v62, %v4209_v11 }
 0x30e   : > { %v4268_v3 = vpop.permute.xlu0 %4267 }
 0x30f   : > { %v4231_v24 = vpop.permute.xlu1 %4230 }
 0x310   : > { %v4526_v28 = vsel %vm1027_vm6, %v4499_v45, %v4231_v24  ;;  %v6003_v45 = vld [vmem:[%s6213_s20 + $0x74] sm:$0x3] }
 0x312   : > { %v4297_v4 = vpop.permute.xlu0 %4296 }
 0x313   : > { %v4266_v25 = vpop.permute.xlu1 %4265  ;;  %v4583_v52 = vsel %vm1109_vm8, %v4551_v2, %v4297_v4  ;;  %v4555_v4 = vsel %vm1068_vm7, %v4526_v28, %v4268_v3  ;;  %v6000_v2 = vld [vmem:[%s6213_s20 + $0x64] sm:$0xf] }
 0x314   : > { %v4553_v47 = vsel %vm1068_vm7, %v4524_v18, %v4266_v25  ;;  %v4527_v25 = vsel %vm1027_vm6, %v4501_v57, %v4231_v24 }
 0x316   : > { %v4301_v32 = vpop.permute.xlu0 %4300 }
 0x317   : > { %v4270_v6 = vpop.permute.xlu1 %4269 }
 0x318   : > { %v4557_v48 = vsel %vm1068_vm7, %v4527_v25, %v4270_v6 }
 0x31a   : > { %v4323_v44 = vpop.permute.xlu0 %4322 }
 0x31b   : > { %v4299_v9 = vpop.permute.xlu1 %4298  ;;  %v4611_v38 = vsel %vm1150_vm9, %v4583_v52, %v4323_v44  ;;  %v6001_v52 = vld [vmem:[%s6213_s20 + $0x6c] sm:$0xf] }
 0x31c   : > { %v4585_v10 = vsel %vm1109_vm8, %v4553_v47, %v4299_v9 }
 0x31d   : > { %v4612_v23 = vsel %vm1150_vm9, %v4585_v10, %v4323_v44  ;;  %v4587_v44 = vsel %vm1109_vm8, %v4555_v4, %v4301_v32 }
 0x31e   : > { %v4358_v20 = vpop.permute.xlu0 %4357 }
 0x31f   : > { %v4303_v12 = vpop.permute.xlu1 %4302  ;;  %v4639_v41 = vsel %vm8677_vm15, %v4611_v38, %v4358_v20  ;;  %vm8684_vm15 = vmmov %vm8673_vm0 }
 0x320   : > { %v4589_v13 = vsel %vm1109_vm8, %v4557_v48, %v4303_v12 }
 0x322   : > { %v8281_v7 = vpop.permute.xlu0 %4053 }
 0x323   : > { %v4325_v43 = vpop.permute.xlu1 %4324 }
 0x324   : > { %v4614_v36 = vsel %vm1150_vm9, %v4587_v44, %v4325_v43  ;;  %v4615_v49 = vsel %vm1150_vm9, %v4589_v13, %v4325_v43 }
 0x326   : > { %v4364_v19 = vpop.permute.xlu0 %4363 }
 0x327   : > { %v4360_v17 = vpop.permute.xlu1 %4359  ;;  %v4645_v3 = vsel %vm8681_vm2, %v4615_v49, %v4364_v19 }
 0x328   : > { %v4641_v60 = vsel %vm8676_vm12, %v4612_v23, %v4360_v17  ;;  %vm8682_vm12 = vmmov %vm8669_vm1  ;;  %v5733_v23 = vcombine.low %v5999_v0, %v6000_v2 }
 0x32a   : > { %v4393_v26 = vpop.permute.xlu0 %4392  ;;  %v4438_v30 = vsel %vm904_vm3, %v5733_v23, %v8281_v7 }
 0x32b   : > { %v4673_v59 = vsel %vm8669_vm1, %v4641_v60, %v4393_v26  ;;  %vm8683_vm1 = vmmov %vm8679_vm13  ;;  %v6002_v60 = vld [vmem:[%s6213_s20 + $0x70] sm:$0xf]  ;;  %s6111_s20 = smov 40  }
 0x32c   : > { %v4362_v15 = vpop.permute.xlu1 %4361  ;;  %v4715_v21 = vrot.slane %v4673_v59, 1  ;;  %v5735_v38 = vcombine.low %v6001_v52, %v6002_v60 }
 0x32d   : > { %v4643_v20 = vsel %vm8673_vm0, %v4614_v36, %v4362_v15 }
 0x32e   : > { %v8304_v58 = vpop.permute.xlu0 %4170 }
 0x32f   : > { %v4471_v53 = vsel %vm945_vm4, %v4438_v30, %v8304_v58 }
 0x330   : > { %v4391_v50 = vpop.permute.xlu1 %4390 }
 0x331   : > { %v4671_v63 = vsel %vm8678_vm10, %v4639_v41, %v4391_v50  ;;  %v4440_v50 = vsel %vm904_vm3, %v5734_v61, %v8281_v7 }
 0x332   : > { %v4714_v56 = vrot.slane %v4671_v63, 1  ;;  %v4395_v16 = vpop.permute.xlu0 %4394 }
 0x333   : > { %v4675_v11 = vsel %vm8680_vm14, %v4643_v20, %v4395_v16  ;;  %v5736_v16 = vcombine.low %v6003_v45, %v6003_v45  ;;  %vm8689_vm14 = vmmov %vm8681_vm2 }
 0x334   : > { %v8315_v31 = vpop.permute.xlu1 %4055  ;;  %v4716_v37 = vsel %vm8679_vm13, %v4714_v56, %v4715_v21  ;;  %v4717_v32 = vrot.slane %v4675_v11, 1  ;;  %vm8686_vm13 = vmmov %vm8678_vm10 }
 0x335   : > { %5859 = vmatprep.mubr.msk.bf16.mxu1 %vm4746_vm11, %v4716_v37  ;;  %v4443_v8 = vsel %vm904_vm3, %v5735_v38, %v8315_v31  ;;  %vm8690_vm2 = vmmov %vm8683_vm1 }
 0x336   : > { %v4175_v54 = vpop.permute.xlu0 %4174 }
 0x337   : > { %v4475_v21 = vsel %vm945_vm4, %v4443_v8, %v4175_v54 }
 0x338   : > { %v4173_v9 = vpop.permute.xlu1 %4172 }
 0x339   : > { %v4473_v34 = vsel %vm945_vm4, %v4440_v50, %v4173_v9  ;;  %v4445_v9 = vsel %vm904_vm3, %v5736_v16, %v8315_v31  ;;  %vm8685_vm3 = vmmov %vm8673_vm0 }
 0x33a   : > { %v4211_v29 = vpop.permute.xlu0 %4210 }
 0x33b   : > { %v4503_v28 = vsel %vm986_vm5, %v4471_v53, %v4211_v29 }
 0x33c   : > { %v4397_v1 = vpop.permute.xlu1 %4396 }
 0x33d   : > { %v4677_v24 = vsel %vm8682_vm12, %v4645_v3, %v4397_v1 }
 0x33e   : > { %v4718_v40 = vrot.slane %v4677_v24, 1  ;;  %v4215_v5 = vpop.permute.xlu0 %4214 }
 0x33f   : > { %v4507_v37 = vsel %vm986_vm5, %v4475_v21, %v4215_v5 }
 0x340   : > { %v4177_v6 = vpop.permute.xlu1 %4176  ;;  %v4719_v14 = vsel %vm8683_vm1, %v4717_v32, %v4718_v40 }
 0x341   : > { %5860 = vmatmul.mubr.msk.bf16.gmra.mxu1 %vm4746_vm11, %v4719_v14  ;;  %v4477_v13 = vsel %vm945_vm4, %v4445_v9, %v4177_v6 }
 0x342   : > { %v4233_v12 = vpop.permute.xlu0 %4232 }
 0x343   : > { %v4529_v27 = vsel %vm1027_vm6, %v4503_v28, %v4233_v12 }
 0x344   : > { %v4213_v43 = vpop.permute.xlu1 %4212 }
 0x345   : > { %v4505_v63 = vsel %vm986_vm5, %v4473_v34, %v4213_v43 }
 0x346   : > { %v4272_v51 = vpop.permute.xlu0 %4271  ;;  %v4530_v62 = vsel %vm1027_vm6, %v4505_v63, %v4233_v12 }
 0x347   : > { %v4559_v4 = vsel %vm1068_vm7, %v4529_v27, %v4272_v51 }
 0x348   : > { %v4217_v18 = vpop.permute.xlu1 %4216 }
 0x349   : > { %v4509_v11 = vsel %vm986_vm5, %v4477_v13, %v4217_v18  ;;  %vm8687_vm5 = vmmov %vm8673_vm0 }
 0x34a   : > { %v4276_v19 = vpop.permute.xlu0 %4275  ;;  %vm8688_vm0 = vmmov %vm8678_vm10 }
 0x34b   : > { %vm8691_vm12 = vmmov %vm8688_vm0 }
 0x34c   : > { %v4235_v17 = vpop.permute.xlu1 %4234 }
 0x34d   : > { %v4532_v7 = vsel %vm1027_vm6, %v4507_v37, %v4235_v17  ;;  %v4533_v31 = vsel %vm1027_vm6, %v4509_v11, %v4235_v17 }
 0x34e   : > { %v4305_v46 = vpop.permute.xlu0 %4304  ;;  %v4563_v48 = vsel %vm1068_vm7, %v4532_v7, %v4276_v19 }
 0x34f   : > { %v4591_v54 = vsel %vm1109_vm8, %v4559_v4, %v4305_v46 }
 0x350   : > { %v4274_v47 = vpop.permute.xlu1 %4273 }
 0x351   : > { %v4561_v58 = vsel %vm1068_vm7, %v4530_v62, %v4274_v47 }
 0x352   : > { %v4309_v39 = vpop.permute.xlu0 %4308 }
 0x353   : > { %v4595_v20 = vsel %vm1109_vm8, %v4563_v48, %v4309_v39 }
 0x354   : > { %v4278_v10 = vpop.permute.xlu1 %4277 }
 0x355   : > { %v4565_v5 = vsel %vm1068_vm7, %v4533_v31, %v4278_v10  ;;  %vm8692_vm7 = vmmov %vm8683_vm1  ;;  %vm5255_vm1 = vcmask 1043459  }
 0x356   : > { %v4327_v42 = vpop.permute.xlu0 %4326 }
 0x357   : > { %v4617_v36 = vsel %vm1150_vm9, %v4591_v54, %v4327_v42 }
 0x358   : > { %v4307_v26 = vpop.permute.xlu1 %4306 }
 0x359   : > { %v4593_v25 = vsel %vm1109_vm8, %v4561_v58, %v4307_v26 }
 0x35a   : > { %v4366_v33 = vpop.permute.xlu0 %4365  ;;  %v4618_v1 = vsel %vm1150_vm9, %v4593_v25, %v4327_v42 }
 0x35b   : > { %v4647_v49 = vsel %vm8684_vm15, %v4617_v36, %v4366_v33  ;;  %vm5257_vm15 = vcmask 1045509  }
 0x35c   : > { %v4311_v15 = vpop.permute.xlu1 %4310 }
 0x35d   : > { %v4597_v14 = vsel %vm1109_vm8, %v4565_v5, %v4311_v15 }
 0x35e   : > { %v4370_v59 = vpop.permute.xlu0 %4369 }
 0x360   : > { %v4329_v41 = vpop.permute.xlu1 %4328 }
 0x361   : > { %v4620_v29 = vsel %vm1150_vm9, %v4595_v20, %v4329_v41  ;;  %v4621_v18 = vsel %vm1150_vm9, %v4597_v14, %v4329_v41  ;;  %vm5253_vm9 = vcmask 1041409  }
 0x362   : > { %v4399_v57 = vpop.permute.xlu0 %4398  ;;  %v4651_v43 = vsel %vm8687_vm5, %v4620_v29, %v4370_v59 }
 0x363   : > { %v4679_v3 = vsel %vm8678_vm10, %v4647_v49, %v4399_v57  ;;  %v6110_v57 = vmov 1934713408   ;;  %vm5259_vm10 = vcmask 1047559  }
 0x364   : > { %v4368_v56 = vpop.permute.xlu1 %4367  ;;  %v4720_v12 = vrot.slane %v4679_v3, 1  ;;  %v5384_v4 = vunpack.c.l.s4 %v6110_v57 }
 0x365   : > { %v4649_v24 = vsel %vm8685_vm3, %v4618_v1, %v4368_v56 }
 0x366   : > { %v4403_v32 = vpop.permute.xlu0 %4402  ;;  %v5385_v29 = vunpack.c.0.s8 %v5384_v4 }
 0x367   : > { %v4683_v19 = vsel %vm8688_vm0, %v4651_v43, %v4403_v32 }
 0x368   : > { %v4372_v44 = vpop.permute.xlu1 %4371  ;;  %v4723_v10 = vrot.slane %v4683_v19, 1 }
 0x369   : > { %v4653_v17 = vsel %vm8689_vm14, %v4621_v18, %v4372_v44 }
 0x36c   : > { %v4401_v40 = vpop.permute.xlu1 %4400 }
 0x36d   : > { %v4681_v6 = vsel %vm8686_vm13, %v4649_v24, %v4401_v40  ;;  %vm5561_vm13 = vcmask 392192  }
 0x36e   : > { %v4721_v51 = vrot.slane %v4681_v6, 1 }
 0x370   : > { %v4405_v46 = vpop.permute.xlu1 %4404  ;;  %v4722_v47 = vsel %vm8690_vm2, %v4720_v12, %v4721_v51 }
 0x371   : > { %v4685_v39 = vsel %vm8691_vm12, %v4653_v17, %v4405_v46  ;;  %5863 = vmatprep.mubr.msk.bf16.mxu1 %vm4746_vm11, %v4722_v47  ;;  %v8411_v17 = vsub.s32 %v5385_v29, %v6508_v55 }
 0x372   : > { %v4724_v42 = vrot.slane %v4685_v39, 1 }
 0x374   : > { %v4725_v26 = vsel %vm8692_vm7, %v4723_v10, %v4724_v42 }
 0x375   : > { %5864 = vmatmul.mubr.msk.bf16.gmra.mxu1 %vm4746_vm11, %v4725_v26 }
 0x386   : > { %v5853_v33 = vpop.f32.mrf.mxu1 }
 0x388   : > { %v4809_v15 = vpop.f32.mrf.mxu1 }
 0x389   : > { %v4872_v23 = vadd.f32 %v5853_v33, %v4809_v15 }
 0x38a   : > { %v5854_v35 = vpop.f32.mrf.mxu1 }
 0x38b   : > { %v4888_v60 = vcombine.high %v4872_v23, %v4872_v23  ;;  %v4895_v38 = vrot.slane %v4872_v23, %v7306_v22 }
 0x38c   : > { %v4812_v61 = vpop.f32.mrf.mxu1 }
 0x38d   : > { %v4873_v50 = vadd.f32 %v5854_v35, %v4812_v61  ;;  %v4902_v34 = vrot.slane %v4888_v60, %v7306_v22  ;;  %v4903_v30 = vcombine.high %v4895_v38, %v4895_v38  ;;  %v5748_v13 = vrot.slane %v4895_v38, 9 }
 0x38f   : > { %v4905_v21 = vcombine.high %v4873_v50, %v4873_v50  ;;  %v4904_v56 = vcombine.high %v4902_v34, %v4902_v34  ;;  %v5749_v45 = vrot.slane %v4903_v30, 9  ;;  %v8393_v16 = vrot.slane %v4873_v50, %v7306_v22 }
 0x390   : > { %v5750_v11 = vrot.slane %v4902_v34, 9  ;;  %v5152_v14 = vadd.f32 %v5748_v13, %v4895_v38 }
 0x391   : > { %v8396_v7 = vrot.slane %v4905_v21, %v7306_v22  ;;  %v5751_v58 = vrot.slane %v4904_v56, 9  ;;  %v5153_v54 = vadd.f32 %v5749_v45, %v4903_v30  ;;  %v4920_v25 = vcombine.high %v8393_v16, %v8393_v16 }
 0x392   : > { %v5154_v43 = vadd.f32 %v5750_v11, %v4902_v34  ;;  %v5184_v35 = vmul.f32 0.25, %v5152_v14  ;;  %v5752_v61 = vrot.slane %v8393_v16, 9 }
 0x393   : > { %v4921_v20 = vcombine.high %v8396_v7, %v8396_v7  ;;  %v5155_v3 = vadd.f32 %v5751_v58, %v4904_v56  ;;  %v5185_v1 = vmul.f32 0.25, %v5153_v54  ;;  %v5753_v31 = vrot.slane %v4920_v25, 9 }
 0x394   : > { %v5754_v23 = vrot.slane %v8396_v7, 9 }
 0x395   : > { %v5755_v12 = vrot.slane %v4921_v20, 9  ;;  %v5187_v46 = vmul.f32 0.25, %v5155_v3  ;;  %v8413_v47 = vrot.slane %v5185_v1, 7  ;;  %v5157_v39 = vadd.f32 %v5753_v31, %v4920_v25 }
 0x397   : > { %v5189_v50 = vmul.f32 0.25, %v5157_v39 }
 0x399   : > { %v5270_v54 = vrot.slane %v5189_v50, 7 }
 0x3c4   : > { %v5857_v0 = vpop.f32.mrf.mxu1 }
 0x3c6   : > { %v4825_v2 = vpop.f32.mrf.mxu1 }
 0x3c7   : > { %v4874_v52 = vadd.f32 %v5857_v0, %v4825_v2  ;;  %v5159_v0 = vadd.f32 %v5755_v12, %v4921_v20  ;;  %v5186_v2 = vmul.f32 0.25, %v5154_v43 }
 0x3c8   : > { %v5858_v41 = vpop.f32.mrf.mxu1 }
 0x3c9   : > { %v4922_v59 = vcombine.high %v4874_v52, %v4874_v52  ;;  %v4929_v8 = vrot.slane %v4874_v52, %v7306_v22  ;;  %v5191_v45 = vmul.f32 0.25, %v5159_v0 }
 0x3ca   : > { %v4828_v53 = vpop.f32.mrf.mxu1 }
 0x3cb   : > { %v4936_v63 = vrot.slane %v4922_v59, %v7306_v22  ;;  %v4875_v28 = vadd.f32 %v5858_v41, %v4828_v53  ;;  %v4937_v37 = vcombine.high %v4929_v8, %v4929_v8  ;;  %v5756_v51 = vrot.slane %v4929_v8, 9 }
 0x3cc   : > { %v5254_v59 = vsel %vm5253_vm9, %v8413_v47, %v5184_v35  ;;  %v8424_v41 = vrot.slane %v5187_v46, 7  ;;  %v5277_v20 = vrot.slane %v5191_v45, 7 }
 0x3cd   : > { %v4938_v27 = vcombine.high %v4936_v63, %v4936_v63  ;;  %v8401_v44 = vrot.slane %v4875_v28, %v7306_v22  ;;  %v5757_v9 = vrot.slane %v4937_v37, 9  ;;  %v4939_v36 = vcombine.high %v4875_v28, %v4875_v28 }
 0x3ce   : > { %v5758_v18 = vrot.slane %v4936_v63, 9  ;;  %v5160_v52 = vadd.f32 %v5756_v51, %v4929_v8  ;;  %v5256_v4 = vsel %vm5255_vm1, %v8413_v47, %v5254_v59  ;;  %v5264_v58 = vsel %vm5253_vm9, %v8424_v41, %v5186_v2 }
 0x3cf   : > { %v5759_v48 = vrot.slane %v4938_v27, 9  ;;  %v4954_v24 = vcombine.high %v8401_v44, %v8401_v44  ;;  %v5161_v32 = vadd.f32 %v5757_v9, %v4937_v37  ;;  %v8408_v5 = vrot.slane %v4939_v36, %v7306_v22 }
 0x3d0   : > { %v5162_v60 = vadd.f32 %v5758_v18, %v4936_v63  ;;  %v5760_v28 = vrot.slane %v8401_v44, 9  ;;  %v5156_v37 = vadd.f32 %v5752_v61, %v8393_v16  ;;  %v5258_v11 = vsel %vm5257_vm15, %v8413_v47, %v5256_v4 }
 0x3d1   : > { %v5163_v40 = vadd.f32 %v5759_v48, %v4938_v27  ;;  %v5761_v10 = vrot.slane %v4954_v24, 9  ;;  %v5193_v42 = vmul.f32 0.25, %v5161_v32  ;;  %v4955_v33 = vcombine.high %v8408_v5, %v8408_v5 }
 0x3d2   : > { %v5158_v27 = vadd.f32 %v5754_v23, %v8396_v7  ;;  %v5194_v57 = vmul.f32 0.25, %v5162_v60  ;;  %v5164_v16 = vadd.f32 %v5760_v28, %v8401_v44  ;;  %v5188_v29 = vmul.f32 0.25, %v5156_v37 }
 0x3d3   : > { %v5195_v26 = vmul.f32 0.25, %v5163_v40  ;;  %v5165_v34 = vadd.f32 %v5761_v10, %v4954_v24  ;;  %v5284_v30 = vrot.slane %v5193_v42, 7  ;;  %v5763_v21 = vrot.slane %v4955_v33, 9 }
 0x3d4   : > { %v5190_v3 = vmul.f32 0.25, %v5158_v27  ;;  %v5762_v1 = vrot.slane %v8408_v5, 9  ;;  %v5265_v44 = vsel %vm5255_vm1, %v8424_v41, %v5264_v58  ;;  %v5196_v51 = vmul.f32 0.25, %v5164_v16 }
 0x3d5   : > { %v5291_v53 = vrot.slane %v5195_v26, 7  ;;  %v5197_v25 = vmul.f32 0.25, %v5165_v34  ;;  %v5167_v36 = vadd.f32 %v5763_v21, %v4955_v33  ;;  %v5260_v35 = vsel %vm5259_vm10, %v8413_v47, %v5258_v11 }
 0x3d6   : > { %v5278_v43 = vsel %vm5253_vm9, %v5277_v20, %v5190_v3  ;;  %v5166_v39 = vadd.f32 %v5762_v1, %v8408_v5  ;;  %v5266_v61 = vsel %vm5257_vm15, %v8424_v41, %v5265_v44 }
 0x3d7   : > { %v5292_v48 = vsel %vm5253_vm9, %v5291_v53, %v5194_v57  ;;  %v5298_v32 = vrot.slane %v5197_v25, 7  ;;  %v5199_v14 = vmul.f32 0.25, %v5167_v36  ;;  %v5267_v34 = vsel %vm5259_vm10, %v8424_v41, %v5266_v61 }
 0x3d8   : > { %v5293_v24 = vsel %vm5255_vm1, %v5291_v53, %v5292_v48  ;;  %v5198_v59 = vmul.f32 0.25, %v5166_v39 }
 0x3d9   : > { %v5294_v42 = vsel %vm5257_vm15, %v5291_v53, %v5293_v24  ;;  %v5299_v26 = vsel %vm5253_vm9, %v5298_v32, %v5196_v51  ;;  %v5305_v2 = vrot.slane %v5199_v14, 7 }
 0x3da   : > { %v5300_v50 = vsel %vm5255_vm1, %v5298_v32, %v5299_v26 }
 0x3db   : > { %v5301_v27 = vsel %vm5257_vm15, %v5298_v32, %v5300_v50 }
 0x401   : > { %v5861_v62 = vpop.f32.mrf.mxu1 }
 0x403   : > { %v4841_v49 = vpop.f32.mrf.mxu1 }
 0x404   : > { %v4876_v6 = vadd.f32 %v5861_v62, %v4841_v49  ;;  %v5192_v62 = vmul.f32 0.25, %v5160_v52 }
 0x405   : > { %v5862_v19 = vpop.f32.mrf.mxu1 }
 0x406   : > { %v8418_v15 = vrot.slane %v4876_v6, %v7306_v22  ;;  %v4956_v55 = vcombine.high %v4876_v6, %v4876_v6  ;;  %v5285_v9 = vsel %vm5253_vm9, %v5284_v30, %v5192_v62  ;;  %v5271_v6 = vsel %vm5253_vm9, %v5270_v54, %v5188_v29 }
 0x407   : > { %v4844_v38 = vpop.f32.mrf.mxu1  ;;  %v5286_v31 = vsel %vm5255_vm1, %v5284_v30, %v5285_v9  ;;  %v5272_v0 = vsel %vm5255_vm1, %v5270_v54, %v5271_v6  ;;  %v8489_v29 = vsel %vm5259_vm10, %v5298_v32, %v5301_v27 }
 0x408   : > { %v4971_v56 = vcombine.high %v8418_v15, %v8418_v15  ;;  %v8430_v8 = vrot.slane %v4956_v55, %v7306_v22  ;;  %v4877_v63 = vadd.f32 %v5862_v19, %v4844_v38  ;;  %v5287_v46 = vsel %vm5257_vm15, %v5284_v30, %v5286_v31 }
 0x409   : > { %v5764_v10 = vrot.slane %v8418_v15, 9  ;;  %v5279_v55 = vsel %vm5255_vm1, %v5277_v20, %v5278_v43  ;;  %v5288_v60 = vsel %vm5259_vm10, %v5284_v30, %v5287_v46  ;;  %v5295_v38 = vsel %vm5259_vm10, %v5291_v53, %v5294_v42 }
 0x40a   : > { %v5765_v13 = vrot.slane %v4971_v56, 9  ;;  %v4972_v7 = vcombine.high %v8430_v8, %v8430_v8  ;;  %v4973_v49 = vcombine.high %v4877_v63, %v4877_v63  ;;  %v4980_v40 = vrot.slane %v4877_v63, %v7306_v22 }
 0x40b   : > { %v5168_v47 = vadd.f32 %v5764_v10, %v8418_v15  ;;  %v5273_v21 = vsel %vm5257_vm15, %v5270_v54, %v5272_v0  ;;  %v5280_v28 = vsel %vm5257_vm15, %v5277_v20, %v5279_v55  ;;  %v5306_v63 = vsel %vm5253_vm9, %v5305_v2, %v5198_v59 }
 0x40c   : > { %v5169_v12 = vadd.f32 %v5765_v13, %v4971_v56  ;;  %v5767_v18 = vrot.slane %v4972_v7, 9  ;;  %v4987_v19 = vrot.slane %v4973_v49, %v7306_v22  ;;  %v4988_v33 = vcombine.high %v4980_v40, %v4980_v40 }
 0x40d   : > { %v5766_v56 = vrot.slane %v8430_v8, 9  ;;  %v5382_v37 = vcombine.low %v5260_v35, %v5288_v60  ;;  %v5400_v53 = vcombine.low %v5267_v34, %v5295_v38  ;;  %v5768_v57 = vrot.slane %v4980_v40, 9 }
 0x40e   : > { %v5201_v23 = vmul.f32 0.25, %v5169_v12  ;;  %v5171_v5 = vadd.f32 %v5767_v18, %v4972_v7  ;;  %v4989_v52 = vcombine.high %v4987_v19, %v4987_v19  ;;  %v5769_v45 = vrot.slane %v4988_v33, 9 }
 0x40f   : > { %v5200_v58 = vmul.f32 0.25, %v5168_v47  ;;  %v5770_v41 = vrot.slane %v4987_v19, 9  ;;  %v8477_v25 = vsel %vm5259_vm10, %v5270_v54, %v5273_v21  ;;  %v5307_v9 = vsel %vm5255_vm1, %v5305_v2, %v5306_v63 }
 0x410   : > { %v5312_v30 = vrot.slane %v5201_v23, 7  ;;  %v5203_v62 = vmul.f32 0.25, %v5171_v5  ;;  %v5771_v15 = vrot.slane %v4989_v52, 9  ;;  %v5170_v48 = vadd.f32 %v5766_v56, %v8430_v8 }
 0x411   : > { %v5173_v36 = vadd.f32 %v5769_v45, %v4988_v33  ;;  %v8482_v16 = vsel %vm5259_vm10, %v5277_v20, %v5280_v28  ;;  %v8486_v11 = vrot.slane %v5382_v37, %v8411_v17  ;;  %v5172_v3 = vadd.f32 %v5768_v57, %v4980_v40 }
 0x412   : > { %v5313_v7 = vsel %vm5253_vm9, %v5312_v30, %v5200_v58  ;;  %v8491_v54 = vrot.slane %v5203_v62, 7  ;;  %v5175_v1 = vadd.f32 %v5771_v15, %v4989_v52  ;;  %v8494_v8 = vrot.slane %v5400_v53, %v8411_v17 }
 0x413   : > { %v5174_v24 = vadd.f32 %v5770_v41, %v4987_v19  ;;  %v5308_v6 = vsel %vm5257_vm15, %v5305_v2, %v5307_v9  ;;  %v5202_v14 = vmul.f32 0.25, %v5170_v48  ;;  %v5314_v12 = vsel %vm5255_vm1, %v5312_v30, %v5313_v7 }
 0x414   : > { %v5205_v43 = vmul.f32 0.25, %v5173_v36  ;;  %v5418_v51 = vcombine.low %v8477_v25, %v8489_v29  ;;  %v5204_v10 = vmul.f32 0.25, %v5172_v3  ;;  %v5207_v42 = vmul.f32 0.25, %v5175_v1 }
 0x415   : > { %v5320_v19 = vsel %vm5253_vm9, %v8491_v54, %v5202_v14  ;;  %v8505_v26 = vsel %vm5259_vm10, %v5305_v2, %v5308_v6  ;;  %v5206_v33 = vmul.f32 0.25, %v5174_v24  ;;  %v5315_v55 = vsel %vm5257_vm15, %v5312_v30, %v5314_v12 }
 0x416   : > { %v5326_v23 = vrot.slane %v5205_v43, 7  ;;  %v5321_v60 = vsel %vm5255_vm1, %v8491_v54, %v5320_v19  ;;  %v5333_v47 = vrot.slane %v5207_v42, 7  ;;  %v5316_v63 = vsel %vm5259_vm10, %v5312_v30, %v5315_v55 }
 0x417   : > { %v5322_v36 = vsel %vm5257_vm15, %v8491_v54, %v5321_v60 }
 0x418   : > { %v5327_v37 = vsel %vm5253_vm9, %v5326_v23, %v5204_v10  ;;  %v5334_v41 = vsel %vm5253_vm9, %v5333_v47, %v5206_v33 }
 0x435   : > { %v5865_v4 = vpop.f32.mrf.mxu1 }
 0x437   : > { %v4857_v13 = vpop.f32.mrf.mxu1 }
 0x438   : > { %v4878_v49 = vadd.f32 %v5865_v4, %v4857_v13  ;;  %v5328_v13 = vsel %vm5255_vm1, %v5326_v23, %v5327_v37  ;;  %v5425_v37 = vrot.slane %v5418_v51, %v8411_v17 }
 0x439   : > { %v5866_v31 = vpop.f32.mrf.mxu1 }
 0x43a   : > { %v4990_v20 = vcombine.high %v4878_v49, %v4878_v49  ;;  %v4997_v44 = vrot.slane %v4878_v49, %v7306_v22 }
 0x43b   : > { %v4860_v32 = vpop.f32.mrf.mxu1 }
 0x43c   : > { %v5004_v40 = vrot.slane %v4990_v20, %v7306_v22  ;;  %v5005_v18 = vcombine.high %v4997_v44, %v4997_v44  ;;  %v5772_v46 = vrot.slane %v4997_v44, 9  ;;  %v4879_v39 = vadd.f32 %v5866_v31, %v4860_v32 }
 0x43d   : > { %v5335_v20 = vsel %vm5255_vm1, %v5333_v47, %v5334_v41 }
 0x43e   : > { %v5006_v35 = vcombine.high %v5004_v40, %v5004_v40  ;;  %v5773_v61 = vrot.slane %v5005_v18, 9  ;;  %v5774_v0 = vrot.slane %v5004_v40, 9  ;;  %v5007_v5 = vcombine.high %v4879_v39, %v4879_v39 }
 0x43f   : > { %v5014_v52 = vrot.slane %v4879_v39, %v7306_v22  ;;  %v5176_v59 = vadd.f32 %v5772_v46, %v4997_v44  ;;  %v5323_v39 = vsel %vm5259_vm10, %v8491_v54, %v5322_v36 }
 0x440   : > { %v5775_v38 = vrot.slane %v5006_v35, 9  ;;  %v5177_v50 = vadd.f32 %v5773_v61, %v5005_v18  ;;  %v5021_v2 = vrot.slane %v5007_v5, %v7306_v22  ;;  %v5178_v56 = vadd.f32 %v5774_v0, %v5004_v40 }
 0x441   : > { %v5022_v34 = vcombine.high %v5014_v52, %v5014_v52  ;;  %v5776_v21 = vrot.slane %v5014_v52, 9  ;;  %v5208_v57 = vmul.f32 0.25, %v5176_v59  ;;  %v5329_v18 = vsel %vm5257_vm15, %v5326_v23, %v5328_v13 }
 0x442   : > { %v5179_v45 = vadd.f32 %v5775_v38, %v5006_v35  ;;  %v5209_v28 = vmul.f32 0.25, %v5177_v50  ;;  %v5023_v53 = vcombine.high %v5021_v2, %v5021_v2  ;;  %v5778_v62 = vrot.slane %v5021_v2, 9 }
 0x443   : > { %v5777_v27 = vrot.slane %v5022_v34, 9  ;;  %v5180_v58 = vadd.f32 %v5776_v21, %v5014_v52  ;;  %v5210_v7 = vmul.f32 0.25, %v5178_v56  ;;  %v5336_v5 = vsel %vm5257_vm15, %v5333_v47, %v5335_v20 }
 0x444   : > { %v5211_v15 = vmul.f32 0.25, %v5179_v45  ;;  %v5340_v4 = vrot.slane %v5209_v28, 7  ;;  %v5779_v9 = vrot.slane %v5023_v53, 9  ;;  %v5182_v1 = vadd.f32 %v5778_v62, %v5021_v2 }
 0x445   : > { %v5181_v48 = vadd.f32 %v5777_v27, %v5022_v34  ;;  %v5212_v14 = vmul.f32 0.25, %v5180_v58  ;;  %v5330_v54 = vsel %vm5259_vm10, %v5326_v23, %v5329_v18  ;;  %v5436_v38 = vcombine.low %v8482_v16, %v8505_v26 }
 0x446   : > { %v5341_v30 = vsel %vm5253_vm9, %v5340_v4, %v5208_v57  ;;  %v5347_v49 = vrot.slane %v5211_v15, 7  ;;  %v5183_v31 = vadd.f32 %v5779_v9, %v5023_v53  ;;  %v5214_v10 = vmul.f32 0.25, %v5182_v1 }
 0x447   : > { %v5342_v3 = vsel %vm5255_vm1, %v5340_v4, %v5341_v30  ;;  %v5213_v24 = vmul.f32 0.25, %v5181_v48  ;;  %v5337_v56 = vsel %vm5259_vm10, %v5333_v47, %v5336_v5  ;;  %v5443_v15 = vrot.slane %v5436_v38, %v8411_v17 }
 0x448   : > { %v5343_v44 = vsel %vm5257_vm15, %v5340_v4, %v5342_v3  ;;  %v5348_v6 = vsel %vm5253_vm9, %v5347_v49, %v5210_v7  ;;  %v5215_v43 = vmul.f32 0.25, %v5183_v31 }
 0x449   : > { %v5349_v12 = vsel %vm5255_vm1, %v5347_v49, %v5348_v6  ;;  %v5354_v32 = vrot.slane %v5213_v24, 7  ;;  %v5344_v40 = vsel %vm5259_vm10, %v5340_v4, %v5343_v44 }
 0x44a   : > { %v5391_v46 = vcombine.low %v5316_v63, %v5344_v40  ;;  %v5350_v19 = vsel %vm5257_vm15, %v5347_v49, %v5349_v12  ;;  %v5361_v33 = vrot.slane %v5215_v43, 7 }
 0x44b   : > { %v5355_v42 = vsel %vm5253_vm9, %v5354_v32, %v5212_v14  ;;  %v5351_v35 = vsel %vm5259_vm10, %v5347_v49, %v5350_v19 }
 0x44c   : > { %v5356_v61 = vsel %vm5255_vm1, %v5354_v32, %v5355_v42  ;;  %v5398_v0 = vrot.slane %v5391_v46, %v8411_v17  ;;  %v5409_v55 = vcombine.low %v5323_v39, %v5351_v35  ;;  %v5362_v60 = vsel %vm5253_vm9, %v5361_v33, %v5214_v10 }
 0x44d   : > { %v5357_v52 = vsel %vm5257_vm15, %v5354_v32, %v5356_v61  ;;  %v5363_v59 = vsel %vm5255_vm1, %v5361_v33, %v5362_v60 }
 0x44e   : > { %v5780_v50 = vcombine.high %v8486_v11, %v5398_v0  ;;  %v5416_v2 = vrot.slane %v5409_v55, %v8411_v17  ;;  %v5358_v34 = vsel %vm5259_vm10, %v5354_v32, %v5357_v52  ;;  %v5364_v45 = vsel %vm5257_vm15, %v5361_v33, %v5363_v59 }
 0x44f   : > { %v5427_v21 = vcombine.low %v5330_v54, %v5358_v34  ;;  %v5456_v28 = vcombine.low %v8486_v11, %v5398_v0  ;;  %v5365_v26 = vsel %vm5259_vm10, %v5361_v33, %v5364_v45 }
 0x450   : > { %v5474_v23 = vrot.slane %v5780_v50, %v7306_v22  ;;  %v5480_v63 = vcombine.low %v8494_v8, %v5416_v2  ;;  %v5781_v16 = vcombine.high %v8494_v8, %v5416_v2  ;;  %v5445_v47 = vcombine.low %v5337_v56, %v5365_v26 }
 0x451   : > { %v5434_v53 = vrot.slane %v5427_v21, %v8411_v17  ;;  %v5463_v41 = vrot.slane %v5456_v28, %v7306_v22 }
 0x452   : > { %5475 = vrot.lane.b32.xlu0 %v5474_v23, %s6102_s28  ;;  %v5487_v11 = vrot.slane %v5480_v63, %v7306_v22  ;;  %v5452_v62 = vrot.slane %v5445_v47, %v8411_v17  ;;  %v5500_v8 = vrot.slane %v5781_v16, %v7306_v22  ;;  %s5669_s28 = sshll.u32 %s185_s27, 2 }
 0x453   : > { %v5506_v27 = vcombine.low %v5425_v37, %v5434_v53  ;;  %v5782_v57 = vcombine.high %v5425_v37, %v5434_v53 }
 0x454   : > { %5488 = vrot.lane.b32.xlu1 %v5487_v11, %s6104_s4  ;;  %v5532_v29 = vcombine.low %v5443_v15, %v5452_v62  ;;  %v5783_v4 = vcombine.high %v5443_v15, %v5452_v62  ;;  %s5579_s4 = sadd.s32 %s6080_s15, %s5785_s29  ;;  %s5568_s15 = scalar_lea.sflag [#allocation3], %s185_s27 }
 0x455   : > { %v5513_v25 = vrot.slane %v5506_v27, %v7306_v22  ;;  %v5526_v51 = vrot.slane %v5782_v57, %v7306_v22  ;;  %s5786_s5 = sshll.u32 %s5579_s4, 6 }
 0x456   : > { %5501 = vrot.lane.b32.xlu0 %v5500_v8, %s6100_s24  ;;  %v5539_v58 = vrot.slane %v5532_v29, %v7306_v22  ;;  %v5552_v17 = vrot.slane %v5783_v4, %v7306_v22  ;;  %s6113_s24 = smov 56   ;;  %s8579_s8 = scalar_lea.hbm %s8628_s3, %s5786_s5 }
 0x458   : > { %5514 = vrot.lane.b32.xlu1 %v5513_v25, %s6106_s6  ;;  %s187_s6 = scalar_lea.vmem [#allocation2], %s5669_s28 }
 0x459   : > { %s5583_s9 = sshll.u32 %s187_s6, 4  ;;  %s5584_s9 = int_to_ptr.vmem [resolvable:$true] %s5583_s9 }
 0x45a   : > { %5527 = vrot.lane.b32.xlu0 %v5526_v51, %s6111_s20  ;;  %s6004_s10 = scalar_lea.vmem %s5584_s9, 64  ;;  %s6008_s20 = sshll.u32 %s6114_s11, 4  ;;  %s6009_s20 = int_to_ptr.vmem [resolvable:$false] %s6008_s20 }
 0x45b   : > { %p6005_p0 = scmp.ne.s32.totalorder %s5584_s9, %s6004_s10  ;;  %p6011_p4 = scmp.lt.s32.totalorder %s5584_s9, %s6009_s20 }
 0x45c   : > { %5540 = vrot.lane.b32.xlu1 %v5539_v58, %s6112_s21  ;;  %s6010_s21 = scalar_lea.vmem %s6009_s20, 128 }
 0x45d   : > { %p6006_p1 = pnand %p6005_p0, %p6186_p3  ;;  %p6012_p5 = scmp.lt.s32.totalorder %s6010_s21, %s6004_s10 }
 0x45e   : > { %5553 = vrot.lane.b32.xlu0 %v5552_v17, %s6113_s24 }
 0x45f   : > { %p6007_p2 = pneg %p6006_p1  ;;  %p6013_p6 = por %p6012_p5, %p6011_p4 }
 0x461   : > { %p6014_p7 = pnand %p6013_p6, %p6007_p2 }
 0x4c4   : > { %v5476_v9 = vpop.permute.xlu0 %5475 }
 0x4c5   : > { %v5556_v48 = vsel %vm945_vm4, %v5463_v41, %v5476_v9  ;;  %vm5563_vm4 = vcmask 457728  }
 0x4c6   : > { %v5489_v36 = vpop.permute.xlu1 %5488 }
 0x4c7   : > { %v5557_v13 = vsel %vm1027_vm6, %v5556_v48, %v5489_v36  ;;  %vm5565_vm6 = vcmask 519168  }
 0x4c8   : > { %v5502_v7 = vpop.permute.xlu0 %5501 }
 0x4c9   : > { %v5558_v30 = vsel %vm1109_vm8, %v5557_v13, %v5502_v7 }
 0x4ca   : > { %v5515_v49 = vpop.permute.xlu1 %5514 }
 0x4cb   : > { %v5559_v3 = vsel %vm8685_vm3, %v5558_v30, %v5515_v49 }
 0x4cc   : > { %v5528_v1 = vpop.permute.xlu0 %5527 }
 0x4cd   : > { %v5560_v22 = vsel %vm4746_vm11, %v5559_v3, %v5528_v1 }
 0x4ce   : > { %v5541_v31 = vpop.permute.xlu1 %5540 }
 0x4cf   : > { %v5562_v24 = vsel %vm5561_vm13, %v5560_v22, %v5541_v31 }
 0x4d0   : > { %v5554_v20 = vpop.permute.xlu0 %5553 }
 0x4d1   : > { %v5564_v44 = vsel %vm5563_vm4, %v5562_v24, %v5554_v20 }
 0x4d2   : > { %5566 = vst.msk [vmem:[%s187_s6] sm:$0xf] %vm5565_vm6, %v5564_v44 }
 0x4d3   : > { %6017 = shalt.err (!%p6014_p7)
}
 0x4d4   : > { %s6018_s24 = scalar_lea.hbm %s8579_s8, 64  ;;  %s6022_s29 = scalar_lea.hbm %s8628_s3, 256 }
 0x4d5   : > { %p6019_p9 = scmp.ne.s32.totalorder %s8579_s8, %s6018_s24  ;;  %p6023_p12 = scmp.lt.s32.totalorder %s8579_s8, %s8628_s3 }
 0x4d6   : > { %p6024_p13 = scmp.lt.s32.totalorder %s6022_s29, %s6018_s24 }
 0x4d7   : > { %p6020_p10 = pnand %p6019_p9, %p6186_p3 }
 0x4d8   : > { %p6025_p0 = por %p6024_p13, %p6023_p12 }
 0x4d9   : > { %p6021_p11 = pneg %p6020_p10 }
 0x4db   : > { %p6026_p1 = pnand %p6025_p0, %p6021_p11 }
 0x4dd   : > { %6029 = shalt.err (!%p6026_p1)
}
 0x4de   : > { %5871 = dma.vmem_to_hbm [thread:$0]  (%p6186_p3), %s5584_s9, 64, %s8579_s8, %s5568_s15  }
 0x4df PF: > { %p5877_p2 = scmp.ge.s32.totalorder %s6096_s19, 2  ;;  %s5595_s6 = sand.u32 1, %s6068_s12  }
 0x4e0   : > { %s5596_s16 = scalar_lea.sflag [#allocation3], %s5595_s6 }
 0x4e1   : > { %p5874_p4 = pnand %p5877_p2, %p6195_p8 }
 0x4e3   : > { %p5875_p5 = pneg %p5874_p4 }
 0x4e5   : > { %6063 = dma.done.wait (%p5875_p5), %s5596_s16, 64  }
 0x4e6   : > { %6065 = vsyncadd (%p5875_p5), %s5596_s16, 4294967232  ;;  %s16_s19 = sadd.s32 1, %s6096_s19   ;;  %s8693_s12 = smov %s6072_s13 }
 0x4e7   : > { %p13_p6 = scmp.ge.s32.totalorder %s16_s19, 6   ;;  %s8694_s13 = smov %s6076_s14 }
 0x4e8   : > { %s8695_s14 = smov %s6204_s30  ;;  %s8696_s15 = smov %s6088_s17 }
 0x4e9   : > { %s8697_s16 = smov %s6092_s18  ;;  %s8698_s17 = smov %s8701_s22 }
 0x4ea   : > { %s8699_s18 = smov %s8705_s23  ;;  %15 = sbr.rel (!%p13_p6) target bundleno = 5 (0x5), region = 67 }
 0x4ef   :  { %5601 = vsyncpa [#allocation3], 1 }
 0x4f0   :  { %5603 = vsyncpa [#allocation3 + $0x1], 1 }

</bundles_post_ra>
